<compile_context>
chip_gen: v6e
topology: v6e:2x2x1
jax: 0.10.0
libtpu: 0.0.40
codegen_flags: <defaults>
</compile_context>

<pallas_src>
import numpy as np
import jax
import jax.numpy as jnp
from jax import lax
from jax.experimental import pallas as pl
from jax.experimental.pallas import tpu as pltpu


def make_kernel(num_layers, n_graphs, n_nodes, feat):
    G, N, F = n_graphs, n_nodes, feat

    def kernel(x_ref, a_ref, m_ref,
               wproj_ref, bproj_ref,
               wmsg_ref, bmsg_ref,
               wupd_ref, bupd_ref,
               watom_ref, batom_ref,
               out_ref):
        x = x_ref[...]        # (G*N, F_atom) bf16, already flattened in wrapper
        a = a_ref[...]        # (G*N, G*N)    bf16 block-diagonal adjacency
        mask = m_ref[...]     # (G, N)        f32

        # project_node_in_feats: Linear + ReLU (one MXU matmul, f32 accumulation)
        h0 = jnp.maximum(
            jnp.dot(x, wproj_ref[...], preferred_element_type=jnp.float32)
            + bproj_ref[...], 0.0)                               # (G*N, F) f32

        # GNN layers: fori_loop with dynamic indexing of the stacked weight refs
        # (bounds live ranges; one layer's slabs live at a time).
        def layer(l, h):
            h_bf = h.astype(jnp.bfloat16)
            msg = jnp.maximum(
                jnp.dot(h_bf, wmsg_ref[l], preferred_element_type=jnp.float32)
                + bmsg_ref[l], 0.0)                              # (G*N, F) f32
            # single full-depth block-diagonal aggregation matmul
            agg = jnp.dot(a, msg.astype(jnp.bfloat16),
                          preferred_element_type=jnp.float32)    # (G*N, F) f32
            # fused update: [h, agg] @ [wupd_h; wupd_m]  (K = 2F = 256)
            hm = jnp.concatenate([h_bf, agg.astype(jnp.bfloat16)], axis=-1)
            return jnp.maximum(
                jnp.dot(hm, wupd_ref[l], preferred_element_type=jnp.float32)
                + bupd_ref[l], 0.0)                              # (G*N, F) f32

        h = lax.fori_loop(0, num_layers, layer, h0)

        # WeightedSumAndMax readout (exact), f32
        h3 = h.reshape(G, N, F)
        logits = jnp.sum(h3 * watom_ref[...], axis=-1) + batom_ref[...]   # (G, N)
        gate = jax.nn.sigmoid(logits) * mask                              # (G, N)
        h_sum = jnp.sum(gate[:, :, None] * h3, axis=1)                    # (G, F)

        neg = jnp.finfo(jnp.float32).min
        h_max = jnp.max(jnp.where(mask[:, :, None] > 0.0, h3, neg), axis=1)
        has_nodes = jnp.max(mask, axis=1, keepdims=True)                  # (G, 1)
        h_max = jnp.where(has_nodes > 0.0, h_max, 0.0)  # empty graph -> 0 (DGL)

        # lane-dense (G, 2F) output, two 128-aligned lane-slice stores
        out_ref[:, :F] = h_sum
        out_ref[:, F:] = h_max

    return kernel


def _block_diag_adjacency(adj, graphs_per_step):
    """(B, N, N) -> (B//G, G*N, G*N) block-diagonal, same dtype."""
    B, N, _ = adj.shape
    G = graphs_per_step
    steps = B // G
    a = adj.reshape(steps, G, N, N)
    eye = jnp.eye(G, dtype=adj.dtype)
    bd = a[:, :, None, :, :] * eye[None, :, :, None, None]     # (S, G, G, N, N)
    return bd.transpose(0, 1, 3, 2, 4).reshape(steps, G * N, G * N)


def _graphs_per_step(batch):
    """grid=1 on single-TC v5e/v6e; >=2 parallel steps on 2-TC v7x."""
    try:
        kind = jax.devices()[0].device_kind.lower()
    except Exception:
        kind = ""
    if ("v7" in kind or "7x" in kind) and batch % 2 == 0:
        return batch // 2
    return batch


def _vmem_limit_bytes():
    """~80% of physical VMEM; never hand Mosaic the whole chip (v7x: 64 MiB)."""
    try:
        cap = pltpu.get_tpu_info().vmem_capacity_bytes
    except Exception:
        cap = 64 * 1024 * 1024          # conservative (v7x-sized) fallback
    return int(cap * 0.8)


def molecular_encoder(x, adj, mask, params, graphs_per_step=None):
    B, N, Fa = x.shape
    F = params["wproj"].shape[1]
    L = params["wmsg"].shape[0]
    G = _graphs_per_step(B) if graphs_per_step is None else graphs_per_step
    assert B % G == 0
    GN = G * N

    x_flat = x.reshape(B * N, Fa)                           # (B*N, Fa) bf16
    adj_bd = _block_diag_adjacency(adj, G)                   # (B//G, GN, GN) bf16

    def resident_spec(arr):
        nd = arr.ndim
        # constant block index + single buffering: weights stay resident in VMEM,
        # no re-DMA per step and no wasted second buffer.
        return pl.BlockSpec(arr.shape, lambda b, _nd=nd: (0,) * _nd,
                            pipeline_mode=pl.Buffered(1))

    out = pl.pallas_call(
        make_kernel(L, G, N, F),
        out_shape=jax.ShapeDtypeStruct((B, 2 * F), jnp.float32),
        grid=(B // G,),
        in_specs=[
            pl.BlockSpec((GN, Fa), lambda b: (b, 0)),
            pl.BlockSpec((None, GN, GN), lambda b: (b, 0, 0)),
            pl.BlockSpec((G, N), lambda b: (b, 0)),
            resident_spec(params["wproj"]), resident_spec(params["bproj"]),
            resident_spec(params["wmsg"]), resident_spec(params["bmsg"]),
            resident_spec(params["wupd"]), resident_spec(params["bupd"]),
            resident_spec(params["watom"]), resident_spec(params["batom"]),
        ],
        out_specs=pl.BlockSpec((G, 2 * F), lambda b: (b, 0)),
        compiler_params=pltpu.CompilerParams(
            dimension_semantics=("parallel",),
            vmem_limit_bytes=_vmem_limit_bytes()),
    )(x_flat, adj_bd, mask,
      params["wproj"], params["bproj"],
      params["wmsg"], params["bmsg"],
      params["wupd"], params["bupd"],
      params["watom"], params["batom"])
    return out


def reference(x, adj, mask, params):
    """Pure-JAX reference of the same computation (same bf16/f32 mixed precision)."""
    L = params["wmsg"].shape[0]
    B, N, Fa = x.shape
    F = params["wproj"].shape[1]

    xf = x.reshape(B * N, Fa)
    h = jnp.maximum(
        jnp.dot(xf, params["wproj"], preferred_element_type=jnp.float32)
        + params["bproj"], 0.0)
    for l in range(L):
        h_bf = h.astype(jnp.bfloat16)
        msg = jnp.maximum(
            jnp.dot(h_bf, params["wmsg"][l], preferred_element_type=jnp.float32)
            + params["bmsg"][l], 0.0)
        agg = jnp.einsum('bij,bjf->bif', adj,
                         msg.reshape(B, N, F).astype(jnp.bfloat16),
                         preferred_element_type=jnp.float32).reshape(B * N, F)
        hm = jnp.concatenate([h_bf, agg.astype(jnp.bfloat16)], axis=-1)
        h = jnp.maximum(
            jnp.dot(hm, params["wupd"][l], preferred_element_type=jnp.float32)
            + params["bupd"][l], 0.0)

    h3 = h.reshape(B, N, F)
    logits = jnp.sum(h3 * params["watom"], axis=-1) + params["batom"]
    gate = jax.nn.sigmoid(logits) * mask
    h_sum = jnp.sum(gate[:, :, None] * h3, axis=1)
    neg = jnp.finfo(jnp.float32).min
    h_max = jnp.max(jnp.where(mask[:, :, None] > 0.0, h3, neg), axis=1)
    has_nodes = jnp.max(mask, axis=1, keepdims=True)
    h_max = jnp.where(has_nodes > 0.0, h_max, 0.0)
    return jnp.concatenate([h_sum, h_max], axis=-1)


def init_params(key, f_atom, f, num_layers, scale=0.05):
    ks = jax.random.split(key, 8)
    bf = jnp.bfloat16
    return {
        # matmul weights stored in bf16 (MXU inputs); biases / readout gate in f32
        "wproj": (scale * jax.random.normal(ks[0], (f_atom, f), jnp.float32)).astype(bf),
        "bproj": scale * jax.random.normal(ks[1], (1, f), jnp.float32),
        "wmsg": (scale * jax.random.normal(ks[2], (num_layers, f, f), jnp.float32)).astype(bf),
        "bmsg": scale * jax.random.normal(ks[3], (num_layers, 1, f), jnp.float32),
        # fused update weight: [wupd_h; wupd_m]  -> (L, 2F, F)
        "wupd": (scale * jax.random.normal(ks[4], (num_layers, 2 * f, f), jnp.float32)).astype(bf),
        "bupd": scale * jax.random.normal(ks[5], (num_layers, 1, f), jnp.float32),
        "watom": scale * jax.random.normal(ks[6], (1, f), jnp.float32),
        "batom": jnp.zeros((1, 1), jnp.float32),
    }


if __name__ == "__main__":
    # small demo config (lane/sublane-aligned: F=128 -> 2F=256, N=16)
    B, N, F_ATOM, F, L = 16, 16, 128, 128, 3

    key = jax.random.PRNGKey(0)
    k_x, k_a, k_p = jax.random.split(key, 3)

    # node features
    x = jax.random.normal(k_x, (B, N, F_ATOM), jnp.float32)

    # node mask: first half of the batch has N nodes, second half N-3
    n_nodes = np.array([N] * (B // 2) + [N - 3] * (B // 2))
    mask_np = np.zeros((B, N), np.float32)
    for b in range(B):
        mask_np[b, : n_nodes[b]] = 1.0
    mask = jnp.asarray(mask_np)

    # deterministic symmetric 0/1 adjacency with self loops, restricted to real nodes
    a_rand = np.asarray(jax.random.uniform(k_a, (B, N, N))) > 0.6
    adj_np = np.asarray(a_rand, np.float32)
    adj_np = np.maximum(adj_np, np.transpose(adj_np, (0, 2, 1)))
    adj_np = np.minimum(adj_np + np.eye(N, dtype=np.float32)[None], 1.0)
    adj_np *= mask_np[:, :, None] * mask_np[:, None, :]
    adj = jnp.asarray(adj_np, jnp.bfloat16)          # 0/1 values: exact in bf16

    # zero features of padded nodes; bf16 inputs for the MXU
    x = (x * mask[:, :, None]).astype(jnp.bfloat16)

    params = init_params(k_p, F_ATOM, F, L)

    out = jax.block_until_ready(molecular_encoder(x, adj, mask, params))
    ref = jax.block_until_ready(reference(x, adj, mask, params))

    np.testing.assert_allclose(np.asarray(out), np.asarray(ref),
                               rtol=2e-2, atol=2e-2)
    assert out.shape == (B, 2 * F)

    print("KERNEL_OK")
</pallas_src>

<mosaic_0001>
module attributes {stable_mosaic.version = 11 : i64} {
  func.func @kernel(%arg0: i32, %arg1: memref<256x128xbf16, #tpu.memory_space<vmem>>, %arg2: memref<1x256x256xbf16, #tpu.memory_space<vmem>>, %arg3: memref<16x16xf32, #tpu.memory_space<vmem>>, %arg4: memref<128x128xbf16, #tpu.memory_space<vmem>>, %arg5: memref<1x128xf32, #tpu.memory_space<vmem>>, %arg6: memref<3x128x128xbf16, #tpu.memory_space<vmem>>, %arg7: memref<3x1x128xf32, #tpu.memory_space<vmem>>, %arg8: memref<3x256x128xbf16, #tpu.memory_space<vmem>>, %arg9: memref<3x1x128xf32, #tpu.memory_space<vmem>>, %arg10: memref<1x128xf32, #tpu.memory_space<vmem>>, %arg11: memref<1x1xf32, #tpu.memory_space<vmem>>, %arg12: memref<16x256xf32, #tpu.memory_space<vmem>>) attributes {dimension_semantics = [#tpu.dimension_semantics<parallel>], iteration_bounds = array<i64: 1>, scalar_prefetch = 0 : i64, scratch_operands = 0 : i64, tpu.core_type = #tpu.core_type<tc>, window_params = [{transform_indices = @transform_0, window_bounds = array<i64: 256, 128>}, {transform_indices = @transform_1, window_bounds = array<i64: 1, 256, 256>}, {transform_indices = @transform_2, window_bounds = array<i64: 16, 16>}, {pipeline_mode = #tpu.pipeline_mode<synchronous>, transform_indices = @transform_3, window_bounds = array<i64: 128, 128>}, {pipeline_mode = #tpu.pipeline_mode<synchronous>, transform_indices = @transform_4, window_bounds = array<i64: 1, 128>}, {pipeline_mode = #tpu.pipeline_mode<synchronous>, transform_indices = @transform_5, window_bounds = array<i64: 3, 128, 128>}, {pipeline_mode = #tpu.pipeline_mode<synchronous>, transform_indices = @transform_6, window_bounds = array<i64: 3, 1, 128>}, {pipeline_mode = #tpu.pipeline_mode<synchronous>, transform_indices = @transform_7, window_bounds = array<i64: 3, 256, 128>}, {pipeline_mode = #tpu.pipeline_mode<synchronous>, transform_indices = @transform_8, window_bounds = array<i64: 3, 1, 128>}, {pipeline_mode = #tpu.pipeline_mode<synchronous>, transform_indices = @transform_9, window_bounds = array<i64: 1, 128>}, {pipeline_mode = #tpu.pipeline_mode<synchronous>, transform_indices = @transform_10, window_bounds = array<i64: 1, 1>}, {transform_indices = @transform_11, window_bounds = array<i64: 16, 256>}]} {
    %c0 = arith.constant 0 : index
    %c0_0 = arith.constant 0 : index
    %0 = vector.load %arg1[%c0, %c0_0] : memref<256x128xbf16, #tpu.memory_space<vmem>>, vector<256x128xbf16>
    %c0_1 = arith.constant 0 : index
    %c0_2 = arith.constant 0 : index
    %c0_3 = arith.constant 0 : index
    %1 = vector.load %arg2[%c0_1, %c0_2, %c0_3] : memref<1x256x256xbf16, #tpu.memory_space<vmem>>, vector<1x256x256xbf16>
    %2 = vector.shape_cast %1 : vector<1x256x256xbf16> to vector<256x256xbf16>
    %c0_4 = arith.constant 0 : index
    %c0_5 = arith.constant 0 : index
    %3 = vector.load %arg3[%c0_4, %c0_5] : memref<16x16xf32, #tpu.memory_space<vmem>>, vector<16x16xf32>
    %c0_6 = arith.constant 0 : index
    %c0_7 = arith.constant 0 : index
    %4 = vector.load %arg4[%c0_6, %c0_7] : memref<128x128xbf16, #tpu.memory_space<vmem>>, vector<128x128xbf16>
    %cst = arith.constant dense<0.000000e+00> : vector<256x128xf32>
    %5 = tpu.matmul %0, %4, %cst {dimension_numbers = #tpu.dot_dimension_numbers<[1], [0], [0], [1], [0, 0, 1, 1], [], []>} : vector<256x128xbf16>, vector<128x128xbf16>, vector<256x128xf32> -> vector<256x128xf32>
    %c0_8 = arith.constant 0 : index
    %c0_9 = arith.constant 0 : index
    %6 = vector.load %arg5[%c0_8, %c0_9] : memref<1x128xf32, #tpu.memory_space<vmem>>, vector<1x128xf32>
    %7 = vector.broadcast %6 : vector<1x128xf32> to vector<256x128xf32>
    %8 = arith.addf %5, %7 : vector<256x128xf32>
    %cst_10 = arith.constant 0.000000e+00 : f32
    %9 = vector.broadcast %cst_10 : f32 to vector<256x128xf32>
    %10 = arith.maximumf %8, %9 : vector<256x128xf32>
    %c0_i32 = arith.constant 0 : i32
    %c3_i32 = arith.constant 3 : i32
    %11 = arith.addi %c0_i32, %c3_i32 : i32
    %c1_i32 = arith.constant 1 : i32
    %12 = scf.for %arg13 = %c0_i32 to %11 step %c1_i32 iter_args(%arg14 = %10) -> (vector<256x128xf32>)  : i32 {
      %50 = arith.truncf %arg14 : vector<256x128xf32> to vector<256x128xbf16>
      %51 = arith.index_cast %arg13 : i32 to index
      %c0_28 = arith.constant 0 : index
      %c0_29 = arith.constant 0 : index
      %52 = vector.load %arg6[%51, %c0_28, %c0_29] : memref<3x128x128xbf16, #tpu.memory_space<vmem>>, vector<1x128x128xbf16>
      %53 = vector.shape_cast %52 : vector<1x128x128xbf16> to vector<128x128xbf16>
      %cst_30 = arith.constant dense<0.000000e+00> : vector<256x128xf32>
      %54 = tpu.matmul %50, %53, %cst_30 {dimension_numbers = #tpu.dot_dimension_numbers<[1], [0], [0], [1], [0, 0, 1, 1], [], []>} : vector<256x128xbf16>, vector<128x128xbf16>, vector<256x128xf32> -> vector<256x128xf32>
      %55 = arith.index_cast %arg13 : i32 to index
      %c0_31 = arith.constant 0 : index
      %c0_32 = arith.constant 0 : index
      %56 = vector.load %arg7[%55, %c0_31, %c0_32] : memref<3x1x128xf32, #tpu.memory_space<vmem>>, vector<1x1x128xf32>
      %57 = vector.shape_cast %56 : vector<1x1x128xf32> to vector<1x128xf32>
      %58 = vector.broadcast %57 : vector<1x128xf32> to vector<256x128xf32>
      %59 = arith.addf %54, %58 : vector<256x128xf32>
      %cst_33 = arith.constant 0.000000e+00 : f32
      %60 = vector.broadcast %cst_33 : f32 to vector<256x128xf32>
      %61 = arith.maximumf %59, %60 : vector<256x128xf32>
      %62 = arith.truncf %61 : vector<256x128xf32> to vector<256x128xbf16>
      %cst_34 = arith.constant dense<0.000000e+00> : vector<256x128xf32>
      %63 = tpu.matmul %2, %62, %cst_34 {dimension_numbers = #tpu.dot_dimension_numbers<[1], [0], [0], [1], [0, 0, 1, 1], [], []>} : vector<256x256xbf16>, vector<256x128xbf16>, vector<256x128xf32> -> vector<256x128xf32>
      %64 = arith.truncf %63 : vector<256x128xf32> to vector<256x128xbf16>
      %65 = tpu.concatenate %50, %64 in 1 : vector<256x128xbf16>, vector<256x128xbf16> -> vector<256x256xbf16>
      %66 = arith.index_cast %arg13 : i32 to index
      %c0_35 = arith.constant 0 : index
      %c0_36 = arith.constant 0 : index
      %67 = vector.load %arg8[%66, %c0_35, %c0_36] : memref<3x256x128xbf16, #tpu.memory_space<vmem>>, vector<1x256x128xbf16>
      %68 = vector.shape_cast %67 : vector<1x256x128xbf16> to vector<256x128xbf16>
      %cst_37 = arith.constant dense<0.000000e+00> : vector<256x128xf32>
      %69 = tpu.matmul %65, %68, %cst_37 {dimension_numbers = #tpu.dot_dimension_numbers<[1], [0], [0], [1], [0, 0, 1, 1], [], []>} : vector<256x256xbf16>, vector<256x128xbf16>, vector<256x128xf32> -> vector<256x128xf32>
      %70 = arith.index_cast %arg13 : i32 to index
      %c0_38 = arith.constant 0 : index
      %c0_39 = arith.constant 0 : index
      %71 = vector.load %arg9[%70, %c0_38, %c0_39] : memref<3x1x128xf32, #tpu.memory_space<vmem>>, vector<1x1x128xf32>
      %72 = vector.shape_cast %71 : vector<1x1x128xf32> to vector<1x128xf32>
      %73 = vector.broadcast %72 : vector<1x128xf32> to vector<256x128xf32>
      %74 = arith.addf %69, %73 : vector<256x128xf32>
      %cst_40 = arith.constant 0.000000e+00 : f32
      %75 = vector.broadcast %cst_40 : f32 to vector<256x128xf32>
      %76 = arith.maximumf %74, %75 : vector<256x128xf32>
      scf.yield %76 : vector<256x128xf32>
    }
    %c3_i32_11 = arith.constant 3 : i32
    %13 = vector.shape_cast %12 : vector<256x128xf32> to vector<16x16x128xf32>
    %c0_12 = arith.constant 0 : index
    %c0_13 = arith.constant 0 : index
    %14 = vector.load %arg10[%c0_12, %c0_13] : memref<1x128xf32, #tpu.memory_space<vmem>>, vector<1x128xf32>
    %15 = vector.shape_cast %14 : vector<1x128xf32> to vector<1x1x128xf32>
    %16 = vector.broadcast %15 : vector<1x1x128xf32> to vector<16x16x128xf32>
    %17 = arith.mulf %13, %16 : vector<16x16x128xf32>
    %cst_14 = arith.constant dense<0.000000e+00> : vector<16x16xf32>
    %18 = vector.multi_reduction <add>, %17, %cst_14 [2] : vector<16x16x128xf32> to vector<16x16xf32>
    %c0_15 = arith.constant 0 : index
    %c0_16 = arith.constant 0 : index
    %19 = vector.load %arg11[%c0_15, %c0_16] : memref<1x1xf32, #tpu.memory_space<vmem>>, vector<1x1xf32>
    %20 = vector.broadcast %19 : vector<1x1xf32> to vector<16x16xf32>
    %21 = arith.addf %18, %20 : vector<16x16xf32>
    %22 = arith.negf %21 : vector<16x16xf32>
    %23 = math.exp %22 : vector<16x16xf32>
    %cst_17 = arith.constant 1.000000e+00 : f32
    %24 = vector.broadcast %cst_17 : f32 to vector<16x16xf32>
    %25 = arith.addf %24, %23 : vector<16x16xf32>
    %26 = arith.divf %24, %25 : vector<16x16xf32>
    %27 = arith.mulf %26, %3 : vector<16x16xf32>
    %28 = vector.shape_cast %27 : vector<16x16xf32> to vector<16x16x1xf32>
    %29 = vector.broadcast %28 : vector<16x16x1xf32> to vector<16x16x128xf32>
    %30 = arith.mulf %29, %13 : vector<16x16x128xf32>
    %cst_18 = arith.constant dense<0.000000e+00> : vector<16x128xf32>
    %31 = vector.multi_reduction <add>, %30, %cst_18 [1] : vector<16x16x128xf32> to vector<16x128xf32>
    %32 = vector.shape_cast %3 : vector<16x16xf32> to vector<16x16x1xf32>
    %cst_19 = arith.constant 0.000000e+00 : f32
    %33 = vector.broadcast %cst_19 : f32 to vector<16x16x1xf32>
    %34 = arith.cmpf ogt, %32, %33 : vector<16x16x1xf32>
    %cst_20 = arith.constant -3.40282347E+38 : f32
    %35 = vector.shape_cast %34 : vector<16x16x1xi1> to vector<16x16x1xi1>
    %36 = vector.broadcast %35 : vector<16x16x1xi1> to vector<16x16x128xi1>
    %37 = vector.broadcast %cst_20 : f32 to vector<16x16x128xf32>
    %38 = arith.select %36, %13, %37 : vector<16x16x128xi1>, vector<16x16x128xf32>
    %cst_21 = arith.constant dense<0xFF800000> : vector<16x128xf32>
    %39 = vector.multi_reduction <maximumf>, %38, %cst_21 [1] : vector<16x16x128xf32> to vector<16x128xf32>
    %cst_22 = arith.constant dense<0xFF800000> : vector<16xf32>
    %40 = vector.multi_reduction <maximumf>, %3, %cst_22 [1] : vector<16x16xf32> to vector<16xf32>
    %41 = vector.shape_cast %40 : vector<16xf32> to vector<16x1xf32>
    %cst_23 = arith.constant 0.000000e+00 : f32
    %42 = vector.broadcast %cst_23 : f32 to vector<16x1xf32>
    %43 = arith.cmpf ogt, %41, %42 : vector<16x1xf32>
    %cst_24 = arith.constant 0.000000e+00 : f32
    %44 = vector.shape_cast %43 : vector<16x1xi1> to vector<16x1xi1>
    %45 = vector.broadcast %44 : vector<16x1xi1> to vector<16x128xi1>
    %46 = vector.broadcast %cst_24 : f32 to vector<16x128xf32>
    %47 = arith.select %45, %39, %46 : vector<16x128xi1>, vector<16x128xf32>
    %c0_25 = arith.constant 0 : index
    %c0_26 = arith.constant 0 : index
    %48 = vector.load %arg12[%c0_25, %c0_26] : memref<16x256xf32, #tpu.memory_space<vmem>>, vector<16x128xf32>
    tpu.vector_store %arg12[%c0_25, %c0_26], %31 {strides = array<i32>} : memref<16x256xf32, #tpu.memory_space<vmem>>, vector<16x128xf32>,
    %c0_27 = arith.constant 0 : index
    %c128 = arith.constant 128 : index
    %49 = vector.load %arg12[%c0_27, %c128] : memref<16x256xf32, #tpu.memory_space<vmem>>, vector<16x128xf32>
    tpu.vector_store %arg12[%c0_27, %c128], %47 {strides = array<i32>} : memref<16x256xf32, #tpu.memory_space<vmem>>, vector<16x128xf32>,
    return
  }
  func.func @transform_0(%arg0: i32) -> (i32, i32) {
    %c0_i32 = arith.constant 0 : i32
    %c0_i32_0 = arith.constant 0 : i32
    return %arg0, %c0_i32 : i32, i32
  }
  func.func @transform_1(%arg0: i32) -> (i32, i32, i32) {
    %c0_i32 = arith.constant 0 : i32
    %c0_i32_0 = arith.constant 0 : i32
    %c0_i32_1 = arith.constant 0 : i32
    return %arg0, %c0_i32, %c0_i32_0 : i32, i32, i32
  }
  func.func @transform_2(%arg0: i32) -> (i32, i32) {
    %c0_i32 = arith.constant 0 : i32
    %c0_i32_0 = arith.constant 0 : i32
    return %arg0, %c0_i32 : i32, i32
  }
  func.func @transform_3(%arg0: i32) -> (i32, i32) {
    %c0_i32 = arith.constant 0 : i32
    %c0_i32_0 = arith.constant 0 : i32
    %c0_i32_1 = arith.constant 0 : i32
    return %c0_i32, %c0_i32_0 : i32, i32
  }
  func.func @transform_4(%arg0: i32) -> (i32, i32) {
    %c0_i32 = arith.constant 0 : i32
    %c0_i32_0 = arith.constant 0 : i32
    %c0_i32_1 = arith.constant 0 : i32
    return %c0_i32, %c0_i32_0 : i32, i32
  }
  func.func @transform_5(%arg0: i32) -> (i32, i32, i32) {
    %c0_i32 = arith.constant 0 : i32
    %c0_i32_0 = arith.constant 0 : i32
    %c0_i32_1 = arith.constant 0 : i32
    %c0_i32_2 = arith.constant 0 : i32
    return %c0_i32, %c0_i32_0, %c0_i32_1 : i32, i32, i32
  }
  func.func @transform_6(%arg0: i32) -> (i32, i32, i32) {
    %c0_i32 = arith.constant 0 : i32
    %c0_i32_0 = arith.constant 0 : i32
    %c0_i32_1 = arith.constant 0 : i32
    %c0_i32_2 = arith.constant 0 : i32
    return %c0_i32, %c0_i32_0, %c0_i32_1 : i32, i32, i32
  }
  func.func @transform_7(%arg0: i32) -> (i32, i32, i32) {
    %c0_i32 = arith.constant 0 : i32
    %c0_i32_0 = arith.constant 0 : i32
    %c0_i32_1 = arith.constant 0 : i32
    %c0_i32_2 = arith.constant 0 : i32
    return %c0_i32, %c0_i32_0, %c0_i32_1 : i32, i32, i32
  }
  func.func @transform_8(%arg0: i32) -> (i32, i32, i32) {
    %c0_i32 = arith.constant 0 : i32
    %c0_i32_0 = arith.constant 0 : i32
    %c0_i32_1 = arith.constant 0 : i32
    %c0_i32_2 = arith.constant 0 : i32
    return %c0_i32, %c0_i32_0, %c0_i32_1 : i32, i32, i32
  }
  func.func @transform_9(%arg0: i32) -> (i32, i32) {
    %c0_i32 = arith.constant 0 : i32
    %c0_i32_0 = arith.constant 0 : i32
    %c0_i32_1 = arith.constant 0 : i32
    return %c0_i32, %c0_i32_0 : i32, i32
  }
  func.func @transform_10(%arg0: i32) -> (i32, i32) {
    %c0_i32 = arith.constant 0 : i32
    %c0_i32_0 = arith.constant 0 : i32
    %c0_i32_1 = arith.constant 0 : i32
    return %c0_i32, %c0_i32_0 : i32, i32
  }
  func.func @transform_11(%arg0: i32) -> (i32, i32) {
    %c0_i32 = arith.constant 0 : i32
    %c0_i32_0 = arith.constant 0 : i32
    return %arg0, %c0_i32 : i32, i32
  }
}

</mosaic_0001>

<bundles_post_ra>
// kernel: tpu_custom_call.1
= control target key start
LH: loop header
LB: loop body
LE: loop exit
PB: predicated region body
PF: predicated region fallthrough
CT: control target
= control target key end

     0   :  { %s5870_s0 = inlined_call_operand.hbm [shape: bf16[256,128], index: 0, kind: input, shape index: {}]   ;;  %s5871_s1 = inlined_call_operand.hbm [shape: bf16[1,256,256], index: 1, kind: input, shape index: {}]   ;;  %s5872_s2 = inlined_call_operand.hbm [shape: f32[16,16], index: 2, kind: input, shape index: {}]   ;;  %s5873_s3 = inlined_call_operand.hbm [shape: bf16[128,128], index: 3, kind: input, shape index: {}]   ;;  %s5874_s4 = inlined_call_operand.vmem [shape: f32[1,128], index: 4, kind: input, shape index: {}]   ;;  %s5875_s5 = inlined_call_operand.hbm [shape: bf16[3,128,128], index: 5, kind: input, shape index: {}]   ;;  %s5876_s6 = inlined_call_operand.vmem [shape: f32[3,1,128], index: 6, kind: input, shape index: {}]   ;;  %s5877_s7 = inlined_call_operand.hbm [shape: bf16[3,256,128], index: 7, kind: input, shape index: {}]   ;;  %s5878_s8 = inlined_call_operand.vmem [shape: f32[3,1,128], index: 8, kind: input, shape index: {}]   ;;  %s5879_s9 = inlined_call_operand.vmem [shape: f32[1,128], index: 9, kind: input, shape index: {}]   ;;  %s5880_s10 = inlined_call_operand.<no memory space> [shape: f32[1,1], index: 10, kind: input, shape index: {}]   ;;  %s5881_s11 = inlined_call_operand.hbm [shape: f32[16,256], index: 11, kind: output, shape index: {}]  }
   0x1   :  { %v16_v0 = vstv %s5880_s10 }
   0x2   :  { %17 = vst [vmem:[#allocation2] sm:$0x1] %v16_v0 }
   0x3   :  { %18 = vsyncpa [#allocation4], 0 }
   0x4   :  { %19 = vsyncpa [#allocation7], 0 }
   0x5   :  { %20 = vsyncpa [#allocation10], 0 }
   0x6   :  { %21 = vsyncpa [#allocation13], 0 }
   0x7   :  { %22 = vsyncpa [#allocation5], 0  ;;  %s4466_s19 = smov [#allocation6]  }
   0x8   :  { %s40_s20 = sshll.u32 %s4466_s19, 4  ;;  %s41_s20 = int_to_ptr.vmem [resolvable:$true] %s40_s20 }
   0x9   :  { %s4060_s21 = scalar_lea.vmem %s41_s20, 4096  ;;  %p4065_p1 = scmp.lt.s32.totalorder %s41_s20, %s41_s20 }
   0xa   :  { %p4061_p0 = scmp.ne.s32.totalorder %s41_s20, %s4060_s21  ;;  %p4066_p2 = scmp.lt.s32.totalorder %s4060_s21, %s4060_s21 }
   0xc   :  { %p4067_p3 = por %p4066_p2, %p4065_p1 }
   0xe   :  { %p4068_p4 = pnand %p4067_p3, %p4061_p0 }
  0x10   :  { %4071 = shalt.err (!%p4068_p4)
}
  0x11   :  { %s4467_s22 = smov 128   ;;  %s4468_s23 = smov 8  }
  0x12   :  { %46 = dma.hbm_to_vmem [thread:$0]  %s5871_s1, 4096, %s41_s20, [#allocation7], %s4467_s22, %s4467_s22, %s4468_s23  }
  0x13   :  { %s4469_s25 = smov [#allocation9]   ;;  %s4470_s27 = smov [#allocation3]  }
  0x14   :  { %s64_s26 = sshll.u32 %s4469_s25, 4  ;;  %s28_s28 = sshll.u32 %s4470_s27, 4  ;;  %s65_s26 = int_to_ptr.vmem [resolvable:$true] %s64_s26  ;;  %s29_s28 = int_to_ptr.vmem [resolvable:$true] %s28_s28 }
  0x15   :  { %s4080_s29 = scalar_lea.vmem %s65_s26, 1024  ;;  %p4085_p6 = scmp.lt.s32.totalorder %s65_s26, %s65_s26 }
  0x16   :  { %p4081_p5 = scmp.ne.s32.totalorder %s65_s26, %s4080_s29  ;;  %p4086_p7 = scmp.lt.s32.totalorder %s4080_s29, %s4080_s29 }
  0x18   :  { %p4087_p8 = por %p4086_p7, %p4085_p6 }
  0x1a   :  { %p4088_p9 = pnand %p4087_p8, %p4081_p5 }
  0x1c   :  { %4091 = shalt.err (!%p4088_p9)
}
  0x1d   :  { %s4471_s30 = smov 64   ;;  %s4472_s12 = smov 4  }
  0x1e   :  { %70 = dma.hbm_to_vmem [thread:$0]  %s5873_s3, 1024, %s65_s26, [#allocation10], %s4471_s30, %s4471_s30, %s4472_s12  }
  0x1f   :  { %s4100_s1 = scalar_lea.vmem %s29_s28, 2048  ;;  %p4105_p11 = scmp.lt.s32.totalorder %s29_s28, %s29_s28 }
  0x20   :  { %p4101_p10 = scmp.ne.s32.totalorder %s29_s28, %s4100_s1  ;;  %p4106_p12 = scmp.lt.s32.totalorder %s4100_s1, %s4100_s1 }
  0x22   :  { %p4107_p13 = por %p4106_p12, %p4105_p11 }
  0x24   :  { %p4108_p0 = pnand %p4107_p13, %p4101_p10 }
  0x26   :  { %4111 = shalt.err (!%p4108_p0)
}
  0x27   :  { %34 = dma.hbm_to_vmem [thread:$0]  %s5870_s0, 2048, %s29_s28, [#allocation4], %s4471_s30, %s4471_s30, %s4472_s12  }
  0x28   :  { %s4473_s17 = smov [#allocation8]   ;;  %s4474_s19 = smov [#allocation11]  }
  0x29   :  { %s52_s18 = sshll.u32 %s4473_s17, 4  ;;  %s78_s3 = sshll.u32 %s4474_s19, 4  ;;  %s53_s18 = int_to_ptr.vmem [resolvable:$true] %s52_s18  ;;  %s79_s3 = int_to_ptr.vmem [resolvable:$true] %s78_s3 }
  0x2a   :  { %s4120_s20 = scalar_lea.vmem %s53_s18, 256  ;;  %p4125_p2 = scmp.lt.s32.totalorder %s53_s18, %s53_s18 }
  0x2b   :  { %p4121_p1 = scmp.ne.s32.totalorder %s53_s18, %s4120_s20  ;;  %p4126_p3 = scmp.lt.s32.totalorder %s4120_s20, %s4120_s20 }
  0x2d   :  { %p4127_p4 = por %p4126_p3, %p4125_p2 }
  0x2f   :  { %p4128_p5 = pnand %p4127_p4, %p4121_p1 }
  0x31   :  { %4131 = shalt.err (!%p4128_p5)
}
  0x32   :  { %58 = dma.hbm_to_vmem [thread:$0]  %s5872_s2, 256, %s53_s18, [#allocation7], %s4467_s22, %s4467_s22, %s4468_s23  }
  0x33   :  { %s4140_s0 = scalar_lea.vmem %s79_s3, 3072  ;;  %p4145_p7 = scmp.lt.s32.totalorder %s79_s3, %s79_s3 }
  0x34   :  { %p4141_p6 = scmp.ne.s32.totalorder %s79_s3, %s4140_s0  ;;  %p4146_p8 = scmp.lt.s32.totalorder %s4140_s0, %s4140_s0 }
  0x36   :  { %p4147_p9 = por %p4146_p8, %p4145_p7 }
  0x38   :  { %p4148_p10 = pnand %p4147_p9, %p4141_p6 }
  0x3a   :  { %4151 = shalt.err (!%p4148_p10)
}
  0x3b   :  { %84 = dma.hbm_to_vmem [thread:$0]  %s5875_s5, 3072, %s79_s3, [#allocation10], %s4471_s30, %s4471_s30, %s4472_s12  }
  0x3c   :  { %s4475_s26 = smov [#allocation12]  }
  0x3d   :  { %s92_s27 = sshll.u32 %s4475_s26, 4  ;;  %s93_s27 = int_to_ptr.vmem [resolvable:$true] %s92_s27 }
  0x3e   :  { %s4160_s28 = scalar_lea.vmem %s93_s27, 6144  ;;  %p4165_p12 = scmp.lt.s32.totalorder %s93_s27, %s93_s27 }
  0x3f   :  { %p4161_p11 = scmp.ne.s32.totalorder %s93_s27, %s4160_s28  ;;  %p4166_p13 = scmp.lt.s32.totalorder %s4160_s28, %s4160_s28 }
  0x41   :  { %p4167_p0 = por %p4166_p13, %p4165_p12 }
  0x43   :  { %p4168_p1 = pnand %p4167_p0, %p4161_p11 }
  0x45   :  { %4171 = shalt.err (!%p4168_p1)
}
  0x46   :  { %98 = dma.hbm_to_vmem [thread:$0]  %s5877_s7, 6144, %s93_s27, [#allocation13], %s4471_s30, %s4471_s30, %s4472_s12  }
  0x47   :  { %4324 = dma.done.wait [#allocation4], 2048  }
  0x48   :  { %4325 = vsyncadd [#allocation4], 4294965248 }
  0x49   :  { %4326 = dma.done.wait [#allocation7], 4352  }
  0x4a   :  { %4327 = vsyncadd [#allocation7], 4294962944 }
  0x4b   :  { %4328 = dma.done.wait [#allocation10], 4096  }
  0x4c   :  { %4329 = vsyncadd [#allocation10], 4294963200 }
  0x4d   :  { %4330 = dma.done.wait [#allocation13], 6144  }
  0x4e   :  { %4331 = vsyncadd [#allocation13], 4294961152  ;;  %v4579_v1 = vld [vmem:[#allocation6] sm:$0xff]  ;;  %v4581_v2 = vld [vmem:[#allocation6 + $0x8] sm:$0xff] }
  0x4f   :  { %6017 = vst [vmem:[#allocation20_spill] sm:$0xff] %v4579_v1  ;;  %6018 = vst [vmem:[#allocation21_spill] sm:$0xff] %v4581_v2  ;;  %v4583_v3 = vld [vmem:[#allocation6 + $0x10] sm:$0xff]  ;;  %v4585_v4 = vld [vmem:[#allocation6 + $0x18] sm:$0xff] }
  0x50   :  { %6019 = vst [vmem:[#allocation22_spill] sm:$0xff] %v4583_v3  ;;  %6020 = vst [vmem:[#allocation23_spill] sm:$0xff] %v4585_v4  ;;  %v4587_v5 = vld [vmem:[#allocation6 + $0x20] sm:$0xff]  ;;  %v4589_v6 = vld [vmem:[#allocation6 + $0x28] sm:$0xff] }
  0x51   :  { %6021 = vst [vmem:[#allocation24_spill] sm:$0xff] %v4587_v5  ;;  %6022 = vst [vmem:[#allocation25_spill] sm:$0xff] %v4589_v6  ;;  %v4591_v7 = vld [vmem:[#allocation6 + $0x30] sm:$0xff]  ;;  %v4593_v8 = vld [vmem:[#allocation6 + $0x38] sm:$0xff] }
  0x52   :  { %6023 = vst [vmem:[#allocation26_spill] sm:$0xff] %v4591_v7  ;;  %6024 = vst [vmem:[#allocation27_spill] sm:$0xff] %v4593_v8  ;;  %v4595_v9 = vld [vmem:[#allocation6 + $0x40] sm:$0xff]  ;;  %v4597_v10 = vld [vmem:[#allocation6 + $0x48] sm:$0xff] }
  0x53   :  { %6025 = vst [vmem:[#allocation28_spill] sm:$0xff] %v4595_v9  ;;  %6026 = vst [vmem:[#allocation29_spill] sm:$0xff] %v4597_v10  ;;  %v4599_v11 = vld [vmem:[#allocation6 + $0x50] sm:$0xff]  ;;  %v4601_v12 = vld [vmem:[#allocation6 + $0x58] sm:$0xff] }
  0x54   :  { %6027 = vst [vmem:[#allocation30_spill] sm:$0xff] %v4599_v11  ;;  %6028 = vst [vmem:[#allocation31_spill] sm:$0xff] %v4601_v12  ;;  %v4603_v13 = vld [vmem:[#allocation6 + $0x60] sm:$0xff]  ;;  %v4605_v14 = vld [vmem:[#allocation6 + $0x68] sm:$0xff] }
  0x55   :  { %6029 = vst [vmem:[#allocation32_spill] sm:$0xff] %v4603_v13  ;;  %6030 = vst [vmem:[#allocation33_spill] sm:$0xff] %v4605_v14  ;;  %v4607_v15 = vld [vmem:[#allocation6 + $0x70] sm:$0xff]  ;;  %v4609_v16 = vld [vmem:[#allocation6 + $0x78] sm:$0xff] }
  0x56   :  { %6031 = vst [vmem:[#allocation34_spill] sm:$0xff] %v4607_v15  ;;  %6032 = vst [vmem:[#allocation35_spill] sm:$0xff] %v4609_v16  ;;  %v4611_v17 = vld [vmem:[#allocation6 + $0x80] sm:$0xff]  ;;  %v4613_v18 = vld [vmem:[#allocation6 + $0x88] sm:$0xff] }
  0x57   :  { %6033 = vst [vmem:[#allocation36_spill] sm:$0xff] %v4611_v17  ;;  %6034 = vst [vmem:[#allocation37_spill] sm:$0xff] %v4613_v18  ;;  %v4615_v19 = vld [vmem:[#allocation6 + $0x90] sm:$0xff]  ;;  %v4617_v20 = vld [vmem:[#allocation6 + $0x98] sm:$0xff] }
  0x58   :  { %6035 = vst [vmem:[#allocation38_spill] sm:$0xff] %v4615_v19  ;;  %6036 = vst [vmem:[#allocation39_spill] sm:$0xff] %v4617_v20  ;;  %v4619_v21 = vld [vmem:[#allocation6 + $0xa0] sm:$0xff]  ;;  %v4621_v22 = vld [vmem:[#allocation6 + $0xa8] sm:$0xff] }
  0x59   :  { %6037 = vst [vmem:[#allocation40_spill] sm:$0xff] %v4619_v21  ;;  %6038 = vst [vmem:[#allocation41_spill] sm:$0xff] %v4621_v22  ;;  %v4623_v23 = vld [vmem:[#allocation6 + $0xb0] sm:$0xff]  ;;  %v4625_v24 = vld [vmem:[#allocation6 + $0xb8] sm:$0xff] }
  0x5a   :  { %6039 = vst [vmem:[#allocation42_spill] sm:$0xff] %v4623_v23  ;;  %6040 = vst [vmem:[#allocation43_spill] sm:$0xff] %v4625_v24  ;;  %v4627_v25 = vld [vmem:[#allocation6 + $0xc0] sm:$0xff]  ;;  %v4629_v26 = vld [vmem:[#allocation6 + $0xc8] sm:$0xff] }
  0x5b   :  { %6041 = vst [vmem:[#allocation44_spill] sm:$0xff] %v4627_v25  ;;  %6042 = vst [vmem:[#allocation45_spill] sm:$0xff] %v4629_v26  ;;  %v4631_v27 = vld [vmem:[#allocation6 + $0xd0] sm:$0xff]  ;;  %v4633_v28 = vld [vmem:[#allocation6 + $0xd8] sm:$0xff] }
  0x5c   :  { %6043 = vst [vmem:[#allocation46_spill] sm:$0xff] %v4631_v27  ;;  %6044 = vst [vmem:[#allocation47_spill] sm:$0xff] %v4633_v28  ;;  %v4635_v29 = vld [vmem:[#allocation6 + $0xe0] sm:$0xff]  ;;  %v4637_v30 = vld [vmem:[#allocation6 + $0xe8] sm:$0xff] }
  0x5d   :  { %6045 = vst [vmem:[#allocation48_spill] sm:$0xff] %v4635_v29  ;;  %6046 = vst [vmem:[#allocation49_spill] sm:$0xff] %v4637_v30  ;;  %v4639_v31 = vld [vmem:[#allocation6 + $0xf0] sm:$0xff]  ;;  %v4641_v32 = vld [vmem:[#allocation6 + $0xf8] sm:$0xff] }
  0x5e   :  { %6047 = vst [vmem:[#allocation50_spill] sm:$0xff] %v4639_v31  ;;  %6048 = vst [vmem:[#allocation51_spill] sm:$0xff] %v4641_v32  ;;  %v4643_v33 = vld [vmem:[#allocation8] sm:$0xff]  ;;  %v4645_v34 = vld [vmem:[#allocation8 + $0x8] sm:$0xff] }
  0x5f   :  { %6049 = vst [vmem:[#allocation52_spill] sm:$0xff] %v4643_v33  ;;  %6050 = vst [vmem:[#allocation53_spill] sm:$0xff] %v4645_v34  ;;  %v3874_v35 = vld [vmem:[#allocation9 + $0x38] sm:$0xff]   ;;  %v3875_v36 = vld [vmem:[#allocation9 + $0x30] sm:$0xff]  }
  0x60   :  { %3468 = vmatprep.subr.bf16.mxu0 %v3874_v35  ;;  %3564 = vmatprep.subr.bf16.mxu1 %v3874_v35  ;;  %v3876_v37 = vld [vmem:[#allocation9 + $0x28] sm:$0xff]   ;;  %v3877_v38 = vld [vmem:[#allocation9 + $0x20] sm:$0xff]   ;;  %v3882_v39 = vld [vmem:[#allocation3] sm:$0xff]  }
  0x61   :  { %3469 = vmatpush3.bf16.msra.mxu0 %v3874_v35  ;;  %3572 = vmatpush3.bf16.msra.mxu1 %v3874_v35  ;;  %v3883_v40 = vld [vmem:[#allocation3 + $0x40] sm:$0xff]   ;;  %v3878_v41 = vld [vmem:[#allocation9 + $0x18] sm:$0xff]   ;;  %v3880_v43 = vld [vmem:[#allocation9 + $0x8] sm:$0xff]  }
  0x62   :  { %3470 = vmatprep.subr.bf16.mxu0 %v3875_v36  ;;  %3565 = vmatprep.subr.bf16.mxu1 %v3875_v36  ;;  %v3879_v42 = vld [vmem:[#allocation9 + $0x10] sm:$0xff]   ;;  %v3881_v44 = vld [vmem:[#allocation9] sm:$0xff]   ;;  %v3884_v45 = vld [vmem:[#allocation3 + $0x8] sm:$0xff]  }
  0x63   :  { %3484 = vmatprep.mubr.bf16.mxu0 %v3882_v39  ;;  %3500 = vmatprep.mubr.bf16.mxu1 %v3883_v40  ;;  %v3885_v46 = vld [vmem:[#allocation3 + $0x48] sm:$0xff]   ;;  %v3886_v47 = vld [vmem:[#allocation3 + $0x10] sm:$0xff]   ;;  %v3888_v49 = vld [vmem:[#allocation3 + $0x18] sm:$0xff]  }
  0x64   :  { %v3887_v48 = vld [vmem:[#allocation3 + $0x50] sm:$0xff]   ;;  %v3889_v50 = vld [vmem:[#allocation3 + $0x58] sm:$0xff]   ;;  %v3890_v51 = vld [vmem:[#allocation3 + $0x20] sm:$0xff]  }
  0x65   :  { %3471 = vmatpush3.bf16.msra.mxu0 %v3875_v36  ;;  %3573 = vmatpush3.bf16.msra.mxu1 %v3875_v36  ;;  %v3891_v52 = vld [vmem:[#allocation3 + $0x60] sm:$0xff]   ;;  %v3892_v53 = vld [vmem:[#allocation3 + $0x28] sm:$0xff]   ;;  %v3894_v55 = vld [vmem:[#allocation3 + $0x30] sm:$0xff]  }
  0x66   :  { %3472 = vmatprep.subr.bf16.mxu0 %v3876_v37  ;;  %3566 = vmatprep.subr.bf16.mxu1 %v3876_v37  ;;  %v3893_v54 = vld [vmem:[#allocation3 + $0x68] sm:$0xff]   ;;  %v3895_v56 = vld [vmem:[#allocation3 + $0x70] sm:$0xff]   ;;  %v3896_v57 = vld [vmem:[#allocation3 + $0x38] sm:$0xff]  }
  0x67   :  { %v3897_v58 = vld [vmem:[#allocation3 + $0x78] sm:$0xff]  }
  0x68   :  { %v4650_v59 = vld [vmem:[%s5874_s4] ss:$0 sm:$0xff]  ;;  %s4827_s4 = smov 0  }
  0x69   :  { %3473 = vmatpush3.bf16.msra.mxu0 %v3876_v37  ;;  %3574 = vmatpush3.bf16.msra.mxu1 %v3876_v37 }
  0x6a   :  { %3474 = vmatprep.subr.bf16.mxu0 %v3877_v38  ;;  %3567 = vmatprep.subr.bf16.mxu1 %v3877_v38 }
  0x6d   :  { %3475 = vmatpush3.bf16.msra.mxu0 %v3877_v38  ;;  %3575 = vmatpush3.bf16.msra.mxu1 %v3877_v38 }
  0x6e   :  { %3476 = vmatprep.subr.bf16.mxu0 %v3878_v41  ;;  %3568 = vmatprep.subr.bf16.mxu1 %v3878_v41 }
  0x71   :  { %3477 = vmatpush3.bf16.msra.mxu0 %v3878_v41  ;;  %3576 = vmatpush3.bf16.msra.mxu1 %v3878_v41 }
  0x72   :  { %3478 = vmatprep.subr.bf16.mxu0 %v3879_v42  ;;  %3569 = vmatprep.subr.bf16.mxu1 %v3879_v42 }
  0x75   :  { %3479 = vmatpush3.bf16.msra.mxu0 %v3879_v42  ;;  %3577 = vmatpush3.bf16.msra.mxu1 %v3879_v42 }
  0x76   :  { %3480 = vmatprep.subr.bf16.mxu0 %v3880_v43  ;;  %3570 = vmatprep.subr.bf16.mxu1 %v3880_v43 }
  0x79   :  { %3481 = vmatpush3.bf16.msra.mxu0 %v3880_v43  ;;  %3578 = vmatpush3.bf16.msra.mxu1 %v3880_v43 }
  0x7a   :  { %3482 = vmatprep.subr.bf16.mxu0 %v3881_v44  ;;  %3571 = vmatprep.subr.bf16.mxu1 %v3881_v44 }
  0x7d   :  { %3483 = vmatpush3.bf16.msra.mxu0 %v3881_v44  ;;  %3579 = vmatpush3.bf16.msra.mxu1 %v3881_v44 }
  0x80   :  { %3485 = vmatmul.mubr.bf16.vlgmr.msra.gmra.mxu0 %v3884_v45  ;;  %3501 = vmatmul.mubr.bf16.vlgmr.msra.gmra.mxu1 %v3885_v46 }
  0x81   :  { %3488 = vmatprep.mubr.bf16.mxu0 %v3886_v47  ;;  %3504 = vmatprep.mubr.bf16.mxu1 %v3887_v48 }
  0x88   :  { %3489 = vmatmul.mubr.bf16.gmra.mxu0 %v3888_v49  ;;  %3505 = vmatmul.mubr.bf16.gmra.mxu1 %v3889_v50 }
  0x89   :  { %3492 = vmatprep.mubr.bf16.mxu0 %v3890_v51  ;;  %3508 = vmatprep.mubr.bf16.mxu1 %v3891_v52 }
  0x90   :  { %3493 = vmatmul.mubr.bf16.gmra.mxu0 %v3892_v53  ;;  %3509 = vmatmul.mubr.bf16.gmra.mxu1 %v3893_v54 }
  0x91   :  { %3496 = vmatprep.mubr.bf16.mxu0 %v3894_v55  ;;  %3512 = vmatprep.mubr.bf16.mxu1 %v3895_v56 }
  0x98   :  { %3497 = vmatmul.mubr.bf16.gmra.mxu0 %v3896_v57  ;;  %3513 = vmatmul.mubr.bf16.gmra.mxu1 %v3897_v58 }
 0x140   :  { %v3486_v60 = vpop.f32.mrf.mxu0  ;;  %v3502_v61 = vpop.f32.mrf.mxu1 }
 0x141   :  { %v4653_v62 = vadd.f32 %v3486_v60, %v4650_v59  ;;  %v4656_v63 = vadd.f32 %v3502_v61, %v4650_v59 }
 0x142   :  { %v391_v0 = vpop.f32.mrf.mxu0  ;;  %v455_v35 = vpop.f32.mrf.mxu1 }
 0x143   :  { %v4661_v38 = vadd.f32 %v4650_v59, %v391_v0  ;;  %v4664_v39 = vadd.f32 %v4650_v59, %v455_v35 }
 0x144   :  { %v3487_v40 = vpop.f32.mrf.mxu0  ;;  %v3503_v41 = vpop.f32.mrf.mxu1 }
 0x145   :  { %v4669_v44 = vadd.f32 %v3487_v40, %v4650_v59  ;;  %v4672_v45 = vadd.f32 %v3503_v41, %v4650_v59 }
 0x146   :  { %v394_v46 = vpop.f32.mrf.mxu0  ;;  %v458_v47 = vpop.f32.mrf.mxu1 }
 0x147   :  { %v4677_v50 = vadd.f32 %v4650_v59, %v394_v46  ;;  %v4680_v51 = vadd.f32 %v4650_v59, %v458_v47 }
 0x148   :  { %v3490_v52 = vpop.f32.mrf.mxu0  ;;  %v3506_v53 = vpop.f32.mrf.mxu1 }
 0x149   :  { %v4685_v56 = vadd.f32 %v3490_v52, %v4650_v59  ;;  %v4688_v57 = vadd.f32 %v3506_v53, %v4650_v59 }
 0x14a   :  { %v407_v58 = vpop.f32.mrf.mxu0  ;;  %v471_v60 = vpop.f32.mrf.mxu1 }
 0x14b   :  { %v4693_v35 = vadd.f32 %v4650_v59, %v407_v58  ;;  %v4696_v40 = vadd.f32 %v4650_v59, %v471_v60 }
 0x14c   :  { %v3491_v41 = vpop.f32.mrf.mxu0  ;;  %v3507_v46 = vpop.f32.mrf.mxu1 }
 0x14d   :  { %v4701_v53 = vadd.f32 %v3491_v41, %v4650_v59  ;;  %v4704_v42 = vadd.f32 %v3507_v46, %v4650_v59 }
 0x14e   :  { %v410_v54 = vpop.f32.mrf.mxu0  ;;  %v474_v36 = vpop.f32.mrf.mxu1 }
 0x14f   :  { %v541_v48 = vmax.f32 %v4704_v42, 0.0   ;;  %v4709_v60 = vadd.f32 %v4650_v59, %v410_v54  ;;  %v475_v61 = vadd.f32 %v4650_v59, %v474_v36 }
 0x150   :  { %v3494_v47 = vpop.f32.mrf.mxu0  ;;  %v3510_v43 = vpop.f32.mrf.mxu1 }
 0x151   :  { %v539_v41 = vmax.f32 %v475_v61, 0.0   ;;  %v4714_v37 = vadd.f32 %v3494_v47, %v4650_v59  ;;  %v496_v46 = vadd.f32 %v3510_v43, %v4650_v59 }
 0x152   :  { %v423_v49 = vpop.f32.mrf.mxu0  ;;  %v487_v52 = vpop.f32.mrf.mxu1 }
 0x153   :  { %v528_v58 = vmax.f32 %v4714_v37, 0.0   ;;  %v544_v42 = vmax.f32 %v496_v46, 0.0   ;;  %v4719_v54 = vadd.f32 %v4650_v59, %v423_v49  ;;  %v488_v36 = vadd.f32 %v4650_v59, %v487_v52 }
 0x154   :  { %v3495_v0 = vpop.f32.mrf.mxu0  ;;  %v3511_v34 = vpop.f32.mrf.mxu1 }
 0x155   :  { %v526_v55 = vmax.f32 %v4719_v54, 0.0   ;;  %v542_v61 = vmax.f32 %v488_v36, 0.0   ;;  %v435_v47 = vadd.f32 %v3495_v0, %v4650_v59  ;;  %v499_v33 = vadd.f32 %v3511_v34, %v4650_v59 }
 0x156   :  { %v426_v43 = vpop.f32.mrf.mxu0  ;;  %v490_v31 = vpop.f32.mrf.mxu1 }
 0x157   :  { %v529_v32 = vmax.f32 %v435_v47, 0.0   ;;  %v545_v29 = vmax.f32 %v499_v33, 0.0   ;;  %v427_v37 = vadd.f32 %v4650_v59, %v426_v43  ;;  %v491_v49 = vadd.f32 %v4650_v59, %v490_v31 }
 0x158   :  { %v3498_v46 = vpop.f32.mrf.mxu0  ;;  %v3514_v30 = vpop.f32.mrf.mxu1 }
 0x159   :  { %v527_v52 = vmax.f32 %v427_v37, 0.0   ;;  %v543_v27 = vmax.f32 %v491_v49, 0.0   ;;  %v448_v28 = vadd.f32 %v3498_v46, %v4650_v59  ;;  %v512_v54 = vadd.f32 %v3514_v30, %v4650_v59 }
 0x15a   :  { %v439_v36 = vpop.f32.mrf.mxu0  ;;  %v503_v0 = vpop.f32.mrf.mxu1 }
 0x15b   :  { %v532_v25 = vmax.f32 %v448_v28, 0.0   ;;  %v548_v34 = vmax.f32 %v512_v54, 0.0   ;;  %v440_v26 = vadd.f32 %v4650_v59, %v439_v36  ;;  %v504_v33 = vadd.f32 %v4650_v59, %v503_v0 }
 0x15c   :  { %v3499_v47 = vpop.f32.mrf.mxu0  ;;  %v3515_v43 = vpop.f32.mrf.mxu1  ;;  %v6055_v0 = vmax.f32 %v4680_v51, 0.0   ;;  %v6060_v51 = vmax.f32 %v4693_v35, 0.0  }
 0x15d   :  { %v530_v23 = vmax.f32 %v440_v26, 0.0   ;;  %v546_v31 = vmax.f32 %v504_v33, 0.0   ;;  %v451_v24 = vadd.f32 %v3499_v47, %v4650_v59  ;;  %v515_v37 = vadd.f32 %v3515_v43, %v4650_v59 }
 0x15e   :  { %v442_v49 = vpop.f32.mrf.mxu0  ;;  %v506_v46 = vpop.f32.mrf.mxu1  ;;  %v6053_v26 = vmax.f32 %v4672_v45, 0.0   ;;  %v6059_v45 = vmax.f32 %v4709_v60, 0.0   ;;  %v6064_v60 = vmax.f32 %v4661_v38, 0.0  }
 0x15f   :  { %v533_v21 = vmax.f32 %v451_v24, 0.0   ;;  %v549_v30 = vmax.f32 %v515_v37, 0.0   ;;  %v443_v22 = vadd.f32 %v4650_v59, %v442_v49  ;;  %v507_v28 = vadd.f32 %v4650_v59, %v506_v46 }
 0x160   :  { %v6052_v24 = vmax.f32 %v4696_v40, 0.0   ;;  %v6054_v59 = vmax.f32 %v4656_v63, 0.0   ;;  %v6057_v63 = vmax.f32 %v4701_v53, 0.0   ;;  %v6061_v40 = vmax.f32 %v4669_v44, 0.0  }
 0x161   :  { %v531_v54 = vmax.f32 %v443_v22, 0.0   ;;  %v547_v36 = vmax.f32 %v507_v28, 0.0   ;;  %v6051_v22 = vmax.f32 %v4688_v57, 0.0   ;;  %v6056_v57 = vmax.f32 %v4664_v39, 0.0  }
 0x162   :  { %v6058_v39 = vmax.f32 %v4685_v56, 0.0   ;;  %v6062_v53 = vmax.f32 %v4653_v62, 0.0   ;;  %v6063_v56 = vmax.f32 %v4677_v50, 0.0  }
 0x163 LB: > { %v6065_v18 = vld [vmem:[#allocation37_spill] sm:$0xff]  ;;  %v6066_v16 = vld [vmem:[#allocation35_spill] sm:$0xff]  ;;  %v6067_v15 = vld [vmem:[#allocation34_spill] sm:$0xff]  ;;  %s3194_s23 = sshll.u32 %s4464_s4, 6  ;;  %v4911_v62 = vpack.c.bf16 %v4456_v56, %v4460_v60  ;;  %v4913_v38 = vpack.c.bf16 %v4392_v0, %v4396_v57  ;;  %v4927_v46 = vpack.c.bf16 %v4448_v40, %v4452_v53  ;;  %v4931_v28 = vpack.c.bf16 %v4384_v26, %v4388_v59  ;;  %s623_s13 = scalar_lea.vmem %s5876_s6, %s4464_s4  ;;  %v4400_v21 = vphi %v533_v21, %v6225_v21   ;;  %v4396_v57 = vphi %v6056_v57, %v6224_v57   ;;  %v4392_v0 = vphi %v6055_v0, %v6223_v0   ;;  %v4388_v59 = vphi %v6054_v59, %v6222_v59   ;;  %v4384_v26 = vphi %v6053_v26, %v6221_v26   ;;  %v4380_v24 = vphi %v6052_v24, %v6220_v24   ;;  %v4376_v41 = vphi %v539_v41, %v6219_v41   ;;  %v4372_v22 = vphi %v6051_v22, %v6218_v22   ;;  %v4368_v48 = vphi %v541_v48, %v6217_v48   ;;  %v4364_v61 = vphi %v542_v61, %v6216_v61   ;;  %v4360_v27 = vphi %v543_v27, %v6215_v27   ;;  %v4356_v42 = vphi %v544_v42, %v6214_v42   ;;  %v4352_v29 = vphi %v545_v29, %v6213_v29   ;;  %v4348_v31 = vphi %v546_v31, %v6212_v31   ;;  %v4344_v36 = vphi %v547_v36, %v6210_v36   ;;  %v4340_v34 = vphi %v548_v34, %v6209_v34   ;;  %v4336_v30 = vphi %v549_v30, %v6207_v30   ;;  %s4464_s4 = sphi %s4827_s4, %s6241_s4   ;;  %v4460_v60 = vphi %v6064_v60, %v6240_v60   ;;  %v4456_v56 = vphi %v6063_v56, %v6239_v56   ;;  %v4452_v53 = vphi %v6062_v53, %v6238_v53   ;;  %v4448_v40 = vphi %v6061_v40, %v6237_v40   ;;  %v4444_v51 = vphi %v6060_v51, %v6236_v51   ;;  %v4440_v45 = vphi %v6059_v45, %v6235_v45   ;;  %v4436_v39 = vphi %v6058_v39, %v6234_v39   ;;  %v4432_v63 = vphi %v6057_v63, %v6233_v63   ;;  %v4428_v55 = vphi %v526_v55, %v6232_v55   ;;  %v4424_v52 = vphi %v527_v52, %v6231_v52   ;;  %v4420_v58 = vphi %v528_v58, %v6230_v58   ;;  %v4416_v32 = vphi %v529_v32, %v6229_v32   ;;  %v4412_v23 = vphi %v530_v23, %v6228_v23   ;;  %v4408_v54 = vphi %v531_v54, %v6227_v54   ;;  %v4404_v25 = vphi %v532_v25, %v6226_v25  }
 0x164   : > { %v6068_v14 = vld [vmem:[#allocation33_spill] sm:$0xff]  ;;  %v6069_v13 = vld [vmem:[#allocation32_spill] sm:$0xff]  ;;  %v6070_v12 = vld [vmem:[#allocation31_spill] sm:$0xff]  ;;  %s4915_s29 = scalar_lea.vmem [#allocation11], %s3194_s23  ;;  %v4933_v0 = vpack.c.bf16 %v4440_v45, %v4444_v51  ;;  %v4937_v57 = vpack.c.bf16 %v4376_v41, %v4380_v24  ;;  %v4944_v40 = vpack.c.bf16 %v4432_v63, %v4436_v39  ;;  %v4948_v26 = vpack.c.bf16 %v4368_v48, %v4372_v22  ;;  %s3195_s14 = sshll.u32 %s4464_s4, 7 }
 0x165   : > { %v6071_v11 = vld [vmem:[#allocation30_spill] sm:$0xff]  ;;  %v6072_v10 = vld [vmem:[#allocation29_spill] sm:$0xff]  ;;  %v6073_v9 = vld [vmem:[#allocation28_spill] sm:$0xff]  ;;  %6082 = vst [vmem:[#allocation54_spill] sm:$0xff] %v4911_v62  ;;  %3532 = vmatprep.mubr.bf16.mxu0 %v4911_v62  ;;  %3548 = vmatprep.mubr.bf16.mxu1 %v4913_v38  ;;  %v4952_v59 = vpack.c.bf16 %v4424_v52, %v4428_v55  ;;  %v4956_v41 = vpack.c.bf16 %v4360_v27, %v4364_v61  ;;  %s5078_s1 = scalar_lea.vmem [#allocation12], %s3195_s14  ;;  %s1260_s17 = scalar_lea.vmem %s5878_s8, %s4464_s4 }
 0x166   : > { %v6074_v8 = vld [vmem:[#allocation27_spill] sm:$0xff]  ;;  %v6075_v7 = vld [vmem:[#allocation26_spill] sm:$0xff]  ;;  %v6076_v6 = vld [vmem:[#allocation25_spill] sm:$0xff]  ;;  %6083 = vst [vmem:[#allocation55_spill] sm:$0xff] %v4913_v38  ;;  %v4964_v48 = vpack.c.bf16 %v4416_v32, %v4420_v58  ;;  %v4968_v55 = vpack.c.bf16 %v4352_v29, %v4356_v42  ;;  %v4972_v27 = vpack.c.bf16 %v4408_v54, %v4412_v23  ;;  %v4976_v61 = vpack.c.bf16 %v4344_v36, %v4348_v31  ;;  %s555_s18 = sadd.s32 1, %s4464_s4  }
 0x167   : > { %v6077_v5 = vld [vmem:[#allocation24_spill] sm:$0xff]  ;;  %v6078_v4 = vld [vmem:[#allocation23_spill] sm:$0xff]  ;;  %v6079_v3 = vld [vmem:[#allocation22_spill] sm:$0xff]  ;;  %6084 = vst [vmem:[#allocation56_spill] sm:$0xff] %v4927_v46  ;;  %v4984_v29 = vpack.c.bf16 %v4400_v21, %v4404_v25  ;;  %v4988_v23 = vpack.c.bf16 %v4336_v30, %v4340_v34  ;;  %p5279_p2 = scmp.ge.s32.totalorder %s555_s18, 3   ;;  %s6241_s4 = smov %s555_s18 }
 0x168   : > { %v6080_v2 = vld [vmem:[#allocation21_spill] sm:$0xff]  ;;  %v6081_v1 = vld [vmem:[#allocation20_spill] sm:$0xff]  ;;  %v3900_v35 = vld [vmem:[%s4915_s29 + $0x28] sm:$0xff]   ;;  %6085 = vst [vmem:[#allocation57_spill] sm:$0xff] %v4931_v28  ;;  %vm2856_vm0 = vcmask (%p5279_p2), 130048   ;;  %vm2885_vm1 = vcmask (%p5279_p2), 1041409  }
 0x169   : > { %v3898_v44 = vld [vmem:[%s4915_s29 + $0x38] sm:$0xff]   ;;  %v3899_v50 = vld [vmem:[%s4915_s29 + $0x30] sm:$0xff]   ;;  %v3901_v33 = vld [vmem:[%s4915_s29 + $0x20] sm:$0xff]   ;;  %6086 = vst [vmem:[#allocation58_spill] sm:$0xff] %v4933_v0  ;;  %v3110_v32 = vcombine.high %v6081_v1, %v6080_v2  ;;  %vm2887_vm2 = vcmask (%p5279_p2), 1042434   ;;  %vm2889_vm3 = vcmask (%p5279_p2), 1043459  }
 0x16a   : > { %3516 = vmatprep.subr.bf16.mxu0 %v3898_v44  ;;  %3580 = vmatprep.subr.bf16.mxu1 %v3898_v44  ;;  %v3902_v47 = vld [vmem:[%s4915_s29 + $0x18] sm:$0xff]   ;;  %v3903_v43 = vld [vmem:[%s4915_s29 + $0x10] sm:$0xff]   ;;  %v3904_v37 = vld [vmem:[%s4915_s29 + $0x8] sm:$0xff]   ;;  %6087 = vst [vmem:[#allocation59_spill] sm:$0xff] %v4937_v57  ;;  %vm2891_vm4 = vcmask (%p5279_p2), 1044484   ;;  %vm2893_vm5 = vcmask (%p5279_p2), 1045509  }
 0x16b   : > { %3517 = vmatpush3.bf16.msra.mxu0 %v3898_v44  ;;  %3588 = vmatpush3.bf16.msra.mxu1 %v3898_v44  ;;  %v3905_v49 = vld [vmem:[%s4915_s29] sm:$0xff]   ;;  %6088 = vst [vmem:[#allocation60_spill] sm:$0xff] %v4944_v40  ;;  %6089 = vst [vmem:[#allocation61_spill] sm:$0xff] %v4948_v26  ;;  %vm6016_vm6 = vcmask (%p5279_p2), 1046534   ;;  %vm6015_vm7 = vcmask (%p5279_p2), 1047559   ;;  %s4477_s6 = smov (%p5279_p2), [#allocation14]  }
 0x16c   : > { %3518 = vmatprep.subr.bf16.mxu0 %v3899_v50  ;;  %3581 = vmatprep.subr.bf16.mxu1 %v3899_v50  ;;  %6090 = vst [vmem:[#allocation62_spill] sm:$0xff] %v4952_v59  ;;  %6091 = vst [vmem:[#allocation63_spill] sm:$0xff] %v4956_v41  ;;  %s2951_s8 = sshll.u32 (%p5279_p2), %s4477_s6, 4  ;;  %s2952_s8 = int_to_ptr.vmem [resolvable:$true] %s2951_s8 }
 0x16d   : > { %6092 = vst [vmem:[#allocation64_spill] sm:$0xff] %v4964_v48  ;;  %6093 = vst [vmem:[#allocation65_spill] sm:$0xff] %v4968_v55  ;;  %p4177_p4 = scmp.lt.s32.totalorder (%p5279_p2), %s2952_s8, %s2952_s8 }
 0x16e   : > { %6094 = vst [vmem:[#allocation66_spill] sm:$0xff] %v4972_v27  ;;  %6095 = vst [vmem:[#allocation67_spill] sm:$0xff] %v4976_v61 }
 0x16f   : > { %3519 = vmatpush3.bf16.msra.mxu0 %v3899_v50  ;;  %3589 = vmatpush3.bf16.msra.mxu1 %v3899_v50  ;;  %6096 = vst [vmem:[#allocation68_spill] sm:$0xff] %v4984_v29  ;;  %6097 = vst [vmem:[#allocation69_spill] sm:$0xff] %v4988_v23 }
 0x170   : > { %3520 = vmatprep.subr.bf16.mxu0 %v3900_v35  ;;  %3582 = vmatprep.subr.bf16.mxu1 %v3900_v35 }
 0x173   : > { %3521 = vmatpush3.bf16.msra.mxu0 %v3900_v35  ;;  %3590 = vmatpush3.bf16.msra.mxu1 %v3900_v35 }
 0x174   : > { %3522 = vmatprep.subr.bf16.mxu0 %v3901_v33  ;;  %3583 = vmatprep.subr.bf16.mxu1 %v3901_v33 }
 0x177   : > { %3523 = vmatpush3.bf16.msra.mxu0 %v3901_v33  ;;  %3591 = vmatpush3.bf16.msra.mxu1 %v3901_v33 }
 0x178   : > { %3524 = vmatprep.subr.bf16.mxu0 %v3902_v47  ;;  %3584 = vmatprep.subr.bf16.mxu1 %v3902_v47 }
 0x17b   : > { %3525 = vmatpush3.bf16.msra.mxu0 %v3902_v47  ;;  %3592 = vmatpush3.bf16.msra.mxu1 %v3902_v47 }
 0x17c   : > { %3526 = vmatprep.subr.bf16.mxu0 %v3903_v43  ;;  %3585 = vmatprep.subr.bf16.mxu1 %v3903_v43 }
 0x17f   : > { %3527 = vmatpush3.bf16.msra.mxu0 %v3903_v43  ;;  %3593 = vmatpush3.bf16.msra.mxu1 %v3903_v43 }
 0x180   : > { %3528 = vmatprep.subr.bf16.mxu0 %v3904_v37  ;;  %3586 = vmatprep.subr.bf16.mxu1 %v3904_v37 }
 0x183   : > { %3529 = vmatpush3.bf16.msra.mxu0 %v3904_v37  ;;  %3594 = vmatpush3.bf16.msra.mxu1 %v3904_v37 }
 0x184   : > { %3530 = vmatprep.subr.bf16.mxu0 %v3905_v49  ;;  %3587 = vmatprep.subr.bf16.mxu1 %v3905_v49 }
 0x187   : > { %3531 = vmatpush3.bf16.msra.mxu0 %v3905_v49  ;;  %3595 = vmatpush3.bf16.msra.mxu1 %v3905_v49  ;;  %v5028_v49 = vld [vmem:[%s623_s13] ss:$0 sm:$0xff] }
 0x18a   : > { %3533 = vmatmul.mubr.bf16.vlgmr.msra.gmra.mxu0 %v4927_v46  ;;  %3549 = vmatmul.mubr.bf16.vlgmr.msra.gmra.mxu1 %v4931_v28 }
 0x18b   : > { %3536 = vmatprep.mubr.bf16.mxu0 %v4933_v0  ;;  %3552 = vmatprep.mubr.bf16.mxu1 %v4937_v57 }
 0x192   : > { %3537 = vmatmul.mubr.bf16.gmra.mxu0 %v4944_v40  ;;  %3553 = vmatmul.mubr.bf16.gmra.mxu1 %v4948_v26 }
 0x193   : > { %3540 = vmatprep.mubr.bf16.mxu0 %v4952_v59  ;;  %3556 = vmatprep.mubr.bf16.mxu1 %v4956_v41 }
 0x19a   : > { %3541 = vmatmul.mubr.bf16.gmra.mxu0 %v4964_v48  ;;  %3557 = vmatmul.mubr.bf16.gmra.mxu1 %v4968_v55 }
 0x19b   : > { %3544 = vmatprep.mubr.bf16.mxu0 %v4972_v27  ;;  %3560 = vmatprep.mubr.bf16.mxu1 %v4976_v61 }
 0x1a2   : > { %3545 = vmatmul.mubr.bf16.gmra.mxu0 %v4984_v29  ;;  %3561 = vmatmul.mubr.bf16.gmra.mxu1 %v4988_v23 }
 0x1a3   : > { %1080 = vmatprep.mubr.bf16.mxu1 %v3110_v32 }
 0x24a   : > { %v4994_v58 = vpop.f32.mrf.mxu0  ;;  %v4996_v42 = vpop.f32.mrf.mxu1 }
 0x24c   : > { %v4998_v52 = vpop.f32.mrf.mxu0  ;;  %v5000_v21 = vpop.f32.mrf.mxu1 }
 0x24e   : > { %v5002_v25 = vpop.f32.mrf.mxu0  ;;  %v5004_v34 = vpop.f32.mrf.mxu1 }
 0x250   : > { %v5006_v31 = vpop.f32.mrf.mxu0  ;;  %v5008_v30 = vpop.f32.mrf.mxu1 }
 0x252   : > { %v5010_v54 = vpop.f32.mrf.mxu0  ;;  %v5012_v36 = vpop.f32.mrf.mxu1 }
 0x254   : > { %v5014_v22 = vpop.f32.mrf.mxu0  ;;  %v5016_v24 = vpop.f32.mrf.mxu1 }
 0x256   : > { %v5018_v63 = vpop.f32.mrf.mxu0  ;;  %v3555_v39 = vpop.f32.mrf.mxu1 }
 0x258   : > { %v5020_v45 = vpop.f32.mrf.mxu0  ;;  %v5022_v51 = vpop.f32.mrf.mxu1 }
 0x25a   : > { %v3542_v53 = vpop.f32.mrf.mxu0  ;;  %v3558_v56 = vpop.f32.mrf.mxu1 }
 0x25b   : > { %v818_v62 = vadd.f32 %v3558_v56, %v5028_v49 }
 0x25c   : > { %v745_v60 = vpop.f32.mrf.mxu0  ;;  %v809_v44 = vpop.f32.mrf.mxu1 }
 0x25d   : > { %v810_v56 = vadd.f32 %v5028_v49, %v809_v44 }
 0x25e   : > { %v3543_v50 = vpop.f32.mrf.mxu0  ;;  %v3559_v35 = vpop.f32.mrf.mxu1 }
 0x25f   : > { %v821_v29 = vadd.f32 %v3559_v35, %v5028_v49  ;;  %v757_v35 = vadd.f32 %v3543_v50, %v5028_v49 }
 0x260   : > { %v748_v33 = vpop.f32.mrf.mxu0  ;;  %v812_v47 = vpop.f32.mrf.mxu1 }
 0x261   : > { %v813_v17 = vadd.f32 %v5028_v49, %v812_v47 }
 0x262   : > { %v3546_v43 = vpop.f32.mrf.mxu0  ;;  %v3562_v37 = vpop.f32.mrf.mxu1 }
 0x263   : > { %v770_v32 = vadd.f32 %v3546_v43, %v5028_v49  ;;  %v834_v23 = vadd.f32 %v3562_v37, %v5028_v49 }
 0x264   : > { %v761_v61 = vpop.f32.mrf.mxu0  ;;  %v825_v55 = vpop.f32.mrf.mxu1 }
 0x265   : > { %v826_v57 = vadd.f32 %v5028_v49, %v825_v55  ;;  %v854_v27 = vmax.f32 %v770_v32, 0.0  ;;  %v870_v48 = vmax.f32 %v834_v23, 0.0  ;;  %v762_v55 = vadd.f32 %v5028_v49, %v761_v61 }
 0x266   : > { %v3547_v41 = vpop.f32.mrf.mxu0  ;;  %v3563_v26 = vpop.f32.mrf.mxu1  ;;  %v867_v23 = vmax.f32 %v821_v29, 0.0  ;;  %v865_v61 = vmax.f32 %v813_v17, 0.0  ;;  %v738_v17 = vadd.f32 %v5010_v54, %v5028_v49  ;;  %v730_v54 = vadd.f32 %v5028_v49, %v5014_v22 }
 0x267   : > { %v773_v28 = vadd.f32 %v3547_v41, %v5028_v49  ;;  %v837_v38 = vadd.f32 %v3563_v26, %v5028_v49  ;;  %v868_v19 = vmax.f32 %v826_v57, 0.0  ;;  %v851_v57 = vmax.f32 %v757_v35, 0.0 }
 0x268   : > { %v764_v59 = vpop.f32.mrf.mxu0  ;;  %v828_v40 = vpop.f32.mrf.mxu1  ;;  %v846_v35 = vmax.f32 %v738_v17, 0.0  ;;  %v844_v22 = vmax.f32 %v730_v54, 0.0  ;;  %v3111_v17 = vcombine.low %v6079_v3, %v6078_v4  ;;  %v3122_v54 = vcombine.high %v6069_v13, %v6068_v14 }
 0x269   : > { %v855_v0 = vmax.f32 %v773_v28, 0.0  ;;  %v871_v43 = vmax.f32 %v837_v38, 0.0  ;;  %v765_v37 = vadd.f32 %v5028_v49, %v764_v59  ;;  %v829_v46 = vadd.f32 %v5028_v49, %v828_v40 }
 0x26a   : > { %v754_v38 = vadd.f32 %v3542_v53, %v5028_v49  ;;  %v852_v59 = vmax.f32 %v762_v55, 0.0  ;;  %v866_v40 = vmax.f32 %v818_v62, 0.0  ;;  %v864_v53 = vmax.f32 %v810_v56, 0.0 }
 0x26b   : > { %v879_v41 = vpack.c.bf16 %v855_v0, %v854_v27  ;;  %v887_v20 = vpack.c.bf16 %v871_v43, %v870_v48  ;;  %v869_v26 = vmax.f32 %v829_v46, 0.0  ;;  %v853_v32 = vmax.f32 %v765_v37, 0.0 }
 0x26c   : > { %v749_v0 = vadd.f32 %v5028_v49, %v748_v33  ;;  %v805_v48 = vadd.f32 %v3555_v39, %v5028_v49  ;;  %v885_v27 = vpack.c.bf16 %v867_v23, %v866_v40  ;;  %v850_v29 = vmax.f32 %v754_v38, 0.0 }
 0x26d   : > { %v886_v28 = vpack.c.bf16 %v869_v26, %v868_v19  ;;  %3244 = vmatprep.subr.bf16.mxu1 %v887_v20  ;;  %v878_v46 = vpack.c.bf16 %v853_v32, %v852_v59  ;;  %v746_v19 = vadd.f32 %v5028_v49, %v745_v60  ;;  %v802_v20 = vadd.f32 %v5012_v36, %v5028_v49 }
 0x26e   : > { %3245 = vmatpush3.bf16.msra.mxu1 %v879_v41  ;;  %v741_v62 = vadd.f32 %v5018_v63, %v5028_v49  ;;  %v877_v44 = vpack.c.bf16 %v851_v57, %v850_v29  ;;  %v849_v50 = vmax.f32 %v749_v0, 0.0  ;;  %v863_v33 = vmax.f32 %v805_v48, 0.0 }
 0x26f   : > { %3246 = vmatprep.subr.bf16.mxu1 %v886_v28  ;;  %v797_v39 = vadd.f32 %v5028_v49, %v5022_v51  ;;  %v884_v47 = vpack.c.bf16 %v865_v61, %v864_v53  ;;  %v848_v60 = vmax.f32 %v746_v19, 0.0  ;;  %v862_v43 = vmax.f32 %v802_v20, 0.0  ;;  %v3908_v53 = vld [vmem:[%s5078_s1 + $0x70] sm:$0xff]  }
 0x270   : > { %v794_v36 = vadd.f32 %v5028_v49, %v5016_v24  ;;  %v847_v37 = vmax.f32 %v741_v62, 0.0  ;;  %v733_v63 = vadd.f32 %v5028_v49, %v5020_v45  ;;  %v789_v41 = vadd.f32 %v5004_v34, %v5028_v49 }
 0x271   : > { %v876_v55 = vpack.c.bf16 %v849_v50, %v848_v60  ;;  %v883_v51 = vpack.c.bf16 %v863_v33, %v862_v43  ;;  %v861_v26 = vmax.f32 %v797_v39, 0.0  ;;  %v786_v32 = vadd.f32 %v4996_v42, %v5028_v49  ;;  %v3910_v50 = vld [vmem:[%s5078_s1 + $0x68] sm:$0xff]   ;;  %v3912_v39 = vld [vmem:[%s5078_s1 + $0x60] sm:$0xff]   ;;  %v3914_v60 = vld [vmem:[%s5078_s1 + $0x58] sm:$0xff]  }
 0x272   : > { %3247 = vmatpush3.bf16.msra.mxu1 %v878_v46  ;;  %v860_v24 = vmax.f32 %v794_v36, 0.0  ;;  %v725_v23 = vadd.f32 %v5002_v25, %v5028_v49  ;;  %v875_v45 = vpack.c.bf16 %v847_v37, %v846_v35  ;;  %v845_v28 = vmax.f32 %v733_v63, 0.0  ;;  %v3911_v33 = vld [vmem:[%s5078_s1 + $0x28] sm:$0xff]   ;;  %v3915_v36 = vld [vmem:[%s5078_s1 + $0x18] sm:$0xff]  }
 0x273   : > { %3248 = vmatprep.subr.bf16.mxu1 %v885_v27  ;;  %v859_v38 = vmax.f32 %v789_v41, 0.0  ;;  %v781_v34 = vadd.f32 %v5028_v49, %v5008_v30  ;;  %v722_v40 = vadd.f32 %v4994_v58, %v5028_v49  ;;  %v858_v56 = vmax.f32 %v786_v32, 0.0 }
 0x274   : > { %v882_v59 = vpack.c.bf16 %v861_v26, %v860_v24  ;;  %v778_v42 = vadd.f32 %v5028_v49, %v5000_v21  ;;  %v843_v57 = vmax.f32 %v725_v23, 0.0  ;;  %v717_v25 = vadd.f32 %v5028_v49, %v5006_v31  ;;  %v3906_v31 = vld [vmem:[%s5078_s1 + $0x78] sm:$0xff]  }
 0x275   : > { %v874_v0 = vpack.c.bf16 %v845_v28, %v844_v22  ;;  %v881_v46 = vpack.c.bf16 %v859_v38, %v858_v56  ;;  %v857_v48 = vmax.f32 %v781_v34, 0.0  ;;  %v842_v30 = vmax.f32 %v722_v40, 0.0  ;;  %3356 = vmatprep.subr.bf16.mxu0 %v3906_v31  ;;  %v6102_v40 = vld [vmem:[#allocation38_spill] sm:$0xff]  ;;  %v3916_v56 = vld [vmem:[%s5078_s1 + $0x50] sm:$0xff]  }
 0x276   : > { %3249 = vmatpush3.bf16.msra.mxu1 %v877_v44  ;;  %v714_v27 = vadd.f32 %v5028_v49, %v4998_v52  ;;  %v856_v58 = vmax.f32 %v778_v42, 0.0  ;;  %v841_v29 = vmax.f32 %v717_v25, 0.0  ;;  %v3907_v49 = vld [vmem:[%s5078_s1 + $0x38] sm:$0xff]   ;;  %v3109_v20 = vcombine.low %v6081_v1, %v6080_v2  ;;  %v3909_v44 = vld [vmem:[%s5078_s1 + $0x30] sm:$0xff]   ;;  %v6110_v31 = vld [vmem:[#allocation42_spill] sm:$0xff] }
 0x277   : > { %3250 = vmatprep.subr.bf16.mxu1 %v884_v47  ;;  %v873_v61 = vpack.c.bf16 %v843_v57, %v842_v30  ;;  %v3112_v62 = vcombine.high %v6079_v3, %v6078_v4  ;;  %3357 = vmatpush3.bf16.msra.mxu0 %v3907_v49  ;;  %v3913_v47 = vld [vmem:[%s5078_s1 + $0x20] sm:$0xff]   ;;  %v3114_v43 = vcombine.high %v6077_v5, %v6076_v6  ;;  %v3917_v42 = vld [vmem:[%s5078_s1 + $0x10] sm:$0xff]   ;;  %v3918_v57 = vld [vmem:[%s5078_s1 + $0x48] sm:$0xff]  }
 0x278   : > { %v880_v19 = vpack.c.bf16 %v857_v48, %v856_v58  ;;  %v840_v21 = vmax.f32 %v714_v27, 0.0  ;;  %3358 = vmatprep.subr.bf16.mxu0 %v3908_v53  ;;  %v3113_v37 = vcombine.low %v6077_v5, %v6076_v6  ;;  %v3116_v63 = vcombine.high %v6075_v7, %v6074_v8  ;;  %v6104_v48 = vld [vmem:[#allocation41_spill] sm:$0xff]  ;;  %v6106_v30 = vld [vmem:[#allocation40_spill] sm:$0xff] }
 0x279   : > { %v3118_v41 = vcombine.high %v6073_v9, %v6072_v10  ;;  %v3120_v26 = vcombine.high %v6071_v11, %v6070_v12  ;;  %v3119_v35 = vcombine.low %v6071_v11, %v6070_v12  ;;  %v3121_v32 = vcombine.low %v6069_v13, %v6068_v14  ;;  %v3920_v58 = vld [vmem:[%s5078_s1 + $0x40] sm:$0xff]  }
 0x27a   : > { %3251 = vmatpush3.bf16.msra.mxu1 %v876_v55  ;;  %v872_v52 = vpack.c.bf16 %v841_v29, %v840_v21  ;;  %v3115_v55 = vcombine.low %v6075_v7, %v6074_v8  ;;  %v3124_v24 = vcombine.high %v6067_v15, %v6066_v16  ;;  %v3123_v23 = vcombine.low %v6067_v15, %v6066_v16  ;;  %v6108_v21 = vld [vmem:[#allocation43_spill] sm:$0xff] }
 0x27b   : > { %3252 = vmatprep.subr.bf16.mxu1 %v883_v51  ;;  %3359 = vmatpush3.bf16.msra.mxu0 %v3909_v44  ;;  %v3117_v51 = vcombine.low %v6073_v9, %v6072_v10  ;;  %v6105_v49 = vmov %v6104_v48  ;;  %v3130_v27 = vcombine.high %v6106_v30, %v6104_v48  ;;  %v6111_v44 = vmov %v6110_v31 }
 0x27c   : > { %3360 = vmatprep.subr.bf16.mxu0 %v3910_v50  ;;  %v6112_v50 = vld [vmem:[#allocation45_spill] sm:$0xff] }
 0x27e   : > { %3253 = vmatpush3.bf16.msra.mxu1 %v875_v45  ;;  %v6098_v45 = vld [vmem:[#allocation36_spill] sm:$0xff] }
 0x27f   : > { %3254 = vmatprep.subr.bf16.mxu1 %v882_v59  ;;  %3361 = vmatpush3.bf16.msra.mxu0 %v3911_v33  ;;  %v6099_v28 = vmov %v6098_v45  ;;  %v3126_v38 = vcombine.high %v6098_v45, %v6065_v18  ;;  %v6100_v59 = vld [vmem:[#allocation39_spill] sm:$0xff]  ;;  %v6113_v33 = vld [vmem:[#allocation44_spill] sm:$0xff] }
 0x280   : > { %3362 = vmatprep.subr.bf16.mxu0 %v3912_v39  ;;  %v3125_v34 = vcombine.low %v6099_v28, %v6065_v18  ;;  %v3128_v22 = vcombine.high %v6102_v40, %v6100_v59  ;;  %v3134_v39 = vcombine.high %v6113_v33, %v6112_v50 }
 0x282   : > { %3255 = vmatpush3.bf16.msra.mxu1 %v874_v0  ;;  %v3919_v0 = vld [vmem:[%s5078_s1 + $0x8] sm:$0xff]  }
 0x283   : > { %3256 = vmatprep.subr.bf16.mxu1 %v881_v46  ;;  %3363 = vmatpush3.bf16.msra.mxu0 %v3913_v47  ;;  %v6101_v46 = vmov %v6100_v59  ;;  %v3133_v47 = vcombine.low %v6113_v33, %v6112_v50 }
 0x284   : > { %3364 = vmatprep.subr.bf16.mxu0 %v3914_v60  ;;  %v6115_v60 = vld [vmem:[#allocation46_spill] sm:$0xff] }
 0x286   : > { %3257 = vmatpush3.bf16.msra.mxu1 %v873_v61  ;;  %v3921_v61 = vld [vmem:[%s5078_s1] sm:$0xff]  }
 0x287   : > { %3258 = vmatprep.subr.bf16.mxu1 %v880_v19  ;;  %3365 = vmatpush3.bf16.msra.mxu0 %v3915_v36  ;;  %v6103_v19 = vmov %v6102_v40 }
 0x288   : > { %3366 = vmatprep.subr.bf16.mxu0 %v3916_v56  ;;  %v3127_v25 = vcombine.low %v6103_v19, %v6101_v46 }
 0x28a   : > { %3259 = vmatpush3.bf16.msra.mxu1 %v872_v52  ;;  %v3132_v52 = vcombine.high %v6110_v31, %v6108_v21  ;;  %v6126_v31 = vld [vmem:[#allocation56_spill] sm:$0xff] }
 0x28b   : > { %3367 = vmatpush3.bf16.msra.mxu0 %v3917_v42 }
 0x28c   : > { %3368 = vmatprep.subr.bf16.mxu0 %v3918_v57 }
 0x28d   : > { %1081 = vmatmul.mubr.bf16.vlgmr.msra.gmra.mxu1 %v3109_v20  ;;  %v6107_v20 = vmov %v6106_v30 }
 0x28e   : > { %1088 = vmatprep.mubr.bf16.mxu1 %v3112_v62  ;;  %v3129_v29 = vcombine.low %v6107_v20, %v6105_v49  ;;  %v6109_v62 = vmov %v6108_v21 }
 0x28f   : > { %3369 = vmatpush3.bf16.msra.mxu0 %v3919_v0  ;;  %v3131_v53 = vcombine.low %v6111_v44, %v6109_v62  ;;  %v6125_v0 = vld [vmem:[#allocation54_spill] sm:$0xff] }
 0x290   : > { %3370 = vmatprep.subr.bf16.mxu0 %v3920_v58 }
 0x293   : > { %3371 = vmatpush3.bf16.msra.mxu0 %v3921_v61 }
 0x295   : > { %1089 = vmatmul.mubr.bf16.gmra.mxu1 %v3111_v17  ;;  %v6114_v17 = vld [vmem:[#allocation47_spill] sm:$0xff] }
 0x296   : > { %1096 = vmatprep.mubr.bf16.mxu1 %v3114_v43  ;;  %v6116_v43 = vmov %v6115_v60  ;;  %v3136_v36 = vcombine.high %v6115_v60, %v6114_v17 }
 0x29d   : > { %1097 = vmatmul.mubr.bf16.gmra.mxu1 %v3113_v37  ;;  %v3135_v37 = vcombine.low %v6116_v43, %v6114_v17 }
 0x29e   : > { %1104 = vmatprep.mubr.bf16.mxu1 %v3116_v63  ;;  %v6117_v63 = vld [vmem:[#allocation49_spill] sm:$0xff] }
 0x2a5   : > { %1105 = vmatmul.mubr.bf16.gmra.mxu1 %v3115_v55  ;;  %v6119_v55 = vld [vmem:[#allocation48_spill] sm:$0xff] }
 0x2a6   : > { %1112 = vmatprep.mubr.bf16.mxu1 %v3118_v41  ;;  %v3138_v41 = vcombine.high %v6119_v55, %v6117_v63 }
 0x2ad   : > { %1113 = vmatmul.mubr.bf16.gmra.mxu1 %v3117_v51 }
 0x2ae   : > { %1120 = vmatprep.mubr.bf16.mxu1 %v3120_v26  ;;  %v6121_v26 = vld [vmem:[#allocation51_spill] sm:$0xff] }
 0x2af   : > { %v6122_v1 = vmov %v6121_v26 }
 0x2b5   : > { %1121 = vmatmul.mubr.bf16.gmra.mxu1 %v3119_v35  ;;  %v6118_v35 = vmov %v6117_v63  ;;  %v6127_v63 = vld [vmem:[#allocation58_spill] sm:$0xff] }
 0x2b6   : > { %1128 = vmatprep.mubr.bf16.mxu1 %v3122_v54  ;;  %v6123_v54 = vld [vmem:[#allocation50_spill] sm:$0xff] }
 0x2b7   : > { %v6124_v2 = vmov %v6123_v54 }
 0x2bd   : > { %1129 = vmatmul.mubr.bf16.gmra.mxu1 %v3121_v32  ;;  %v3140_v32 = vcombine.high %v6123_v54, %v6121_v26 }
 0x2be   : > { %1136 = vmatprep.mubr.bf16.mxu1 %v3124_v24  ;;  %v3139_v24 = vcombine.low %v6124_v2, %v6122_v1 }
 0x2c5   : > { %1137 = vmatmul.mubr.bf16.gmra.mxu1 %v3123_v23 }
 0x2c6   : > { %1144 = vmatprep.mubr.bf16.mxu1 %v3126_v38  ;;  %v6120_v38 = vmov %v6119_v55 }
 0x2c7   : > { %v3137_v51 = vcombine.low %v6120_v38, %v6118_v35 }
 0x2cd   : > { %1145 = vmatmul.mubr.bf16.gmra.mxu1 %v3125_v34 }
 0x2ce   : > { %1152 = vmatprep.mubr.bf16.mxu1 %v3128_v22 }
 0x2d5   : > { %1153 = vmatmul.mubr.bf16.gmra.mxu1 %v3127_v25 }
 0x2d6   : > { %1160 = vmatprep.mubr.bf16.mxu1 %v3130_v27 }
 0x2dd   : > { %1161 = vmatmul.mubr.bf16.gmra.mxu1 %v3129_v29 }
 0x2de   : > { %1168 = vmatprep.mubr.bf16.mxu1 %v3132_v52 }
 0x2e5   : > { %1169 = vmatmul.mubr.bf16.gmra.mxu1 %v3131_v53 }
 0x2e6   : > { %1176 = vmatprep.mubr.bf16.mxu1 %v3134_v39 }
 0x2ed   : > { %1177 = vmatmul.mubr.bf16.gmra.mxu1 %v3133_v47 }
 0x2ee   : > { %1184 = vmatprep.mubr.bf16.mxu1 %v3136_v36 }
 0x2f5   : > { %1185 = vmatmul.mubr.bf16.gmra.mxu1 %v3135_v37 }
 0x2f6   : > { %1192 = vmatprep.mubr.bf16.mxu1 %v3138_v41 }
 0x2fd   : > { %1193 = vmatmul.mubr.bf16.gmra.mxu1 %v3137_v51 }
 0x2fe   : > { %1200 = vmatprep.mubr.bf16.mxu1 %v3140_v32 }
 0x305   : > { %1201 = vmatmul.mubr.bf16.gmra.mxu1 %v3139_v24 }
 0x34d   : > { %v3260_v23 = vpop.f32.mrf.mxu1 }
 0x34f   : > { %v3261_v45 = vpop.f32.mrf.mxu1 }
 0x350   : > { %v3262_v40 = vadd.f32 %v3261_v45, %v3260_v23  ;;  %v6128_v23 = vld [vmem:[#allocation60_spill] sm:$0xff] }
 0x351   : > { %v3263_v34 = vpop.f32.mrf.mxu1 }
 0x353   : > { %v3264_v59 = vpop.f32.mrf.mxu1 }
 0x354   : > { %v3265_v22 = vadd.f32 %v3264_v59, %v3263_v34 }
 0x355   : > { %v3266_v56 = vpop.f32.mrf.mxu1 }
 0x356   : > { %v1209_v42 = vpack.c.bf16 %v3265_v22, %v3262_v40 }
 0x357   : > { %v3267_v57 = vpop.f32.mrf.mxu1 }
 0x358   : > { %1396 = vmatprep.mubr.bf16.mxu0 %v1209_v42  ;;  %v3268_v30 = vadd.f32 %v3267_v57, %v3266_v56  ;;  %v6129_v57 = vld [vmem:[#allocation62_spill] sm:$0xff] }
 0x359   : > { %v3269_v25 = vpop.f32.mrf.mxu1  ;;  %1397 = vmatmul.mubr.bf16.vlgmr.msra.gmra.mxu0 %v6125_v0 }
 0x35b   : > { %v3270_v48 = vpop.f32.mrf.mxu1 }
 0x35c   : > { %v3271_v27 = vadd.f32 %v3270_v48, %v3269_v25 }
 0x35d   : > { %v3272_v58 = vpop.f32.mrf.mxu1 }
 0x35e   : > { %v1210_v61 = vpack.c.bf16 %v3271_v27, %v3268_v30 }
 0x35f   : > { %v3273_v29 = vpop.f32.mrf.mxu1 }
 0x360   : > { %1404 = vmatprep.mubr.bf16.mxu0 %v1210_v61  ;;  %v3274_v53 = vadd.f32 %v3273_v29, %v3272_v58  ;;  %v6130_v29 = vld [vmem:[#allocation64_spill] sm:$0xff] }
 0x361   : > { %v3275_v21 = vpop.f32.mrf.mxu1  ;;  %1405 = vmatmul.mubr.bf16.gmra.mxu0 %v6126_v31 }
 0x363   : > { %v3276_v52 = vpop.f32.mrf.mxu1 }
 0x364   : > { %v3277_v39 = vadd.f32 %v3276_v52, %v3275_v21 }
 0x365   : > { %v3278_v47 = vpop.f32.mrf.mxu1 }
 0x366   : > { %v1211_v60 = vpack.c.bf16 %v3277_v39, %v3274_v53 }
 0x367   : > { %v3279_v36 = vpop.f32.mrf.mxu1 }
 0x368   : > { %1412 = vmatprep.mubr.bf16.mxu0 %v1211_v60  ;;  %v3280_v41 = vadd.f32 %v3279_v36, %v3278_v47  ;;  %v6131_v36 = vld [vmem:[#allocation66_spill] sm:$0xff] }
 0x369   : > { %v3281_v37 = vpop.f32.mrf.mxu1  ;;  %1413 = vmatmul.mubr.bf16.gmra.mxu0 %v6127_v63 }
 0x36b   : > { %v3282_v55 = vpop.f32.mrf.mxu1 }
 0x36c   : > { %v3283_v51 = vadd.f32 %v3282_v55, %v3281_v37 }
 0x36d   : > { %v3284_v26 = vpop.f32.mrf.mxu1 }
 0x36e   : > { %v1212_v54 = vpack.c.bf16 %v3283_v51, %v3280_v41 }
 0x36f   : > { %v3285_v32 = vpop.f32.mrf.mxu1 }
 0x370   : > { %1420 = vmatprep.mubr.bf16.mxu0 %v1212_v54  ;;  %v3286_v34 = vadd.f32 %v3285_v32, %v3284_v26  ;;  %v6132_v32 = vld [vmem:[#allocation68_spill] sm:$0xff] }
 0x371   : > { %v3287_v24 = vpop.f32.mrf.mxu1  ;;  %1421 = vmatmul.mubr.bf16.gmra.mxu0 %v6128_v23 }
 0x373   : > { %v3288_v45 = vpop.f32.mrf.mxu1 }
 0x374   : > { %v3289_v59 = vadd.f32 %v3288_v45, %v3287_v24 }
 0x375   : > { %v3290_v40 = vpop.f32.mrf.mxu1 }
 0x376   : > { %v1213_v22 = vpack.c.bf16 %v3289_v59, %v3286_v34 }
 0x377   : > { %v3291_v56 = vpop.f32.mrf.mxu1 }
 0x378   : > { %1428 = vmatprep.mubr.bf16.mxu0 %v1213_v22  ;;  %v3292_v0 = vadd.f32 %v3291_v56, %v3290_v40  ;;  %v6133_v56 = vld [vmem:[#allocation55_spill] sm:$0xff] }
 0x379   : > { %v3293_v42 = vpop.f32.mrf.mxu1  ;;  %1429 = vmatmul.mubr.bf16.gmra.mxu0 %v6129_v57 }
 0x37b   : > { %v3294_v25 = vpop.f32.mrf.mxu1 }
 0x37c   : > { %v3295_v48 = vadd.f32 %v3294_v25, %v3293_v42 }
 0x37d   : > { %v3296_v30 = vpop.f32.mrf.mxu1 }
 0x37e   : > { %v1214_v27 = vpack.c.bf16 %v3295_v48, %v3292_v0 }
 0x37f   : > { %v3297_v58 = vpop.f32.mrf.mxu1 }
 0x380   : > { %1436 = vmatprep.mubr.bf16.mxu0 %v1214_v27  ;;  %v3298_v31 = vadd.f32 %v3297_v58, %v3296_v30  ;;  %v6134_v58 = vld [vmem:[#allocation57_spill] sm:$0xff] }
 0x381   : > { %v3299_v61 = vpop.f32.mrf.mxu1  ;;  %1437 = vmatmul.mubr.bf16.gmra.mxu0 %v6130_v29 }
 0x383   : > { %v3300_v21 = vpop.f32.mrf.mxu1 }
 0x384   : > { %v3301_v52 = vadd.f32 %v3300_v21, %v3299_v61 }
 0x385   : > { %v3302_v53 = vpop.f32.mrf.mxu1 }
 0x386   : > { %v1215_v39 = vpack.c.bf16 %v3301_v52, %v3298_v31 }
 0x387   : > { %v3303_v47 = vpop.f32.mrf.mxu1 }
 0x388   : > { %1444 = vmatprep.mubr.bf16.mxu0 %v1215_v39  ;;  %v3304_v63 = vadd.f32 %v3303_v47, %v3302_v53  ;;  %v6135_v47 = vld [vmem:[#allocation59_spill] sm:$0xff] }
 0x389   : > { %v3305_v60 = vpop.f32.mrf.mxu1  ;;  %1445 = vmatmul.mubr.bf16.gmra.mxu0 %v6131_v36 }
 0x38b   : > { %v3306_v37 = vpop.f32.mrf.mxu1 }
 0x38c   : > { %v3307_v55 = vadd.f32 %v3306_v37, %v3305_v60 }
 0x38d   : > { %v3308_v41 = vpop.f32.mrf.mxu1 }
 0x38e   : > { %v1216_v51 = vpack.c.bf16 %v3307_v55, %v3304_v63 }
 0x38f   : > { %v3309_v26 = vpop.f32.mrf.mxu1 }
 0x390   : > { %1452 = vmatprep.mubr.bf16.mxu0 %v1216_v51  ;;  %v3310_v23 = vadd.f32 %v3309_v26, %v3308_v41  ;;  %v6136_v26 = vld [vmem:[#allocation61_spill] sm:$0xff] }
 0x391   : > { %v3311_v54 = vpop.f32.mrf.mxu1  ;;  %1453 = vmatmul.mubr.bf16.gmra.mxu0 %v6132_v32 }
 0x393   : > { %v3312_v24 = vpop.f32.mrf.mxu1 }
 0x394   : > { %v3313_v45 = vadd.f32 %v3312_v24, %v3311_v54 }
 0x395   : > { %v3314_v34 = vpop.f32.mrf.mxu1 }
 0x396   : > { %v1217_v59 = vpack.c.bf16 %v3313_v45, %v3310_v23 }
 0x397   : > { %v3315_v40 = vpop.f32.mrf.mxu1 }
 0x398   : > { %1460 = vmatprep.mubr.bf16.mxu0 %v1217_v59  ;;  %v3316_v57 = vadd.f32 %v3315_v40, %v3314_v34  ;;  %v6137_v40 = vld [vmem:[#allocation63_spill] sm:$0xff] }
 0x399   : > { %v3317_v22 = vpop.f32.mrf.mxu1  ;;  %1461 = vmatmul.mubr.bf16.gmra.mxu0 %v6133_v56 }
 0x39b   : > { %v3318_v42 = vpop.f32.mrf.mxu1 }
 0x39c   : > { %v3319_v25 = vadd.f32 %v3318_v42, %v3317_v22 }
 0x39d   : > { %v3320_v0 = vpop.f32.mrf.mxu1 }
 0x39e   : > { %v1218_v48 = vpack.c.bf16 %v3319_v25, %v3316_v57 }
 0x39f   : > { %v3321_v30 = vpop.f32.mrf.mxu1 }
 0x3a0   : > { %1468 = vmatprep.mubr.bf16.mxu0 %v1218_v48  ;;  %v3322_v29 = vadd.f32 %v3321_v30, %v3320_v0  ;;  %v6138_v30 = vld [vmem:[#allocation65_spill] sm:$0xff] }
 0x3a1   : > { %v3323_v27 = vpop.f32.mrf.mxu1  ;;  %1469 = vmatmul.mubr.bf16.gmra.mxu0 %v6134_v58 }
 0x3a3   : > { %v3324_v61 = vpop.f32.mrf.mxu1 }
 0x3a4   : > { %v3325_v21 = vadd.f32 %v3324_v61, %v3323_v27 }
 0x3a5   : > { %v3326_v31 = vpop.f32.mrf.mxu1 }
 0x3a6   : > { %v1219_v52 = vpack.c.bf16 %v3325_v21, %v3322_v29 }
 0x3a7   : > { %v3327_v53 = vpop.f32.mrf.mxu1 }
 0x3a8   : > { %1476 = vmatprep.mubr.bf16.mxu0 %v1219_v52  ;;  %v3328_v36 = vadd.f32 %v3327_v53, %v3326_v31  ;;  %v6139_v53 = vld [vmem:[#allocation67_spill] sm:$0xff] }
 0x3a9   : > { %v3329_v39 = vpop.f32.mrf.mxu1  ;;  %1477 = vmatmul.mubr.bf16.gmra.mxu0 %v6135_v47 }
 0x3ab   : > { %v3330_v60 = vpop.f32.mrf.mxu1 }
 0x3ac   : > { %v3331_v37 = vadd.f32 %v3330_v60, %v3329_v39 }
 0x3ad   : > { %v3332_v63 = vpop.f32.mrf.mxu1 }
 0x3ae   : > { %v1220_v55 = vpack.c.bf16 %v3331_v37, %v3328_v36  ;;  %v6140_v37 = vld [vmem:[#allocation69_spill] sm:$0xff] }
 0x3af   : > { %v3333_v41 = vpop.f32.mrf.mxu1 }
 0x3b0   : > { %1484 = vmatprep.mubr.bf16.mxu0 %v1220_v55  ;;  %v3334_v32 = vadd.f32 %v3333_v41, %v3332_v63  ;;  %v5178_v55 = vld [vmem:[%s1260_s17] ss:$0 sm:$0xff] }
 0x3b1   : > { %v3335_v51 = vpop.f32.mrf.mxu1  ;;  %1485 = vmatmul.mubr.bf16.gmra.mxu0 %v6136_v26 }
 0x3b3   : > { %v3336_v54 = vpop.f32.mrf.mxu1 }
 0x3b4   : > { %v3337_v24 = vadd.f32 %v3336_v54, %v3335_v51 }
 0x3b5   : > { %v3338_v23 = vpop.f32.mrf.mxu1 }
 0x3b6   : > { %v1221_v45 = vpack.c.bf16 %v3337_v24, %v3334_v32 }
 0x3b7   : > { %v3339_v34 = vpop.f32.mrf.mxu1 }
 0x3b8   : > { %1492 = vmatprep.mubr.bf16.mxu0 %v1221_v45  ;;  %v3340_v56 = vadd.f32 %v3339_v34, %v3338_v23 }
 0x3b9   : > { %v3341_v59 = vpop.f32.mrf.mxu1  ;;  %1493 = vmatmul.mubr.bf16.gmra.mxu0 %v6137_v40 }
 0x3bb   : > { %v3342_v22 = vpop.f32.mrf.mxu1 }
 0x3bc   : > { %v3343_v42 = vadd.f32 %v3342_v22, %v3341_v59 }
 0x3bd   : > { %v3344_v57 = vpop.f32.mrf.mxu1 }
 0x3be   : > { %v1222_v25 = vpack.c.bf16 %v3343_v42, %v3340_v56 }
 0x3bf   : > { %v3345_v0 = vpop.f32.mrf.mxu1 }
 0x3c0   : > { %1500 = vmatprep.mubr.bf16.mxu0 %v1222_v25  ;;  %v3346_v58 = vadd.f32 %v3345_v0, %v3344_v57 }
 0x3c1   : > { %v3347_v48 = vpop.f32.mrf.mxu1  ;;  %1501 = vmatmul.mubr.bf16.gmra.mxu0 %v6138_v30 }
 0x3c3   : > { %v3348_v27 = vpop.f32.mrf.mxu1 }
 0x3c4   : > { %v3349_v61 = vadd.f32 %v3348_v27, %v3347_v48 }
 0x3c5   : > { %v3350_v29 = vpop.f32.mrf.mxu1 }
 0x3c6   : > { %v1223_v21 = vpack.c.bf16 %v3349_v61, %v3346_v58 }
 0x3c7   : > { %v3351_v31 = vpop.f32.mrf.mxu1 }
 0x3c8   : > { %1508 = vmatprep.mubr.bf16.mxu0 %v1223_v21  ;;  %v3352_v47 = vadd.f32 %v3351_v31, %v3350_v29 }
 0x3c9   : > { %v3353_v52 = vpop.f32.mrf.mxu1  ;;  %1509 = vmatmul.mubr.bf16.gmra.mxu0 %v6139_v53 }
 0x3cb   : > { %v3354_v39 = vpop.f32.mrf.mxu1 }
 0x3cc   : > { %v3355_v60 = vadd.f32 %v3354_v39, %v3353_v52 }
 0x3ce   : > { %v1224_v36 = vpack.c.bf16 %v3355_v60, %v3352_v47 }
 0x3d0   : > { %1516 = vmatprep.mubr.bf16.mxu0 %v1224_v36 }
 0x3d1   : > { %1517 = vmatmul.mubr.bf16.gmra.mxu0 %v6140_v37 }
 0x419   : > { %v3372_v63 = vpop.f32.mrf.mxu0 }
 0x41b   : > { %v3373_v41 = vpop.f32.mrf.mxu0 }
 0x41c   : > { %v3374_v51 = vadd.f32 %v3373_v41, %v3372_v63 }
 0x41d   : > { %v3375_v26 = vpop.f32.mrf.mxu0 }
 0x41e   : > { %v1399_v54 = vadd.f32 %v3374_v51, %v5178_v55 }
 0x41f   : > { %v3376_v32 = vpop.f32.mrf.mxu0 }
 0x420   : > { %v5181_v60 = vmax.f32 %v1399_v54, 0.0   ;;  %v3377_v24 = vadd.f32 %v3376_v32, %v3375_v26 }
 0x421   : > { %v3378_v23 = vpop.f32.mrf.mxu0 }
 0x422   : > { %6141 = vst [vmem:[#allocation70_spill] sm:$0xff] %v5181_v60  ;;  %v6142_v1 = vmov %v5181_v60  ;;  %v1402_v45 = vadd.f32 %v3377_v24, %v5178_v55 }
 0x423   : > { %v3379_v34 = vpop.f32.mrf.mxu0 }
 0x424   : > { %v5184_v56 = vmax.f32 %v1402_v45, 0.0   ;;  %v3380_v59 = vadd.f32 %v3379_v34, %v3378_v23 }
 0x425   : > { %v3381_v40 = vpop.f32.mrf.mxu0 }
 0x426   : > { %6143 = vst [vmem:[#allocation71_spill] sm:$0xff] %v5184_v56  ;;  %v6144_v47 = vmov %v5184_v56  ;;  %v1407_v22 = vadd.f32 %v3380_v59, %v5178_v55 }
 0x427   : > { %v3382_v42 = vpop.f32.mrf.mxu0 }
 0x428   : > { %v5187_v53 = vmax.f32 %v1407_v22, 0.0   ;;  %v3383_v57 = vadd.f32 %v3382_v42, %v3381_v40 }
 0x429   : > { %v3384_v25 = vpop.f32.mrf.mxu0 }
 0x42a   : > { %6145 = vst [vmem:[#allocation72_spill] sm:$0xff] %v5187_v53  ;;  %v6146_v37 = vmov %v5187_v53  ;;  %v1410_v0 = vadd.f32 %v3383_v57, %v5178_v55 }
 0x42b   : > { %v3385_v48 = vpop.f32.mrf.mxu0 }
 0x42c   : > { %v5190_v40 = vmax.f32 %v1410_v0, 0.0   ;;  %v3386_v30 = vadd.f32 %v3385_v48, %v3384_v25 }
 0x42d   : > { %v3387_v27 = vpop.f32.mrf.mxu0 }
 0x42e   : > { %6147 = vst [vmem:[#allocation73_spill] sm:$0xff] %v5190_v40  ;;  %v6148_v2 = vmov %v5190_v40  ;;  %v1415_v58 = vadd.f32 %v3386_v30, %v5178_v55 }
 0x42f   : > { %v3388_v61 = vpop.f32.mrf.mxu0 }
 0x430   : > { %v5193_v51 = vmax.f32 %v1415_v58, 0.0   ;;  %v3389_v56 = vadd.f32 %v3388_v61, %v3387_v27 }
 0x431   : > { %v3390_v29 = vpop.f32.mrf.mxu0 }
 0x432   : > { %6149 = vst [vmem:[#allocation74_spill] sm:$0xff] %v5193_v51  ;;  %v6150_v3 = vmov %v5193_v51  ;;  %v1418_v21 = vadd.f32 %v3389_v56, %v5178_v55 }
 0x433   : > { %v3391_v31 = vpop.f32.mrf.mxu0 }
 0x434   : > { %v5196_v45 = vmax.f32 %v1418_v21, 0.0   ;;  %v3392_v52 = vadd.f32 %v3391_v31, %v3390_v29 }
 0x435   : > { %v3393_v53 = vpop.f32.mrf.mxu0 }
 0x436   : > { %6151 = vst [vmem:[#allocation75_spill] sm:$0xff] %v5196_v45  ;;  %v6152_v4 = vmov %v5196_v45  ;;  %v1423_v39 = vadd.f32 %v3392_v52, %v5178_v55 }
 0x437   : > { %v3394_v60 = vpop.f32.mrf.mxu0 }
 0x438   : > { %v5199_v39 = vmax.f32 %v1423_v39, 0.0   ;;  %v3395_v36 = vadd.f32 %v3394_v60, %v3393_v53 }
 0x439   : > { %v3396_v63 = vpop.f32.mrf.mxu0 }
 0x43a   : > { %6153 = vst [vmem:[#allocation76_spill] sm:$0xff] %v5199_v39  ;;  %v6154_v5 = vmov %v5199_v39  ;;  %v1426_v41 = vadd.f32 %v3395_v36, %v5178_v55 }
 0x43b   : > { %v3397_v26 = vpop.f32.mrf.mxu0 }
 0x43c   : > { %v5202_v51 = vmax.f32 %v1426_v41, 0.0   ;;  %v3398_v54 = vadd.f32 %v3397_v26, %v3396_v63 }
 0x43d   : > { %v3399_v32 = vpop.f32.mrf.mxu0 }
 0x43e   : > { %6155 = vst [vmem:[#allocation77_spill] sm:$0xff] %v5202_v51  ;;  %v6156_v6 = vmov %v5202_v51  ;;  %v1431_v24 = vadd.f32 %v3398_v54, %v5178_v55 }
 0x43f   : > { %v3400_v23 = vpop.f32.mrf.mxu0 }
 0x440   : > { %v5205_v45 = vmax.f32 %v1431_v24, 0.0   ;;  %v3401_v34 = vadd.f32 %v3400_v23, %v3399_v32 }
 0x441   : > { %v3402_v59 = vpop.f32.mrf.mxu0 }
 0x442   : > { %6157 = vst [vmem:[#allocation78_spill] sm:$0xff] %v5205_v45  ;;  %v6158_v7 = vmov %v5205_v45  ;;  %v1434_v40 = vadd.f32 %v3401_v34, %v5178_v55 }
 0x443   : > { %v3403_v22 = vpop.f32.mrf.mxu0 }
 0x444   : > { %v5208_v52 = vmax.f32 %v1434_v40, 0.0   ;;  %v3404_v42 = vadd.f32 %v3403_v22, %v3402_v59 }
 0x445   : > { %v3405_v57 = vpop.f32.mrf.mxu0 }
 0x446   : > { %6159 = vst [vmem:[#allocation79_spill] sm:$0xff] %v5208_v52  ;;  %v6160_v8 = vmov %v5208_v52  ;;  %v1439_v25 = vadd.f32 %v3404_v42, %v5178_v55 }
 0x447   : > { %v3406_v0 = vpop.f32.mrf.mxu0 }
 0x448   : > { %v5211_v58 = vmax.f32 %v1439_v25, 0.0   ;;  %v3407_v48 = vadd.f32 %v3406_v0, %v3405_v57 }
 0x449   : > { %v3408_v30 = vpop.f32.mrf.mxu0 }
 0x44a   : > { %6161 = vst [vmem:[#allocation80_spill] sm:$0xff] %v5211_v58  ;;  %v6162_v9 = vmov %v5211_v58  ;;  %v1442_v27 = vadd.f32 %v3407_v48, %v5178_v55 }
 0x44b   : > { %v3409_v61 = vpop.f32.mrf.mxu0 }
 0x44c   : > { %v5214_v32 = vmax.f32 %v1442_v27, 0.0   ;;  %v3410_v56 = vadd.f32 %v3409_v61, %v3408_v30 }
 0x44d   : > { %v3411_v29 = vpop.f32.mrf.mxu0 }
 0x44e   : > { %6163 = vst [vmem:[#allocation81_spill] sm:$0xff] %v5214_v32  ;;  %v6164_v10 = vmov %v5214_v32  ;;  %v1447_v21 = vadd.f32 %v3410_v56, %v5178_v55 }
 0x44f   : > { %v3412_v31 = vpop.f32.mrf.mxu0 }
 0x450   : > { %v5217_v23 = vmax.f32 %v1447_v21, 0.0   ;;  %v3413_v52 = vadd.f32 %v3412_v31, %v3411_v29 }
 0x451   : > { %v3414_v53 = vpop.f32.mrf.mxu0 }
 0x452   : > { %6165 = vst [vmem:[#allocation82_spill] sm:$0xff] %v5217_v23  ;;  %v6166_v11 = vmov %v5217_v23  ;;  %v1450_v39 = vadd.f32 %v3413_v52, %v5178_v55 }
 0x453   : > { %v3415_v60 = vpop.f32.mrf.mxu0 }
 0x454   : > { %v5220_v54 = vmax.f32 %v1450_v39, 0.0   ;;  %v3416_v58 = vadd.f32 %v3415_v60, %v3414_v53 }
 0x455   : > { %v3417_v36 = vpop.f32.mrf.mxu0 }
 0x456   : > { %6167 = vst [vmem:[#allocation83_spill] sm:$0xff] %v5220_v54  ;;  %v6168_v12 = vmov %v5220_v54  ;;  %v1455_v63 = vadd.f32 %v3416_v58, %v5178_v55 }
 0x457   : > { %v3418_v41 = vpop.f32.mrf.mxu0 }
 0x458   : > { %v5223_v25 = vmax.f32 %v1455_v63, 0.0   ;;  %v3419_v26 = vadd.f32 %v3418_v41, %v3417_v36 }
 0x459   : > { %v3420_v51 = vpop.f32.mrf.mxu0 }
 0x45a   : > { %6169 = vst [vmem:[#allocation84_spill] sm:$0xff] %v5223_v25  ;;  %v6170_v13 = vmov %v5223_v25  ;;  %v1458_v32 = vadd.f32 %v3419_v26, %v5178_v55 }
 0x45b   : > { %v3421_v24 = vpop.f32.mrf.mxu0 }
 0x45c   : > { %v5226_v21 = vmax.f32 %v1458_v32, 0.0   ;;  %v3422_v23 = vadd.f32 %v3421_v24, %v3420_v51 }
 0x45d   : > { %v3423_v45 = vpop.f32.mrf.mxu0 }
 0x45e   : > { %6171 = vst [vmem:[#allocation85_spill] sm:$0xff] %v5226_v21  ;;  %v6172_v14 = vmov %v5226_v21  ;;  %v1463_v34 = vadd.f32 %v3422_v23, %v5178_v55 }
 0x45f   : > { %v3424_v59 = vpop.f32.mrf.mxu0 }
 0x460   : > { %v5229_v57 = vmax.f32 %v1463_v34, 0.0   ;;  %v3425_v54 = vadd.f32 %v3424_v59, %v3423_v45 }
 0x461   : > { %v3426_v40 = vpop.f32.mrf.mxu0 }
 0x462   : > { %6173 = vst [vmem:[#allocation86_spill] sm:$0xff] %v5229_v57  ;;  %v6174_v15 = vmov %v5229_v57  ;;  %v1466_v22 = vadd.f32 %v3425_v54, %v5178_v55 }
 0x463   : > { %v3427_v42 = vpop.f32.mrf.mxu0 }
 0x464   : > { %v5232_v0 = vmax.f32 %v1466_v22, 0.0   ;;  %v3428_v25 = vadd.f32 %v3427_v42, %v3426_v40 }
 0x465   : > { %v3429_v48 = vpop.f32.mrf.mxu0 }
 0x466   : > { %6175 = vst [vmem:[#allocation87_spill] sm:$0xff] %v5232_v0  ;;  %v6176_v16 = vmov %v5232_v0  ;;  %v1471_v30 = vadd.f32 %v3428_v25, %v5178_v55 }
 0x467   : > { %v3430_v27 = vpop.f32.mrf.mxu0 }
 0x468   : > { %v5235_v59 = vmax.f32 %v1471_v30, 0.0   ;;  %v3431_v61 = vadd.f32 %v3430_v27, %v3429_v48 }
 0x469   : > { %v3432_v56 = vpop.f32.mrf.mxu0 }
 0x46a   : > { %6177 = vst [vmem:[#allocation88_spill] sm:$0xff] %v5235_v59  ;;  %v6178_v17 = vmov %v5235_v59  ;;  %v1474_v29 = vadd.f32 %v3431_v61, %v5178_v55 }
 0x46b   : > { %v3433_v21 = vpop.f32.mrf.mxu0 }
 0x46c   : > { %v5238_v26 = vmax.f32 %v1474_v29, 0.0   ;;  %v3434_v57 = vadd.f32 %v3433_v21, %v3432_v56 }
 0x46d   : > { %v3435_v31 = vpop.f32.mrf.mxu0 }
 0x46e   : > { %6179 = vst [vmem:[#allocation89_spill] sm:$0xff] %v5238_v26  ;;  %v6180_v18 = vmov %v5238_v26  ;;  %v1479_v52 = vadd.f32 %v3434_v57, %v5178_v55 }
 0x46f   : > { %v3436_v53 = vpop.f32.mrf.mxu0 }
 0x470   : > { %v5241_v24 = vmax.f32 %v1479_v52, 0.0   ;;  %v3437_v0 = vadd.f32 %v3436_v53, %v3435_v31 }
 0x471   : > { %v3438_v39 = vpop.f32.mrf.mxu0 }
 0x472   : > { %6181 = vst [vmem:[#allocation90_spill] sm:$0xff] %v5241_v24  ;;  %v6182_v19 = vmov %v5241_v24  ;;  %v1482_v60 = vadd.f32 %v3437_v0, %v5178_v55 }
 0x473   : > { %v3439_v58 = vpop.f32.mrf.mxu0 }
 0x474   : > { %v5244_v41 = vmax.f32 %v1482_v60, 0.0   ;;  %v3440_v36 = vadd.f32 %v3439_v58, %v3438_v39 }
 0x475   : > { %v3441_v63 = vpop.f32.mrf.mxu0 }
 0x476   : > { %6183 = vst [vmem:[#allocation91_spill] sm:$0xff] %v5244_v41  ;;  %v6184_v20 = vmov %v5244_v41  ;;  %v1487_v51 = vadd.f32 %v3440_v36, %v5178_v55 }
 0x477   : > { %v3442_v32 = vpop.f32.mrf.mxu0 }
 0x478   : > { %v5247_v22 = vmax.f32 %v1487_v51, 0.0   ;;  %v3443_v26 = vadd.f32 %v3442_v32, %v3441_v63 }
 0x479   : > { %v3444_v23 = vpop.f32.mrf.mxu0 }
 0x47a   : > { %6185 = vst [vmem:[#allocation92_spill] sm:$0xff] %v5247_v22  ;;  %v6186_v28 = vmov %v5247_v22  ;;  %v1490_v45 = vadd.f32 %v3443_v26, %v5178_v55 }
 0x47b   : > { %v3445_v34 = vpop.f32.mrf.mxu0 }
 0x47c   : > { %v5250_v48 = vmax.f32 %v1490_v45, 0.0   ;;  %v3446_v24 = vadd.f32 %v3445_v34, %v3444_v23 }
 0x47d   : > { %v3447_v59 = vpop.f32.mrf.mxu0 }
 0x47e   : > { %6187 = vst [vmem:[#allocation93_spill] sm:$0xff] %v5250_v48  ;;  %v6188_v33 = vmov %v5250_v48  ;;  %v1495_v54 = vadd.f32 %v3446_v24, %v5178_v55 }
 0x47f   : > { %v3448_v40 = vpop.f32.mrf.mxu0 }
 0x480   : > { %v5253_v61 = vmax.f32 %v1495_v54, 0.0   ;;  %v3449_v41 = vadd.f32 %v3448_v40, %v3447_v59  ;;  %v6222_v59 = vmov %v6178_v17  ;;  %v6227_v54 = vmov %v6168_v12 }
 0x481   : > { %v3450_v42 = vpop.f32.mrf.mxu0  ;;  %v6237_v40 = vmov %v6148_v2 }
 0x482   : > { %6189 = vst [vmem:[#allocation94_spill] sm:$0xff] %v5253_v61  ;;  %v6190_v35 = vmov %v5253_v61  ;;  %v1498_v25 = vadd.f32 %v3449_v41, %v5178_v55  ;;  %v6219_v41 = vmov %v6184_v20 }
 0x483   : > { %v3451_v30 = vpop.f32.mrf.mxu0 }
 0x484   : > { %v5256_v27 = vmax.f32 %v1498_v25, 0.0   ;;  %v3452_v22 = vadd.f32 %v3451_v30, %v3450_v42  ;;  %v6226_v25 = vmov %v6170_v13 }
 0x485   : > { %v3453_v56 = vpop.f32.mrf.mxu0 }
 0x486   : > { %6191 = vst [vmem:[#allocation95_spill] sm:$0xff] %v5256_v27  ;;  %v6192_v38 = vmov %v5256_v27  ;;  %v1503_v29 = vadd.f32 %v3452_v22, %v5178_v55  ;;  %v6218_v22 = vmov %v6186_v28 }
 0x487   : > { %v3454_v21 = vpop.f32.mrf.mxu0 }
 0x488   : > { %v5259_v42 = vmax.f32 %v1503_v29, 0.0   ;;  %v3455_v48 = vadd.f32 %v3454_v21, %v3453_v56  ;;  %v6225_v21 = vmov %v6172_v14  ;;  %v6239_v56 = vmov %v6144_v47 }
 0x489   : > { %v3456_v57 = vpop.f32.mrf.mxu0 }
 0x48a   : > { %6193 = vst [vmem:[#allocation96_spill] sm:$0xff] %v5259_v42  ;;  %v6194_v43 = vmov %v5259_v42  ;;  %v1506_v31 = vadd.f32 %v3455_v48, %v5178_v55  ;;  %v6217_v48 = vmov %v6188_v33 }
 0x48b   : > { %v3457_v52 = vpop.f32.mrf.mxu0  ;;  %v6214_v42 = vmov %v6194_v43 }
 0x48c   : > { %v5262_v29 = vmax.f32 %v1506_v31, 0.0   ;;  %v3458_v61 = vadd.f32 %v3457_v52, %v3456_v57  ;;  %v6224_v57 = vmov %v6174_v15  ;;  %v6231_v52 = vmov %v6160_v8 }
 0x48d   : > { %v3459_v53 = vpop.f32.mrf.mxu0 }
 0x48e   : > { %6195 = vst [vmem:[#allocation97_spill] sm:$0xff] %v5262_v29  ;;  %v6196_v44 = vmov %v5262_v29  ;;  %v1511_v0 = vadd.f32 %v3458_v61, %v5178_v55  ;;  %v6216_v61 = vmov %v6190_v35 }
 0x48f   : > { %v3460_v39 = vpop.f32.mrf.mxu0  ;;  %v6213_v29 = vmov %v6196_v44 }
 0x490   : > { %v5265_v31 = vmax.f32 %v1511_v0, 0.0   ;;  %v3461_v27 = vadd.f32 %v3460_v39, %v3459_v53  ;;  %v6223_v0 = vmov %v6176_v16  ;;  %v6234_v39 = vmov %v6154_v5 }
 0x491   : > { %v3462_v60 = vpop.f32.mrf.mxu0  ;;  %v6238_v53 = vmov %v6146_v37 }
 0x492   : > { %6197 = vst [vmem:[#allocation98_spill] sm:$0xff] %v5265_v31  ;;  %v1514_v58 = vadd.f32 %v3461_v27, %v5178_v55  ;;  %v6211_v46 = vmov %v5265_v31  ;;  %v6215_v27 = vmov %v6192_v38 }
 0x493   : > { %v3463_v36 = vpop.f32.mrf.mxu0  ;;  %v6212_v31 = vmov %v6211_v46  ;;  %v4476_v46 = vmov (%p5279_p2), 0  }
 0x494   : > { %v5268_v63 = vmax.f32 %v1514_v58, 0.0   ;;  %v3464_v51 = vadd.f32 %v3463_v36, %v3462_v60  ;;  %v6230_v58 = vmov %v6162_v9  ;;  %v6240_v60 = vmov %v6142_v1  ;;  %3922 = vset.pattern.permute.xlu0 (%p5279_p2), %v4476_v46  ;;  %3923 = vset.pattern.permute.xlu1 (%p5279_p2), %v4476_v46 }
 0x495   : > { %v3465_v32 = vpop.f32.mrf.mxu0  ;;  %v5388_v60 = vld [vmem:[%s5879_s9] ss:$0 sm:$0xff] (%p5279_p2)  ;;  %s4172_s9 = scalar_lea.vmem (%p5279_p2), %s2952_s8, 512 }
 0x496   : > { %6199 = vst [vmem:[#allocation99_spill] sm:$0xff] %v5268_v63  ;;  %v6200_v49 = vmov %v5268_v63  ;;  %v1519_v26 = vadd.f32 %v3464_v51, %v5178_v55  ;;  %v6233_v63 = vmov %v6156_v6  ;;  %v6236_v51 = vmov %v6150_v3  ;;  %p4173_p3 = scmp.ne.s32.totalorder (%p5279_p2), %s2952_s8, %s4172_s9  ;;  %p4178_p5 = scmp.lt.s32.totalorder (%p5279_p2), %s4172_s9, %s4172_s9 }
 0x497   : > { %v3466_v23 = vpop.f32.mrf.mxu0  ;;  %v6210_v36 = vmov %v6200_v49  ;;  %v1567_v49 = vmul.f32 (%p5279_p2), %v5388_v60, %v6148_v2  ;;  %v1568_v59 = vmul.f32 (%p5279_p2), %v5388_v60, %v6150_v3  ;;  %v1571_v46 = vmul.f32 (%p5279_p2), %v5388_v60, %v6156_v6 }
 0x498   : > { %v5271_v34 = vmax.f32 %v1519_v26, 0.0   ;;  %v3467_v45 = vadd.f32 %v3466_v23, %v3465_v32  ;;  %v6221_v26 = vmov %v6180_v18  ;;  %v6228_v23 = vmov %v6166_v11  ;;  %p4179_p6 = por (%p5279_p2), %p4178_p5, %p4177_p4 }
 0x499   : > { %v6229_v32 = vmov %v6164_v10  ;;  %v1575_v54 = vmul.f32 (%p5279_p2), %v5388_v60, %v6164_v10  ;;  %v1574_v40 = vmul.f32 (%p5279_p2), %v5388_v60, %v6162_v9  ;;  %v1577_v41 = vmul.f32 (%p5279_p2), %v5388_v60, %v6168_v12  ;;  %v6243_v36 = vld [vmem:[#allocation98_spill] sm:$0xff] (%p5279_p2) }
 0x49a   : > { %6201 = vst [vmem:[#allocation100_spill] sm:$0xff] %v5271_v34  ;;  %v1522_v24 = vadd.f32 %v3467_v45, %v5178_v55  ;;  %v6208_v50 = vmov %v5271_v34  ;;  %v6232_v55 = vmov %v6158_v7  ;;  %v6235_v45 = vmov %v6152_v4  ;;  %p4180_p7 = pnand (%p5279_p2), %p4179_p6, %p4173_p3 }
 0x49b   : > { %v6209_v34 = vmov %v6208_v50  ;;  %554 = sbr.rel (!%p5279_p2) target bundleno = 355 (0x163), region = 99  ;;  %v1566_v50 = vmul.f32 (%p5279_p2), %v5388_v60, %v6146_v37  ;;  %v1565_v55 = vmul.f32 (%p5279_p2), %v5388_v60, %v6144_v47  ;;  %v1576_v42 = vmul.f32 (%p5279_p2), %v5388_v60, %v6166_v11 }
 0x49c   : > { %v5274_v30 = vmax.f32 %v1522_v24, 0.0   ;;  %v6220_v24 = vmov %v6182_v19  ;;  %v1569_v34 = vmul.f32 (%p5279_p2), %v5388_v60, %v6152_v4  ;;  %v1579_v25 = vmul.f32 (%p5279_p2), %v5388_v60, %v6172_v14 }
 0x49d   :  { %1600 = vadd.xlane.f32.xlu1 (%p5279_p2), %v1566_v50  ;;  %v1572_v50 = vmul.f32 (%p5279_p2), %v5388_v60, %v6158_v7  ;;  %v1581_v22 = vmul.f32 (%p5279_p2), %v5388_v60, %v6176_v16  ;;  %v1580_v56 = vmul.f32 (%p5279_p2), %v5388_v60, %v6174_v15  ;;  %v1583_v29 = vmul.f32 (%p5279_p2), %v5388_v60, %v6180_v18  ;;  %v6242_v27 = vld [vmem:[#allocation99_spill] sm:$0xff] (%p5279_p2) }
 0x49e   : > { %6203 = vst [vmem:[#allocation101_spill] sm:$0xff] %v5274_v30  ;;  %v6206_v62 = vmov %v5274_v30  ;;  %v1582_v21 = vmul.f32 (%p5279_p2), %v5388_v60, %v6178_v17  ;;  %v1585_v48 = vmul.f32 (%p5279_p2), %v5388_v60, %v6184_v20  ;;  %v1584_v57 = vmul.f32 (%p5279_p2), %v5388_v60, %v6182_v19 }
 0x49f   : > { %v6207_v30 = vmov %v6206_v62  ;;  %v1564_v62 = vmul.f32 (%p5279_p2), %v5388_v60, %v6142_v1  ;;  %v1587_v31 = vmul.f32 (%p5279_p2), %v5388_v60, %v6188_v33  ;;  %v1586_v52 = vmul.f32 (%p5279_p2), %v5388_v60, %v6186_v28 }
 0x4a0   :  { %v1578_v30 = vmul.f32 %v5388_v60, %v6170_v13  ;;  %v1589_v61 = vmul.f32 %v5388_v60, %v6192_v38  ;;  %v1588_v53 = vmul.f32 %v5388_v60, %v6190_v35  ;;  %v1591_v0 = vmul.f32 %v5388_v60, %v6196_v44 }
 0x4a1   :  { %1596 = vadd.xlane.f32.xlu0 %v1564_v62  ;;  %1602 = vadd.xlane.f32.xlu1 %v1567_v49  ;;  %v1570_v62 = vmul.f32 %v5388_v60, %v6154_v5  ;;  %v1573_v49 = vmul.f32 %v5388_v60, %v6160_v8  ;;  %v1590_v39 = vmul.f32 %v5388_v60, %v6194_v43  ;;  %v6245_v26 = vld [vmem:[#allocation100_spill] sm:$0xff]  ;;  %v1896_v45 = vlaneseq }
 0x4a2   :  { %v1593_v58 = vmul.f32 %v5388_v60, %v6242_v27  ;;  %v1592_v63 = vmul.f32 %v5388_v60, %v6243_v36  ;;  %v1594_v23 = vmul.f32 %v5388_v60, %v6245_v26 }
 0x4a3   :  { %v1897_v24 = vshrl.u32 %v1896_v45, 7 }
 0x4a5   :  { %1598 = vadd.xlane.f32.xlu0 %v1565_v55  ;;  %1606 = vadd.xlane.f32.xlu1 %v1569_v34  ;;  %v6244_v51 = vld [vmem:[#allocation101_spill] sm:$0xff]  ;;  %v1898_v55 = vsub.s32 0, %v1897_v24  ;;  %v6246_v34 = vld [vmem:[#allocation52_spill] sm:$0xff] }
 0x4a6   :  { %v1595_v32 = vmul.f32 %v5388_v60, %v6244_v51 }
 0x4a9   :  { %1604 = vadd.xlane.f32.xlu0 %v1568_v59  ;;  %1610 = vadd.xlane.f32.xlu1 %v1571_v46  ;;  %v5455_v59 = vrot.slane %v6246_v34, %v1898_v55  ;;  %v1909_v46 = vsub.s32 1, %v1897_v24 }
 0x4ad   :  { %1608 = vadd.xlane.f32.xlu0 %v1570_v62  ;;  %1614 = vadd.xlane.f32.xlu1 %v1573_v49  ;;  %v1942_v62 = vsub.s32 4, %v1897_v24  ;;  %v3161_v49 = vld [vmem:[#allocation2] ss:$0 sm:$0xff] }
 0x4af   :  { %v5463_v60 = vrot.slane %v6246_v34, %v1942_v62 }
 0x4b1   :  { %1612 = vadd.xlane.f32.xlu0 %v1572_v50  ;;  %1618 = vadd.xlane.f32.xlu1 %v1575_v54  ;;  %v5460_v50 = vrot.slane %v6246_v34, %v1909_v46  ;;  %v1953_v54 = vsub.s32 5, %v1897_v24 }
 0x4b5   :  { %1616 = vadd.xlane.f32.xlu0 %v1574_v40  ;;  %1622 = vadd.xlane.f32.xlu1 %v1577_v41  ;;  %v1920_v40 = vsub.s32 2, %v1897_v24  ;;  %v5468_v41 = vrot.slane %v6246_v34, %v1953_v54 }
 0x4b9   :  { %1620 = vadd.xlane.f32.xlu0 %v1576_v42  ;;  %1626 = vadd.xlane.f32.xlu1 %v1579_v25  ;;  %v1964_v42 = vsub.s32 6, %v1897_v24  ;;  %v5472_v25 = vrot.slane %v6246_v34, %v1920_v40 }
 0x4bd   :  { %1624 = vadd.xlane.f32.xlu0 %v1578_v30  ;;  %1630 = vadd.xlane.f32.xlu1 %v1581_v22  ;;  %v5476_v30 = vrot.slane %v6246_v34, %v1964_v42  ;;  %v1975_v22 = vsub.s32 7, %v1897_v24 }
 0x4c1   :  { %1628 = vadd.xlane.f32.xlu0 %v1580_v56  ;;  %1634 = vadd.xlane.f32.xlu1 %v1583_v29  ;;  %v1931_v56 = vsub.s32 3, %v1897_v24  ;;  %v5481_v29 = vrot.slane %v6246_v34, %v1975_v22 }
 0x4c5   :  { %1632 = vadd.xlane.f32.xlu0 %v1582_v21  ;;  %1638 = vadd.xlane.f32.xlu1 %v1585_v48  ;;  %v5485_v21 = vrot.slane %v6246_v34, %v1931_v56  ;;  %v6247_v48 = vld [vmem:[#allocation53_spill] sm:$0xff] }
 0x4c9   :  { %1636 = vadd.xlane.f32.xlu0 %v1584_v57  ;;  %1642 = vadd.xlane.f32.xlu1 %v1587_v31  ;;  %v5489_v57 = vrot.slane %v6247_v48, %v1898_v55  ;;  %v5494_v31 = vrot.slane %v6247_v48, %v1909_v46 }
 0x4cd   :  { %1640 = vadd.xlane.f32.xlu0 %v1586_v52  ;;  %1646 = vadd.xlane.f32.xlu1 %v1589_v61  ;;  %v5499_v52 = vrot.slane %v6247_v48, %v1920_v40  ;;  %v5504_v61 = vrot.slane %v6247_v48, %v1931_v56 }
 0x4d1   :  { %1644 = vadd.xlane.f32.xlu0 %v1588_v53  ;;  %1650 = vadd.xlane.f32.xlu1 %v1591_v0  ;;  %v5509_v53 = vrot.slane %v6247_v48, %v1942_v62  ;;  %v5514_v0 = vrot.slane %v6247_v48, %v1953_v54 }
 0x4d5   :  { %1648 = vadd.xlane.f32.xlu0 %v1590_v39  ;;  %1654 = vadd.xlane.f32.xlu1 %v1593_v58  ;;  %v5519_v39 = vrot.slane %v6247_v48, %v1964_v42  ;;  %v5524_v58 = vrot.slane %v6247_v48, %v1975_v22 }
 0x4d7   :  { %6248 = vst [vmem:[#allocation20_spill] sm:$0xff] %v5524_v58 }
 0x4d9   :  { %1652 = vadd.xlane.f32.xlu0 %v1592_v63  ;;  %1658 = vadd.xlane.f32.xlu1 %v1595_v32 }
 0x4dd   :  { %1656 = vadd.xlane.f32.xlu0 %v1594_v23 }
 0x4ea   :  { %1901 = vbcast.lane.b32.xlu1 %v5455_v59, 256 }
 0x4ee   :  { %1905 = vbcast.lane.b32.xlu1 %v5455_v59, 264 }
 0x4f2   :  { %1912 = vbcast.lane.b32.xlu1 %v5460_v50, 256 }
 0x4f3   :  { %1667 = vperm.xlu0 %3922, %v3161_v49  }
 0x4f6   :  { %1916 = vbcast.lane.b32.xlu1 %v5460_v50, 264 }
 0x4f7   :  { %1945 = vbcast.lane.b32.xlu0 %v5463_v60, 256 }
 0x4fa   :  { %1923 = vbcast.lane.b32.xlu1 %v5472_v25, 256 }
 0x4fb   :  { %1956 = vbcast.lane.b32.xlu0 %v5468_v41, 256 }
 0x4fe   :  { %1927 = vbcast.lane.b32.xlu1 %v5472_v25, 264 }
 0x4ff   :  { %1967 = vbcast.lane.b32.xlu0 %v5476_v30, 256 }
 0x502   :  { %1934 = vbcast.lane.b32.xlu1 %v5485_v21, 256 }
 0x503   :  { %1978 = vbcast.lane.b32.xlu0 %v5481_v29, 256 }
 0x506   :  { %1938 = vbcast.lane.b32.xlu1 %v5485_v21, 264 }
 0x507   :  { %1989 = vbcast.lane.b32.xlu0 %v5489_v57, 256 }
 0x50a   :  { %1949 = vbcast.lane.b32.xlu1 %v5463_v60, 264 }
 0x50b   :  { %2000 = vbcast.lane.b32.xlu0 %v5494_v31, 256 }
 0x50e   :  { %1960 = vbcast.lane.b32.xlu1 %v5468_v41, 264 }
 0x50f   :  { %2011 = vbcast.lane.b32.xlu0 %v5499_v52, 256 }
 0x512   :  { %1971 = vbcast.lane.b32.xlu1 %v5476_v30, 264 }
 0x513   :  { %2022 = vbcast.lane.b32.xlu0 %v5504_v61, 256 }
 0x516   :  { %1982 = vbcast.lane.b32.xlu1 %v5481_v29, 264 }
 0x517   :  { %2033 = vbcast.lane.b32.xlu0 %v5509_v53, 256 }
 0x51a   :  { %1993 = vbcast.lane.b32.xlu1 %v5489_v57, 264 }
 0x51b   :  { %2044 = vbcast.lane.b32.xlu0 %v5514_v0, 256 }
 0x51e   :  { %2004 = vbcast.lane.b32.xlu1 %v5494_v31, 264 }
 0x51f   :  { %2055 = vbcast.lane.b32.xlu0 %v5519_v39, 256 }
 0x522   :  { %2015 = vbcast.lane.b32.xlu1 %v5499_v52, 264 }
 0x523   :  { %2066 = vbcast.lane.b32.xlu0 %v5524_v58, 256 }
 0x526   :  { %v1601_v63 = vpop.xlane.xlu1 %1600  ;;  %2026 = vbcast.lane.b32.xlu1 %v5504_v61, 264 }
 0x52a   :  { %v1597_v32 = vpop.xlane.xlu0 %1596  ;;  %v1603_v23 = vpop.xlane.xlu1 %1602  ;;  %2037 = vbcast.lane.b32.xlu1 %v5509_v53, 264 }
 0x52e   :  { %v1599_v45 = vpop.xlane.xlu0 %1598  ;;  %v1607_v24 = vpop.xlane.xlu1 %1606  ;;  %2048 = vbcast.lane.b32.xlu1 %v5514_v0, 264 }
 0x532   :  { %v1605_v55 = vpop.xlane.xlu0 %1604  ;;  %v1611_v46 = vpop.xlane.xlu1 %1610  ;;  %2059 = vbcast.lane.b32.xlu1 %v5519_v39, 264 }
 0x536   :  { %v1615_v62 = vpop.xlane.xlu1 %1614  ;;  %2070 = vbcast.lane.b32.xlu1 %v5524_v58, 264  ;;  %v1609_v49 = vpop.xlane.xlu0 %1608 }
 0x53a   :  { %v1619_v54 = vpop.xlane.xlu1 %1618  ;;  %v1613_v40 = vpop.xlane.xlu0 %1612 }
 0x53e   :  { %v5534_v42 = vpop.xlane.xlu1 %1622  ;;  %v1617_v56 = vpop.xlane.xlu0 %1616 }
 0x542   :  { %v5536_v22 = vpop.xlane.xlu1 %1626  ;;  %v1621_v51 = vpop.xlane.xlu0 %1620 }
 0x546   :  { %v5538_v26 = vpop.xlane.xlu1 %1630  ;;  %v5542_v27 = vpop.xlane.xlu0 %1624 }
 0x54a   :  { %v5540_v36 = vpop.xlane.xlu1 %1634  ;;  %v5546_v44 = vpop.xlane.xlu0 %1628 }
 0x54e   :  { %v5544_v43 = vpop.xlane.xlu1 %1638  ;;  %v5550_v38 = vpop.xlane.xlu0 %1632 }
 0x552   :  { %v5548_v35 = vpop.xlane.xlu1 %1642  ;;  %v5554_v33 = vpop.xlane.xlu0 %1636 }
 0x556   :  { %v5552_v28 = vpop.xlane.xlu1 %1646  ;;  %v5558_v16 = vpop.xlane.xlu0 %1640 }
 0x55a   :  { %v5556_v15 = vpop.xlane.xlu1 %1650  ;;  %v5562_v20 = vpop.xlane.xlu0 %1644 }
 0x55e   :  { %v5560_v19 = vpop.xlane.xlu1 %1654  ;;  %v5566_v18 = vpop.xlane.xlu0 %1648 }
 0x562   :  { %v5564_v17 = vpop.xlane.xlu1 %1658  ;;  %v5570_v34 = vpop.xlane.xlu0 %1652 }
 0x566   :  { %v5568_v48 = vpop.permute.xlu1 %1901  ;;  %v5574_v14 = vpop.xlane.xlu0 %1656 }
 0x56a   :  { %v5572_v13 = vpop.permute.xlu1 %1905 }
 0x56e   :  { %v5576_v11 = vpop.permute.xlu1 %1912  ;;  %v5578_v12 = vpop.permute.xlu0 %1667 }
 0x56f   :  { %v1673_v9 = vadd.f32 %v5578_v12, %v1603_v23  ;;  %v1672_v10 = vadd.f32 %v5578_v12, %v1601_v63  ;;  %v1671_v8 = vadd.f32 %v5578_v12, %v1599_v45  ;;  %v1670_v5 = vadd.f32 %v5578_v12, %v1597_v32 }
 0x570   :  { %v1675_v3 = vadd.f32 %v5578_v12, %v1607_v24  ;;  %v1674_v47 = vadd.f32 %v5578_v12, %v1605_v55  ;;  %v1677_v63 = vadd.f32 %v5578_v12, %v1611_v46  ;;  %v1676_v45 = vadd.f32 %v5578_v12, %v1609_v49 }
 0x571   :  { %v3165_v6 = vmul.f32 -1.442695, %v1673_v9  ;;  %v3164_v1 = vmul.f32 -1.442695, %v1672_v10  ;;  %v3163_v4 = vmul.f32 -1.442695, %v1671_v8  ;;  %v1679_v10 = vadd.f32 %v5578_v12, %v1615_v62 }
 0x572   :  { %v5582_v7 = vpop.permute.xlu1 %1916  ;;  %v3162_v2 = vmul.f32 -1.442695, %v1670_v5  ;;  %v3167_v23 = vmul.f32 -1.442695, %v1675_v3  ;;  %v3166_v58 = vmul.f32 -1.442695, %v1674_v47  ;;  %v1678_v32 = vadd.f32 %v5578_v12, %v1613_v40 }
 0x573   :  { %3924 = vpow2.f32 %v3165_v6  ;;  %v3169_v9 = vmul.f32 -1.442695, %v1677_v63  ;;  %v3168_v5 = vmul.f32 -1.442695, %v1676_v45  ;;  %v1680_v3 = vadd.f32 %v5578_v12, %v1617_v56 }
 0x574   :  { %3926 = vpow2.f32 %v3164_v1  ;;  %v3171_v6 = vmul.f32 -1.442695, %v1679_v10  ;;  %v1681_v1 = vadd.f32 %v5578_v12, %v1619_v54  ;;  %v3170_v47 = vmul.f32 -1.442695, %v1678_v32 }
 0x575   :  { %3928 = vpow2.f32 %v3163_v4  ;;  %v1682_v4 = vadd.f32 %v5578_v12, %v1621_v51  ;;  %v1683_v49 = vadd.f32 %v5578_v12, %v5534_v42  ;;  %v1684_v54 = vadd.f32 %v5578_v12, %v5542_v27 }
 0x576   :  { %v5588_v37 = vpop.permute.xlu1 %1923  ;;  %3930 = vpow2.f32 %v3162_v2  ;;  %v3172_v2 = vmul.f32 -1.442695, %v1680_v3  ;;  %v3173_v55 = vmul.f32 -1.442695, %v1681_v1  ;;  %v1685_v42 = vadd.f32 %v5578_v12, %v5536_v22 }
 0x577   :  { %3932 = vpow2.f32 %v3167_v23  ;;  %v3176_v3 = vmul.f32 -1.442695, %v1684_v54  ;;  %v1686_v27 = vadd.f32 %v5578_v12, %v5546_v44  ;;  %v1688_v22 = vadd.f32 %v5578_v12, %v5550_v38  ;;  %v5617_v44 = vpop.permute.xlu0 %1945 }
 0x578   :  { %3934 = vpow2.f32 %v3166_v58  ;;  %v3174_v58 = vmul.f32 -1.442695, %v1682_v4  ;;  %v1690_v38 = vadd.f32 %v5578_v12, %v5554_v33  ;;  %v1692_v33 = vadd.f32 %v5578_v12, %v5558_v16 }
 0x579   :  { %3936 = vpow2.f32 %v3169_v9 }
 0x57a   :  { %v5594_v8 = vpop.permute.xlu1 %1927  ;;  %3938 = vpow2.f32 %v3168_v5  ;;  %v3175_v5 = vmul.f32 -1.442695, %v1683_v49  ;;  %v3184_v16 = vmul.f32 -1.442695, %v1692_v33 }
 0x57b   :  { %3940 = vpow2.f32 %v3171_v6 }
 0x57c   :  { %3942 = vpow2.f32 %v3170_v47 }
 0x57d   :  { %3944 = vpow2.f32 %v3172_v2  ;;  %v3177_v2 = vmul.f32 -1.442695, %v1685_v42  ;;  %v5625_v42 = vpop.permute.xlu0 %1956 }
 0x57e   :  { %v5599_v24 = vpop.permute.xlu1 %1934  ;;  %3946 = vpow2.f32 %v3173_v55  ;;  %v1687_v55 = vadd.f32 %v5578_v12, %v5538_v26  ;;  %v1689_v26 = vadd.f32 %v5578_v12, %v5540_v36  ;;  %v1691_v36 = vadd.f32 %v5578_v12, %v5544_v43 }
 0x57f   :  { %3948 = vpow2.f32 %v3174_v58 }
 0x580   :  { %v3925_v46 = vpop.eup %3924 }
 0x581   :  { %v3927_v62 = vpop.eup %3926  ;;  %v1801_v51 = vadd.f32 1.0, %v3925_v46  ;;  %v3178_v46 = vmul.f32 -1.442695, %v1686_v27 }
 0x582   :  { %v3929_v40 = vpop.eup %3928  ;;  %v1800_v45 = vadd.f32 1.0, %v3927_v62  ;;  %v5605_v9 = vpop.permute.xlu1 %1938 }
 0x583   :  { %v3931_v56 = vpop.eup %3930  ;;  %v1799_v23 = vadd.f32 1.0, %v3929_v40 }
 0x584   :  { %v3933_v63 = vpop.eup %3932  ;;  %v1798_v10 = vadd.f32 1.0, %v3931_v56  ;;  %v3179_v56 = vmul.f32 -1.442695, %v1687_v55 }
 0x585   :  { %v3935_v32 = vpop.eup %3934  ;;  %3950 = vrcp.f32 %v1799_v23  ;;  %v1803_v6 = vadd.f32 1.0, %v3933_v63 }
 0x586   :  { %3952 = vrcp.f32 %v1798_v10  ;;  %v3937_v1 = vpop.eup %3936  ;;  %v1802_v47 = vadd.f32 1.0, %v3935_v32  ;;  %v5615_v58 = vpop.permute.xlu1 %1949 }
 0x587   :  { %3954 = vrcp.f32 %v1801_v51  ;;  %v3939_v4 = vpop.eup %3938  ;;  %v1805_v62 = vadd.f32 1.0, %v3937_v1  ;;  %v3180_v51 = vmul.f32 -1.442695, %v1688_v22  ;;  %v1693_v22 = vadd.f32 %v5578_v12, %v5548_v35 }
 0x588   :  { %3956 = vrcp.f32 %v1800_v45  ;;  %v3941_v49 = vpop.eup %3940  ;;  %v1804_v40 = vadd.f32 1.0, %v3939_v4 }
 0x589   :  { %3958 = vpow2.f32 %v3175_v5  ;;  %v3943_v54 = vpop.eup %3942  ;;  %v1807_v63 = vadd.f32 1.0, %v3941_v49 }
 0x58a   :  { %3960 = vpow2.f32 %v3176_v3  ;;  %v3945_v23 = vpop.eup %3944  ;;  %v1806_v10 = vadd.f32 1.0, %v3943_v54  ;;  %v5623_v32 = vpop.permute.xlu1 %1960  ;;  %v3181_v3 = vmul.f32 -1.442695, %v1689_v26 }
 0x58b   :  { %3962 = vrcp.f32 %v1803_v6  ;;  %v3947_v45 = vpop.eup %3946  ;;  %v3182_v6 = vmul.f32 -1.442695, %v1690_v38  ;;  %v1808_v55 = vadd.f32 1.0, %v3945_v23  ;;  %v5638_v26 = vpop.permute.xlu0 %1967  ;;  %v1695_v38 = vadd.f32 %v5578_v12, %v5552_v28 }
 0x58c   :  { %3964 = vrcp.f32 %v1802_v47  ;;  %v3949_v5 = vpop.eup %3948  ;;  %v1809_v47 = vadd.f32 1.0, %v3947_v45 }
 0x58d   :  { %3966 = vpow2.f32 %v3177_v2  ;;  %v3187_v28 = vmul.f32 -1.442695, %v1695_v38  ;;  %v1701_v38 = vadd.f32 %v5578_v12, %v5564_v17 }
 0x58e   :  { %3968 = vpow2.f32 %v3178_v46 }
 0x58f   :  { %3970 = vrcp.f32 %v1805_v62  ;;  %v3183_v62 = vmul.f32 -1.442695, %v1691_v36 }
 0x590   :  { %3972 = vrcp.f32 %v1804_v40  ;;  %v5635_v40 = vpop.permute.xlu1 %1971 }
 0x591   :  { %3974 = vpow2.f32 %v3179_v56  ;;  %v1810_v56 = vadd.f32 1.0, %v3949_v5 }
 0x592   :  { %v3951_v27 = vpop.eup %3950  ;;  %3976 = vpow2.f32 %v3180_v51  ;;  %v3185_v51 = vmul.f32 -1.442695, %v1693_v22 }
 0x593   :  { %v3953_v1 = vpop.eup %3952  ;;  %3978 = vrcp.f32 %v1807_v63  ;;  %v2105_v4 = vmul.f32 %v3951_v27, %v5572_v13 }
 0x594   :  { %v3955_v2 = vpop.eup %3954  ;;  %3980 = vrcp.f32 %v1806_v10  ;;  %v2104_v46 = vmul.f32 %v3953_v1, %v5568_v48  ;;  %v5647_v27 = vpop.permute.xlu1 %1982 }
 0x595   :  { %v3957_v43 = vpop.eup %3956  ;;  %2143 = vperm.xlu1 %3923, %v2105_v4   ;;  %3982 = vpow2.f32 %v3181_v3  ;;  %v2107_v13 = vmul.f32 %v3955_v2, %v5582_v7  ;;  %v1694_v7 = vadd.f32 %v5578_v12, %v5562_v20  ;;  %v5651_v1 = vpop.permute.xlu0 %1978 }
 0x596   :  { %v3959_v49 = vpop.eup %3958  ;;  %3984 = vpow2.f32 %v3182_v6  ;;  %2138 = vperm.xlu0 %3922, %v2104_v46   ;;  %v2106_v35 = vmul.f32 %v3957_v43, %v5576_v11  ;;  %v1697_v6 = vadd.f32 %v5578_v12, %v5556_v15  ;;  %v1699_v43 = vadd.f32 %v5578_v12, %v5560_v19 }
 0x597   :  { %v3961_v54 = vpop.eup %3960  ;;  %3986 = vrcp.f32 %v1809_v47  ;;  %v1811_v63 = vadd.f32 1.0, %v3959_v49  ;;  %v3186_v4 = vmul.f32 -1.442695, %v1694_v7  ;;  %v1700_v7 = vadd.f32 %v5578_v12, %v5574_v14 }
 0x598   :  { %v3963_v48 = vpop.eup %3962  ;;  %3988 = vrcp.f32 %v1808_v55  ;;  %v1812_v11 = vadd.f32 1.0, %v3961_v54  ;;  %v3189_v22 = vmul.f32 -1.442695, %v1697_v6  ;;  %v5659_v54 = vpop.permute.xlu1 %1993 }
 0x599   :  { %v3965_v23 = vpop.eup %3964  ;;  %2153 = vperm.xlu1 %3923, %v2107_v13   ;;  %3990 = vpow2.f32 %v3183_v62  ;;  %v2109_v5 = vmul.f32 %v3963_v48, %v5594_v8  ;;  %v1696_v8 = vadd.f32 %v5578_v12, %v5566_v18 }
 0x59a   :  { %v3967_v45 = vpop.eup %3966  ;;  %3992 = vpow2.f32 %v3184_v16  ;;  %2148 = vperm.xlu0 %3922, %v2106_v35   ;;  %v2108_v36 = vmul.f32 %v3965_v23, %v5588_v37 }
 0x59b   :  { %v3969_v10 = vpop.eup %3968  ;;  %3994 = vrcp.f32 %v1810_v56  ;;  %v1813_v20 = vadd.f32 1.0, %v3967_v45  ;;  %v3188_v18 = vmul.f32 -1.442695, %v1696_v8 }
 0x59c   :  { %v3971_v3 = vpop.eup %3970  ;;  %3996 = vpow2.f32 %v3185_v51  ;;  %v1814_v2 = vadd.f32 1.0, %v3969_v10  ;;  %v3191_v51 = vmul.f32 -1.442695, %v1699_v43  ;;  %v2005_v17 = vpop.permute.xlu1 %2004 }
 0x59d   :  { %v3973_v33 = vpop.eup %3972  ;;  %3998 = vrcp.f32 %v1811_v63  ;;  %2163 = vperm.xlu1 %3923, %v2109_v5   ;;  %v2111_v55 = vmul.f32 %v3971_v3, %v5605_v9  ;;  %v1698_v9 = vadd.f32 %v5578_v12, %v5570_v34  ;;  %v3193_v3 = vmul.f32 -1.442695, %v1701_v38 }
 0x59e   :  { %v3975_v47 = vpop.eup %3974  ;;  %2158 = vperm.xlu0 %3922, %v2108_v36   ;;  %4000 = vrcp.f32 %v1812_v11  ;;  %v2110_v15 = vmul.f32 %v3973_v33, %v5599_v24  ;;  %v5663_v24 = vpop.permute.xlu0 %1989  ;;  %v3192_v12 = vmul.f32 -1.442695, %v1700_v7 }
 0x59f   :  { %v3977_v37 = vpop.eup %3976  ;;  %4002 = vpow2.f32 %v3187_v28  ;;  %v1815_v49 = vadd.f32 1.0, %v3975_v47  ;;  %v3190_v45 = vmul.f32 -1.442695, %v1698_v9 }
 0x5a0   :  { %v3979_v46 = vpop.eup %3978  ;;  %4004 = vrcp.f32 %v1813_v20  ;;  %v1816_v56 = vadd.f32 1.0, %v3977_v37  ;;  %v2016_v37 = vpop.permute.xlu1 %2015 }
 0x5a1   :  { %v3981_v62 = vpop.eup %3980  ;;  %2173 = vperm.xlu1 %3923, %v2111_v55   ;;  %4006 = vpow2.f32 %v3186_v4  ;;  %v2113_v19 = vmul.f32 %v3979_v46, %v5615_v58 }
 0x5a2   :  { %v3983_v16 = vpop.eup %3982  ;;  %2168 = vperm.xlu0 %3922, %v2110_v15   ;;  %4008 = vrcp.f32 %v1814_v2  ;;  %v2112_v35 = vmul.f32 %v3981_v62, %v5617_v44  ;;  %v2001_v28 = vpop.permute.xlu0 %2000 }
 0x5a3   :  { %v3985_v13 = vpop.eup %3984  ;;  %4010 = vpow2.f32 %v3189_v22  ;;  %v1817_v63 = vadd.f32 1.0, %v3983_v16 }
 0x5a4   :  { %v3987_v48 = vpop.eup %3986  ;;  %4012 = vrcp.f32 %v1815_v49  ;;  %v1818_v10 = vadd.f32 1.0, %v3985_v13  ;;  %v2027_v13 = vpop.permute.xlu1 %2026 }
 0x5a5   :  { %v3989_v23 = vpop.eup %3988  ;;  %2183 = vperm.xlu1 %3923, %v2113_v19   ;;  %4014 = vpow2.f32 %v3188_v18  ;;  %v2115_v44 = vmul.f32 %v3987_v48, %v5623_v32 }
 0x5a6   :  { %v3991_v34 = vpop.eup %3990  ;;  %2178 = vperm.xlu0 %3922, %v2112_v35   ;;  %4016 = vrcp.f32 %v1816_v56  ;;  %v2114_v11 = vmul.f32 %v3989_v23, %v5625_v42  ;;  %v2012_v55 = vpop.permute.xlu0 %2011 }
 0x5a7   :  { %v3993_v58 = vpop.eup %3992  ;;  %4018 = vpow2.f32 %v3191_v51  ;;  %v1819_v6 = vadd.f32 1.0, %v3991_v34 }
 0x5a8   :  { %v3995_v5 = vpop.eup %3994  ;;  %4020 = vrcp.f32 %v1817_v63  ;;  %v1820_v47 = vadd.f32 1.0, %v3993_v58 }
 0x5a9   :  { %v3997_v36 = vpop.eup %3996  ;;  %2193 = vperm.xlu1 %3923, %v2115_v44   ;;  %4022 = vpow2.f32 %v3190_v45  ;;  %v2116_v32 = vmul.f32 %v3995_v5, %v5638_v26  ;;  %v2038_v45 = vpop.permute.xlu1 %2037 }
 0x5aa   :  { %v3999_v33 = vpop.eup %3998  ;;  %2188 = vperm.xlu0 %3922, %v2114_v11   ;;  %4024 = vrcp.f32 %v1818_v10  ;;  %v1821_v4 = vadd.f32 1.0, %v3997_v36 }
 0x5ab   :  { %v2117_v14 = vmul.f32 %v3999_v33, %v5635_v40  ;;  %v4001_v20 = vpop.eup %4000  ;;  %4026 = vpow2.f32 %v3193_v3 }
 0x5ac   :  { %v4003_v42 = vpop.eup %4002  ;;  %4028 = vrcp.f32 %v1819_v6  ;;  %v2118_v40 = vmul.f32 %v4001_v20, %v5651_v1 }
 0x5ad   :  { %2203 = vperm.xlu1 %3923, %v2117_v14   ;;  %v4005_v8 = vpop.eup %4004  ;;  %4030 = vpow2.f32 %v3192_v12  ;;  %v1823_v26 = vadd.f32 1.0, %v4003_v42  ;;  %v2049_v6 = vpop.permute.xlu1 %2048 }
 0x5ae   :  { %2198 = vperm.xlu0 %3922, %v2116_v32   ;;  %v4007_v2 = vpop.eup %4006  ;;  %v2119_v46 = vmul.f32 %v4005_v8, %v5647_v27  ;;  %4032 = vrcp.f32 %v1820_v47  ;;  %v2023_v27 = vpop.permute.xlu0 %2022 }
 0x5af   :  { %v4009_v15 = vpop.eup %4008  ;;  %4034 = vrcp.f32 %v1821_v4  ;;  %v1822_v62 = vadd.f32 1.0, %v4007_v2 }
 0x5b0   :  { %v4011_v22 = vpop.eup %4010  ;;  %v2120_v9 = vmul.f32 %v4009_v15, %v5663_v24  ;;  %4036 = vrcp.f32 %v1823_v26 }
 0x5b1   :  { %2213 = vperm.xlu1 %3923, %v2119_v46   ;;  %v4013_v43 = vpop.eup %4012  ;;  %v1825_v19 = vadd.f32 1.0, %v4011_v22  ;;  %4038 = vrcp.f32 %v1822_v62  ;;  %v2060_v42 = vpop.permute.xlu1 %2059 }
 0x5b2   :  { %2208 = vperm.xlu0 %3922, %v2118_v40   ;;  %v4015_v49 = vpop.eup %4014  ;;  %v2121_v16 = vmul.f32 %v4013_v43, %v5659_v54  ;;  %v2034_v58 = vpop.permute.xlu0 %2033 }
 0x5b3   :  { %v4017_v18 = vpop.eup %4016  ;;  %v1824_v48 = vadd.f32 1.0, %v4015_v49  ;;  %4040 = vrcp.f32 %v1825_v19 }
 0x5b4   :  { %v4019_v56 = vpop.eup %4018  ;;  %v2122_v23 = vmul.f32 %v4017_v18, %v2001_v28 }
 0x5b5   :  { %2223 = vperm.xlu1 %3923, %v2121_v16   ;;  %v4021_v1 = vpop.eup %4020  ;;  %v1827_v54 = vadd.f32 1.0, %v4019_v56  ;;  %4042 = vrcp.f32 %v1824_v48  ;;  %v2071_v22 = vpop.permute.xlu1 %2070  ;;  %v6256_v48 = vld [vmem:[#allocation77_spill] sm:$0xff] }
 0x5b6   :  { %2218 = vperm.xlu0 %3922, %v2120_v9   ;;  %v4023_v35 = vpop.eup %4022  ;;  %v2123_v51 = vmul.f32 %v4021_v1, %v2005_v17  ;;  %v2045_v33 = vpop.permute.xlu0 %2044  ;;  %v6254_v9 = vld [vmem:[#allocation70_spill] sm:$0xff] }
 0x5b7   :  { %v4025_v38 = vpop.eup %4024  ;;  %v1826_v24 = vadd.f32 1.0, %v4023_v35  ;;  %4044 = vrcp.f32 %v1827_v54 }
 0x5b8   :  { %v4027_v63 = vpop.eup %4026  ;;  %v2124_v44 = vmul.f32 %v4025_v38, %v2012_v55 }
 0x5b9   :  { %2233 = vperm.xlu1 %3923, %v2123_v51   ;;  %v4029_v34 = vpop.eup %4028  ;;  %v1829_v11 = vadd.f32 1.0, %v4027_v63  ;;  %4046 = vrcp.f32 %v1826_v24 }
 0x5ba   :  { %2228 = vperm.xlu0 %3922, %v2122_v23   ;;  %v4031_v7 = vpop.eup %4030  ;;  %v2125_v10 = vmul.f32 %v4029_v34, %v2016_v37  ;;  %v2056_v8 = vpop.permute.xlu0 %2055  ;;  %v6257_v23 = vld [vmem:[#allocation76_spill] sm:$0xff] }
 0x5bb   :  { %v4033_v5 = vpop.eup %4032  ;;  %v1828_v3 = vadd.f32 1.0, %v4031_v7  ;;  %4048 = vrcp.f32 %v1829_v11  ;;  %v6258_v7 = vld [vmem:[#allocation79_spill] sm:$0xff] }
 0x5bc   :  { %v4035_v17 = vpop.eup %4034  ;;  %v2126_v28 = vmul.f32 %v4033_v5, %v2023_v27  ;;  %v6259_v5 = vld [vmem:[#allocation78_spill] sm:$0xff] }
 0x5bd   :  { %2243 = vperm.xlu1 %3923, %v2125_v10   ;;  %v2127_v36 = vmul.f32 %v4035_v17, %v2027_v13  ;;  %v4037_v12 = vpop.eup %4036  ;;  %4050 = vrcp.f32 %v1828_v3  ;;  %v6255_v13 = vld [vmem:[#allocation74_spill] sm:$0xff] }
 0x5be   :  { %2238 = vperm.xlu0 %3922, %v2124_v44   ;;  %v4039_v14 = vpop.eup %4038  ;;  %v2129_v20 = vmul.f32 %v4037_v12, %v2038_v45  ;;  %v2067_v26 = vpop.permute.xlu0 %2066 }
 0x5bf   :  { %v2128_v32 = vmul.f32 %v4039_v14, %v2034_v58 }
 0x5c0   :  { %v4041_v47 = vpop.eup %4040 }
 0x5c1   :  { %2253 = vperm.xlu1 %3923, %v2127_v36   ;;  %v2131_v37 = vmul.f32 %v4041_v47, %v2049_v6 }
 0x5c2   :  { %2248 = vperm.xlu0 %3922, %v2126_v28   ;;  %v4043_v4 = vpop.eup %4042 }
 0x5c3   :  { %v2130_v2 = vmul.f32 %v4043_v4, %v2045_v33  ;;  %v6260_v33 = vld [vmem:[#allocation81_spill] sm:$0xff] }
 0x5c4   :  { %v4045_v55 = vpop.eup %4044 }
 0x5c5   :  { %2263 = vperm.xlu1 %3923, %v2129_v20   ;;  %v2133_v15 = vmul.f32 %v4045_v55, %v2060_v42  ;;  %v6261_v42 = vld [vmem:[#allocation80_spill] sm:$0xff] }
 0x5c6   :  { %2258 = vperm.xlu0 %3922, %v2128_v32   ;;  %v4047_v46 = vpop.eup %4046 }
 0x5c7   :  { %v2132_v40 = vmul.f32 %v4047_v46, %v2056_v8 }
 0x5c8   :  { %v4049_v43 = vpop.eup %4048 }
 0x5c9   :  { %2273 = vperm.xlu1 %3923, %v2131_v37   ;;  %v2135_v49 = vmul.f32 %v4049_v43, %v2071_v22  ;;  %v6263_v43 = vld [vmem:[#allocation82_spill] sm:$0xff] }
 0x5ca   :  { %2268 = vperm.xlu0 %3922, %v2130_v2   ;;  %v4051_v62 = vpop.eup %4050 }
 0x5cb   :  { %v2134_v16 = vmul.f32 %v4051_v62, %v2067_v26 }
 0x5cd   :  { %2283 = vperm.xlu1 %3923, %v2133_v15   ;;  %v6262_v15 = vld [vmem:[#allocation83_spill] sm:$0xff] }
 0x5ce   :  { %2278 = vperm.xlu0 %3922, %v2132_v40  }
 0x5d1   :  { %2293 = vperm.xlu1 %3923, %v2135_v49  }
 0x5d2   :  { %2288 = vperm.xlu0 %3922, %v2134_v16  }
 0x5d5   :  { %2449 = vbcast.lane.b32.xlu1 %v5455_v59, 264 }
 0x5d6   :  { %2445 = vbcast.lane.b32.xlu0 %v5455_v59, 256 }
 0x5d9   :  { %2460 = vbcast.lane.b32.xlu1 %v5460_v50, 264 }
 0x5da   :  { %2456 = vbcast.lane.b32.xlu0 %v5460_v50, 256 }
 0x5dd   :  { %2537 = vbcast.lane.b32.xlu1 %v5489_v57, 264 }
 0x5de   :  { %2533 = vbcast.lane.b32.xlu0 %v5489_v57, 256 }
 0x5e1   :  { %2548 = vbcast.lane.b32.xlu1 %v5494_v31, 264 }
 0x5e2   :  { %2544 = vbcast.lane.b32.xlu0 %v5494_v31, 256  ;;  %v6251_v31 = vld [vmem:[#allocation72_spill] sm:$0xff] }
 0x5e5   :  { %2471 = vbcast.lane.b32.xlu1 %v5472_v25, 264 }
 0x5e6   :  { %2467 = vbcast.lane.b32.xlu0 %v5472_v25, 256 }
 0x5e9   :  { %2559 = vbcast.lane.b32.xlu1 %v5499_v52, 264 }
 0x5ea   :  { %2555 = vbcast.lane.b32.xlu0 %v5499_v52, 256 }
 0x5ed   :  { %2482 = vbcast.lane.b32.xlu1 %v5485_v21, 264 }
 0x5ee   :  { %2478 = vbcast.lane.b32.xlu0 %v5485_v21, 256  ;;  %v6250_v21 = vld [vmem:[#allocation73_spill] sm:$0xff] }
 0x5f1   :  { %2570 = vbcast.lane.b32.xlu1 %v5504_v61, 264 }
 0x5f2   :  { %2566 = vbcast.lane.b32.xlu0 %v5504_v61, 256  ;;  %v6252_v61 = vld [vmem:[#allocation75_spill] sm:$0xff] }
 0x5f5   :  { %2493 = vbcast.lane.b32.xlu1 %v5463_v60, 264 }
 0x5f6   :  { %2489 = vbcast.lane.b32.xlu0 %v5463_v60, 256  ;;  %v6249_v60 = vld [vmem:[#allocation20_spill] sm:$0xff] }
 0x5f9   :  { %2581 = vbcast.lane.b32.xlu1 %v5509_v53, 264 }
 0x5fa   :  { %2577 = vbcast.lane.b32.xlu0 %v5509_v53, 256 }
 0x5fd   :  { %2504 = vbcast.lane.b32.xlu1 %v5468_v41, 264 }
 0x5fe   :  { %2500 = vbcast.lane.b32.xlu0 %v5468_v41, 256 }
 0x601   :  { %2592 = vbcast.lane.b32.xlu1 %v5514_v0, 264 }
 0x602   :  { %2588 = vbcast.lane.b32.xlu0 %v5514_v0, 256 }
 0x605   :  { %2515 = vbcast.lane.b32.xlu1 %v5476_v30, 264 }
 0x606   :  { %2511 = vbcast.lane.b32.xlu0 %v5476_v30, 256 }
 0x609   :  { %2603 = vbcast.lane.b32.xlu1 %v5519_v39, 264 }
 0x60a   :  { %2599 = vbcast.lane.b32.xlu0 %v5519_v39, 256  ;;  %v6253_v39 = vld [vmem:[#allocation71_spill] sm:$0xff] }
 0x60d   :  { %2526 = vbcast.lane.b32.xlu1 %v5481_v29, 264 }
 0x60e   :  { %2522 = vbcast.lane.b32.xlu0 %v5481_v29, 256 }
 0x610   :  { %v2144_v59 = vpop.permute.xlu1 %2143 }
 0x611   :  { %v2139_v50 = vpop.permute.xlu0 %2138  ;;  %2614 = vbcast.lane.b32.xlu1 %v6249_v60, 264  ;;  %v2297_v18 = vmul.f32 %v2144_v59, %v6253_v39 }
 0x612   :  { %2610 = vbcast.lane.b32.xlu0 %v6249_v60, 256  ;;  %v2296_v29 = vmul.f32 %v2139_v50, %v6254_v9 }
 0x614   :  { %v2154_v41 = vpop.permute.xlu1 %2153  ;;  %v2328_v38 = vadd.f32 %v2297_v18, %v2296_v29  ;;  %v6265_v29 = vld [vmem:[#allocation84_spill] sm:$0xff] }
 0x615   :  { %v2149_v25 = vpop.permute.xlu0 %2148  ;;  %v2299_v57 = vmul.f32 %v2154_v41, %v6250_v21 }
 0x616   :  { %v2298_v30 = vmul.f32 %v2149_v25, %v6251_v31  ;;  %v2329_v44 = vrot.slane %v2328_v38, 4 }
 0x618   :  { %v2164_v52 = vpop.permute.xlu1 %2163  ;;  %v2335_v27 = vadd.f32 %v2299_v57, %v2298_v30  ;;  %v2330_v20 = vadd.f32 %v2329_v44, %v2328_v38  ;;  %v6264_v30 = vld [vmem:[#allocation85_spill] sm:$0xff] }
 0x619   :  { %v2301_v53 = vmul.f32 %v2164_v52, %v6252_v61  ;;  %v2159_v0 = vpop.permute.xlu0 %2158 }
 0x61a   :  { %v2300_v56 = vmul.f32 %v2159_v0, %v6255_v13  ;;  %v2336_v54 = vrot.slane %v2335_v27, 4  ;;  %v2331_v26 = vrot.slane %v2330_v20, 2 }
 0x61c   :  { %v2174_v19 = vpop.permute.xlu1 %2173  ;;  %v2342_v1 = vadd.f32 %v2301_v53, %v2300_v56  ;;  %v2337_v3 = vadd.f32 %v2336_v54, %v2335_v27  ;;  %v2332_v0 = vadd.f32 %v2331_v26, %v2330_v20  ;;  %v6266_v27 = vld [vmem:[#allocation52_spill] sm:$0xff] }
 0x61d   :  { %v2303_v35 = vmul.f32 %v2174_v19, %v6256_v48  ;;  %v2169_v51 = vpop.permute.xlu0 %2168  ;;  %v2857_v19 = vsel %vm2856_vm0, %v6266_v27, -inf  ;;  %v6272_v27 = vld [vmem:[#allocation87_spill] sm:$0xff] }
 0x61e   :  { %v2302_v63 = vmul.f32 %v2169_v51, %v6257_v23  ;;  %v2343_v45 = vrot.slane %v2342_v1, 4  ;;  %v2338_v8 = vrot.slane %v2337_v3, 2 }
 0x620   :  { %v2349_v34 = vadd.f32 %v2303_v35, %v2302_v63  ;;  %v2184_v24 = vpop.permute.xlu1 %2183  ;;  %v2344_v6 = vadd.f32 %v2343_v45, %v2342_v1  ;;  %v2339_v59 = vadd.f32 %v2338_v8, %v2337_v3 }
 0x621   :  { %v2305_v58 = vmul.f32 %v2184_v24, %v6258_v7  ;;  %v2179_v10 = vpop.permute.xlu0 %2178 }
 0x622   :  { %v2304_v11 = vmul.f32 %v2179_v10, %v6259_v5  ;;  %v2350_v17 = vrot.slane %v2349_v34, 4  ;;  %v2345_v55 = vrot.slane %v2344_v6, 2  ;;  %v2340_v51 = vrot.slane %v2339_v59, 1 }
 0x623   :  { %v2333_v10 = vrot.slane %v2332_v0, 1 }
 0x624   :  { %v2356_v36 = vadd.f32 %v2305_v58, %v2304_v11  ;;  %v2194_v28 = vpop.permute.xlu1 %2193  ;;  %v2351_v47 = vadd.f32 %v2350_v17, %v2349_v34  ;;  %v2346_v25 = vadd.f32 %v2345_v55, %v2344_v6  ;;  %v6267_v17 = vld [vmem:[#allocation53_spill] sm:$0xff] }
 0x625   :  { %v2307_v12 = vmul.f32 %v2194_v28, %v6260_v33  ;;  %v2189_v14 = vpop.permute.xlu0 %2188  ;;  %v2860_v3 = vsel %vm2856_vm0, %v6267_v17, -inf  ;;  %v2341_v28 = vadd.f32 %v2340_v51, %v2339_v59  ;;  %v2334_v8 = vadd.f32 %v2333_v10, %v2332_v0  ;;  %v6271_v0 = vld [vmem:[#allocation90_spill] sm:$0xff]  ;;  %v6275_v17 = vld [vmem:[#allocation92_spill] sm:$0xff] }
 0x626   :  { %v2357_v32 = vrot.slane %v2356_v36, 4  ;;  %v2306_v4 = vmul.f32 %v2189_v14, %v6261_v42  ;;  %v2352_v49 = vrot.slane %v2351_v47, 2  ;;  %v2347_v24 = vrot.slane %v2346_v25, 1 }
 0x628   :  { %v2358_v37 = vadd.f32 %v2357_v32, %v2356_v36  ;;  %v2204_v2 = vpop.permute.xlu1 %2203  ;;  %v2363_v46 = vadd.f32 %v2307_v12, %v2306_v4  ;;  %v2353_v1 = vadd.f32 %v2352_v49, %v2351_v47  ;;  %v2348_v32 = vadd.f32 %v2347_v24, %v2346_v25  ;;  %v6274_v24 = vld [vmem:[#allocation93_spill] sm:$0xff] }
 0x629   :  { %v2309_v40 = vmul.f32 %v2204_v2, %v6262_v15  ;;  %v2199_v22 = vpop.permute.xlu0 %2198 }
 0x62a   :  { %v2308_v62 = vmul.f32 %v2199_v22, %v6263_v43  ;;  %v2364_v16 = vrot.slane %v2363_v46, 4  ;;  %v2359_v50 = vrot.slane %v2358_v37, 2  ;;  %v2354_v36 = vrot.slane %v2353_v1, 1 }
 0x62c   :  { %v2370_v60 = vadd.f32 %v2309_v40, %v2308_v62  ;;  %v2214_v41 = vpop.permute.xlu1 %2213  ;;  %v2365_v57 = vadd.f32 %v2364_v16, %v2363_v46  ;;  %v2360_v38 = vadd.f32 %v2359_v50, %v2358_v37  ;;  %v2355_v55 = vadd.f32 %v2354_v36, %v2353_v1  ;;  %v6268_v16 = vld [vmem:[#allocation89_spill] sm:$0xff]  ;;  %v6269_v50 = vld [vmem:[#allocation88_spill] sm:$0xff]  ;;  %v6273_v1 = vld [vmem:[#allocation86_spill] sm:$0xff] }
 0x62d   :  { %v2311_v52 = vmul.f32 %v2214_v41, %v6264_v30  ;;  %v2209_v53 = vpop.permute.xlu0 %2208  ;;  %v2926_v46 = vsel %vm2885_vm1, %v2341_v28, %v2334_v8 }
 0x62e   :  { %v2371_v18 = vrot.slane %v2370_v60, 4  ;;  %v2310_v56 = vmul.f32 %v2209_v53, %v6265_v29  ;;  %v2366_v35 = vrot.slane %v2365_v57, 2  ;;  %v2361_v6 = vrot.slane %v2360_v38, 1 }
 0x62f   :  { %v2927_v62 = vsel %vm2887_vm2, %v2348_v32, %v2926_v46 }
 0x630   :  { %v2372_v63 = vadd.f32 %v2371_v18, %v2370_v60  ;;  %v2377_v54 = vadd.f32 %v2311_v52, %v2310_v56  ;;  %v2224_v34 = vpop.permute.xlu1 %2223  ;;  %v2367_v45 = vadd.f32 %v2366_v35, %v2365_v57  ;;  %v2362_v40 = vadd.f32 %v2361_v6, %v2360_v38  ;;  %v6270_v52 = vld [vmem:[#allocation91_spill] sm:$0xff] }
 0x631   :  { %2858 = vmax.xlane.f32.xlu0 %v2857_v19  ;;  %v2219_v58 = vpop.permute.xlu0 %2218  ;;  %v2928_v56 = vsel %vm2889_vm3, %v2355_v55, %v2927_v62  ;;  %v2313_v19 = vmul.f32 %v2224_v34, %v6272_v27 }
 0x632   :  { %v2373_v44 = vrot.slane %v2372_v63, 2  ;;  %v2378_v11 = vrot.slane %v2377_v54, 4  ;;  %v2368_v47 = vrot.slane %v2367_v45, 1  ;;  %v2312_v35 = vmul.f32 %v2219_v58, %v6273_v1 }
 0x634   :  { %v2374_v12 = vadd.f32 %v2373_v44, %v2372_v63  ;;  %v2379_v14 = vadd.f32 %v2378_v11, %v2377_v54  ;;  %v2234_v20 = vpop.permute.xlu1 %2233  ;;  %v2369_v49 = vadd.f32 %v2368_v47, %v2367_v45  ;;  %v2929_v63 = vsel %vm2891_vm4, %v2362_v40, %v2928_v56 }
 0x635   :  { %v2229_v4 = vpop.permute.xlu0 %2228  ;;  %2861 = vmax.xlane.f32.xlu1 %v2860_v3  ;;  %v2315_v59 = vmul.f32 %v2234_v20, %v6268_v16  ;;  %v2384_v34 = vadd.f32 %v2313_v19, %v2312_v35  ;;  %v6280_v35 = vld [vmem:[#allocation99_spill] sm:$0xff] }
 0x636   :  { %v2375_v37 = vrot.slane %v2374_v12, 1  ;;  %v2380_v2 = vrot.slane %v2379_v14, 2  ;;  %v2314_v60 = vmul.f32 %v2229_v4, %v6269_v50  ;;  %v2930_v44 = vsel %vm2893_vm5, %v2369_v49, %v2929_v63  ;;  %v6277_v4 = vld [vmem:[#allocation94_spill] sm:$0xff] }
 0x638   :  { %v2381_v22 = vadd.f32 %v2380_v2, %v2379_v14  ;;  %v2244_v26 = vpop.permute.xlu1 %2243  ;;  %v2376_v25 = vadd.f32 %v2375_v37, %v2374_v12  ;;  %v2391_v54 = vadd.f32 %v2315_v59, %v2314_v60  ;;  %v6276_v14 = vld [vmem:[#allocation95_spill] sm:$0xff]  ;;  %v2385_v37 = vrot.slane %v2384_v34, 4 }
 0x639   :  { %v2239_v41 = vpop.permute.xlu0 %2238  ;;  %v2317_v53 = vmul.f32 %v2244_v26, %v6270_v52 }
 0x63a   :  { %v2382_v57 = vrot.slane %v2381_v22, 1  ;;  %v2316_v18 = vmul.f32 %v2239_v41, %v6271_v0  ;;  %v2931_v36 = vsel %vm6016_vm6, %v2376_v25, %v2930_v44  ;;  %v2392_v12 = vrot.slane %v2391_v54, 4  ;;  %v6279_v25 = vld [vmem:[#allocation96_spill] sm:$0xff] }
 0x63b   :  { %v2386_v60 = vadd.f32 %v2385_v37, %v2384_v34 }
 0x63c   :  { %v2383_v51 = vadd.f32 %v2382_v57, %v2381_v22  ;;  %v2254_v38 = vpop.permute.xlu1 %2253  ;;  %v2398_v11 = vadd.f32 %v2317_v53, %v2316_v18  ;;  %v2393_v40 = vadd.f32 %v2392_v12, %v2391_v54  ;;  %v6278_v22 = vld [vmem:[#allocation97_spill] sm:$0xff] }
 0x63d   :  { %v2319_v45 = vmul.f32 %v2254_v38, %v6274_v24  ;;  %v2249_v10 = vpop.permute.xlu0 %2248  ;;  %v2387_v54 = vrot.slane %v2386_v60, 2 }
 0x63e   :  { %v2318_v3 = vmul.f32 %v2249_v10, %v6275_v17  ;;  %v2932_v58 = vsel %vm6015_vm7, %v2383_v51, %v2931_v36  ;;  %v2399_v47 = vrot.slane %v2398_v11, 4  ;;  %v2394_v56 = vrot.slane %v2393_v40, 2 }
 0x63f   :  { %2942 = vst [vmem:[#allocation14] sm:$0xff] %v2932_v58 }
 0x640   :  { %v2405_v28 = vadd.f32 %v2319_v45, %v2318_v3  ;;  %v2264_v6 = vpop.permute.xlu1 %2263  ;;  %v2400_v49 = vadd.f32 %v2399_v47, %v2398_v11  ;;  %v6281_v45 = vld [vmem:[#allocation98_spill] sm:$0xff]  ;;  %v2395_v34 = vadd.f32 %v2394_v56, %v2393_v40 }
 0x641   :  { %v2321_v20 = vmul.f32 %v2264_v6, %v6276_v14  ;;  %v2259_v32 = vpop.permute.xlu0 %2258  ;;  %v6282_v6 = vld [vmem:[#allocation101_spill] sm:$0xff] }
 0x642   :  { %v2320_v8 = vmul.f32 %v2259_v32, %v6277_v4  ;;  %v2406_v2 = vrot.slane %v2405_v28, 4  ;;  %v2401_v63 = vrot.slane %v2400_v49, 2 }
 0x644   :  { %v2412_v55 = vadd.f32 %v2321_v20, %v2320_v8  ;;  %v2274_v46 = vpop.permute.xlu1 %2273  ;;  %v2407_v41 = vadd.f32 %v2406_v2, %v2405_v28  ;;  %v2402_v32 = vadd.f32 %v2401_v63, %v2400_v49  ;;  %v6283_v8 = vld [vmem:[#allocation100_spill] sm:$0xff]  ;;  %v2388_v2 = vadd.f32 %v2387_v54, %v2386_v60 }
 0x645   :  { %v2323_v26 = vmul.f32 %v2274_v46, %v6278_v22  ;;  %v2269_v62 = vpop.permute.xlu0 %2268 }
 0x646   :  { %v2413_v59 = vrot.slane %v2412_v55, 4  ;;  %v2322_v57 = vmul.f32 %v2269_v62, %v6279_v25  ;;  %v2408_v44 = vrot.slane %v2407_v41, 2 }
 0x648   :  { %v2414_v53 = vadd.f32 %v2413_v59, %v2412_v55  ;;  %v2284_v18 = vpop.permute.xlu1 %2283  ;;  %v2419_v19 = vadd.f32 %v2323_v26, %v2322_v57  ;;  %v2409_v55 = vadd.f32 %v2408_v44, %v2407_v41 }
 0x649   :  { %v2325_v51 = vmul.f32 %v2284_v18, %v6280_v35  ;;  %v2279_v38 = vpop.permute.xlu0 %2278  ;;  %v2396_v18 = vrot.slane %v2395_v34, 1 }
 0x64a   :  { %v2324_v10 = vmul.f32 %v2279_v38, %v6281_v45  ;;  %v2420_v3 = vrot.slane %v2419_v19, 4  ;;  %v2415_v36 = vrot.slane %v2414_v53, 2 }
 0x64c   :  { %v2426_v11 = vadd.f32 %v2325_v51, %v2324_v10  ;;  %v2294_v58 = vpop.permute.xlu1 %2293  ;;  %v2421_v28 = vadd.f32 %v2420_v3, %v2419_v19  ;;  %v2416_v26 = vadd.f32 %v2415_v36, %v2414_v53  ;;  %v2403_v10 = vrot.slane %v2402_v32, 1 }
 0x64d   :  { %v2327_v12 = vmul.f32 %v2294_v58, %v6282_v6  ;;  %v2289_v20 = vpop.permute.xlu0 %2288  ;;  %v2389_v19 = vrot.slane %v2388_v2, 1  ;;  %v2410_v3 = vrot.slane %v2409_v55, 1 }
 0x64e   :  { %v2427_v47 = vrot.slane %v2426_v11, 4  ;;  %v2326_v37 = vmul.f32 %v2289_v20, %v6283_v8  ;;  %v2422_v46 = vrot.slane %v2421_v28, 2  ;;  %v2417_v58 = vrot.slane %v2416_v26, 1 }
 0x64f   :  { %v2397_v20 = vadd.f32 %v2396_v18, %v2395_v34  ;;  %v2404_v54 = vadd.f32 %v2403_v10, %v2402_v32  ;;  %v2390_v36 = vadd.f32 %v2389_v19, %v2388_v2 }
 0x650   :  { %v2428_v62 = vadd.f32 %v2427_v47, %v2426_v11  ;;  %v2433_v59 = vadd.f32 %v2327_v12, %v2326_v37  ;;  %v2450_v57 = vpop.permute.xlu1 %2449  ;;  %v2423_v38 = vadd.f32 %v2422_v46, %v2421_v28  ;;  %v2411_v11 = vadd.f32 %v2410_v3, %v2409_v55 }
 0x651   :  { %v2446_v51 = vpop.permute.xlu0 %2445  ;;  %v2418_v12 = vadd.f32 %v2417_v58, %v2416_v26  ;;  %v2933_v37 = vsel %vm2885_vm1, %v2397_v20, %v2390_v36  ;;  %vm2617_vm8 = vcmp.gt.f32.partialorder %v2450_v57, 0.0 }
 0x652   :  { %v2429_v40 = vrot.slane %v2428_v62, 2  ;;  %v2434_v56 = vrot.slane %v2433_v59, 4  ;;  %v2424_v60 = vrot.slane %v2423_v38, 1  ;;  %v2934_v45 = vsel %vm2887_vm2, %v2404_v54, %v2933_v37 }
 0x653   :  { %v2935_v34 = vsel %vm2889_vm3, %v2411_v11, %v2934_v45  ;;  %vm2616_vm9 = vcmp.gt.f32.partialorder %v2446_v51, 0.0 }
 0x654   :  { %v2430_v49 = vadd.f32 %v2429_v40, %v2428_v62  ;;  %v2435_v63 = vadd.f32 %v2434_v56, %v2433_v59  ;;  %v2461_v6 = vpop.permute.xlu1 %2460  ;;  %v2425_v46 = vadd.f32 %v2424_v60, %v2423_v38  ;;  %v2936_v32 = vsel %vm2891_vm4, %v2418_v12, %v2935_v34 }
 0x655   :  { %v2457_v41 = vpop.permute.xlu0 %2456  ;;  %vm2619_vm10 = vcmp.gt.f32.partialorder %v2461_v6, 0.0  ;;  %v2712_v37 = vsel %vm2616_vm9, %v6254_v9, -3.4028235e+38 }
 0x656   :  { %v2431_v53 = vrot.slane %v2430_v49, 1  ;;  %v2436_v44 = vrot.slane %v2435_v63, 2  ;;  %v2937_v2 = vsel %vm2893_vm5, %v2425_v46, %v2936_v32  ;;  %vm2618_vm11 = vcmp.gt.f32.partialorder %v2457_v41, 0.0 }
 0x657   :  { %v2714_v34 = vsel %vm2618_vm11, %v6251_v31, -3.4028235e+38 }
 0x658   :  { %v2437_v28 = vadd.f32 %v2436_v44, %v2435_v63  ;;  %v2538_v47 = vpop.permute.xlu1 %2537  ;;  %v2432_v62 = vadd.f32 %v2431_v53, %v2430_v49 }
 0x659   :  { %v2534_v8 = vpop.permute.xlu0 %2533  ;;  %vm2633_vm14 = vcmp.gt.f32.partialorder %v2538_v47, 0.0 }
 0x65a   :  { %v2438_v59 = vrot.slane %v2437_v28, 1  ;;  %v2938_v55 = vsel %vm6016_vm6, %v2432_v62, %v2937_v2  ;;  %vm2632_vm15 = vcmp.gt.f32.partialorder %v2534_v8, 0.0  ;;  %v2729_v31 = vsel %vm2633_vm14, %v6272_v27, -3.4028235e+38 }
 0x65b   :  { %v2728_v41 = vsel %vm2632_vm15, %v6273_v1, -3.4028235e+38 }
 0x65c   :  { %v2439_v18 = vadd.f32 %v2438_v59, %v2437_v28  ;;  %v2549_v40 = vpop.permute.xlu1 %2548  ;;  %v2713_v28 = vsel %vm2617_vm8, %v6253_v39, -3.4028235e+38  ;;  %v2715_v59 = vsel %vm2619_vm10, %v6250_v21, -3.4028235e+38 }
 0x65d   :  { %v2545_v10 = vpop.permute.xlu0 %2544  ;;  %v2751_v32 = vmax.f32 %v2714_v34, %v2715_v59  ;;  %vm2635_vm0 = vcmp.gt.f32.partialorder %v2549_v40, 0.0 }
 0x65e   :  { %v2939_v26 = vsel %vm6015_vm7, %v2439_v18, %v2938_v55  ;;  %v2744_v18 = vmax.f32 %v2712_v37, %v2713_v28  ;;  %vm2634_vm8 = vcmp.gt.f32.partialorder %v2545_v10, 0.0  ;;  %v2731_v8 = vsel %vm2635_vm0, %v6268_v16, -3.4028235e+38 }
 0x65f   :  { %2943 = vst [vmem:[#allocation14 + $0x10] sm:$0xff] %v2939_v26  ;;  %v2752_v21 = vrot.slane %v2751_v32, 4  ;;  %v2730_v47 = vsel %vm2634_vm8, %v6269_v50, -3.4028235e+38  ;;  %v5803_v55 = vmax.f32 %v2728_v41, %v2729_v31 }
 0x660   :  { %v2472_v56 = vpop.permute.xlu1 %2471  ;;  %v2745_v9 = vrot.slane %v2744_v18, 4  ;;  %v5805_v1 = vmax.f32 %v2730_v47, %v2731_v8 }
 0x661   :  { %v2468_v38 = vpop.permute.xlu0 %2467  ;;  %vm2621_vm12 = vcmp.gt.f32.partialorder %v2472_v56, 0.0  ;;  %v5801_v2 = vmax.f32 %v2751_v32, %v2752_v21 }
 0x662   :  { %vm2620_vm13 = vcmp.gt.f32.partialorder %v2468_v38, 0.0  ;;  %v2717_v57 = vsel %vm2621_vm12, %v6252_v61, -3.4028235e+38  ;;  %v5797_v10 = vmax.f32 %v2744_v18, %v2745_v9 }
 0x663   :  { %v2716_v51 = vsel %vm2620_vm13, %v6255_v13, -3.4028235e+38 }
 0x664   :  { %v2560_v19 = vpop.permute.xlu1 %2559  ;;  %v5795_v40 = vmax.f32 %v2716_v51, %v2717_v57  ;;  %v2747_v57 = vrot.slane %v5797_v10, 2  ;;  %v2754_v51 = vrot.slane %v5801_v2, 2 }
 0x665   :  { %v2556_v3 = vpop.permute.xlu0 %2555  ;;  %vm2637_vm9 = vcmp.gt.f32.partialorder %v2560_v19, 0.0 }
 0x666   :  { %vm2636_vm10 = vcmp.gt.f32.partialorder %v2556_v3, 0.0  ;;  %v2733_v61 = vsel %vm2637_vm9, %v6270_v52, -3.4028235e+38  ;;  %v2759_v52 = vrot.slane %v5795_v40, 4 }
 0x667   :  { %v2732_v13 = vsel %vm2636_vm10, %v6271_v0, -3.4028235e+38 }
 0x668   :  { %v2483_v58 = vpop.permute.xlu1 %2482  ;;  %v5811_v56 = vmax.f32 %v2732_v13, %v2733_v61 }
 0x669   :  { %v2479_v49 = vpop.permute.xlu0 %2478  ;;  %vm2623_vm11 = vcmp.gt.f32.partialorder %v2483_v58, 0.0 }
 0x66a   :  { %vm2622_vm7 = vcmp.gt.f32.partialorder %v2479_v49, 0.0  ;;  %v2719_v50 = vsel %vm2623_vm11, %v6256_v48, -3.4028235e+38  ;;  %v2815_v34 = vrot.slane %v5811_v56, 4 }
 0x66b   :  { %v2718_v26 = vsel %vm2622_vm7, %v6257_v23, -3.4028235e+38 }
 0x66c   :  { %v5761_v63 = vpop.permute.xlu1 %2570  ;;  %v2765_v48 = vmax.f32 %v2718_v26, %v2719_v50  ;;  %v2816_v13 = vmax.f32 %v5811_v56, %v2815_v34 }
 0x66d   :  { %v5763_v45 = vpop.permute.xlu0 %2566  ;;  %vm2639_vm14 = vcmp.gt.f32.partialorder %v5761_v63, 0.0 }
 0x66e   :  { %vm2638_vm15 = vcmp.gt.f32.partialorder %v5763_v45, 0.0  ;;  %v2735_v23 = vsel %vm2639_vm14, %v6274_v24, -3.4028235e+38 }
 0x66f   :  { %v2734_v19 = vsel %vm2638_vm15, %v6275_v17, -3.4028235e+38 }
 0x670   :  { %v2494_v20 = vpop.permute.xlu1 %2493 }
 0x671   :  { %v2490_v60 = vpop.permute.xlu0 %2489  ;;  %vm2625_vm12 = vcmp.gt.f32.partialorder %v2494_v20, 0.0  ;;  %v2766_v20 = vrot.slane %v2765_v48, 4 }
 0x672   :  { %vm2624_vm13 = vcmp.gt.f32.partialorder %v2490_v60, 0.0  ;;  %v2721_v0 = vsel %vm2625_vm12, %v6258_v7, -3.4028235e+38 }
 0x673   :  { %v2720_v38 = vsel %vm2624_vm13, %v6259_v5, -3.4028235e+38  ;;  %v2767_v32 = vmax.f32 %v2765_v48, %v2766_v20  ;;  %v2755_v48 = vmax.f32 %v5801_v2, %v2754_v51 }
 0x674   :  { %v5765_v54 = vpop.permute.xlu1 %2581  ;;  %v2772_v7 = vmax.f32 %v2720_v38, %v2721_v0  ;;  %v2748_v38 = vmax.f32 %v5797_v10, %v2747_v57 }
 0x675   :  { %v5767_v53 = vpop.permute.xlu0 %2577  ;;  %vm2641_vm0 = vcmp.gt.f32.partialorder %v5765_v54, 0.0  ;;  %v2768_v50 = vrot.slane %v2767_v32, 2 }
 0x676   :  { %v2737_v3 = vsel %vm2641_vm0, %v6276_v14, -3.4028235e+38  ;;  %vm2640_vm12 = vcmp.gt.f32.partialorder %v5767_v53, 0.0 }
 0x678   :  { %v5769_v44 = vpop.permute.xlu1 %2504 }
 0x679   :  { %v5771_v36 = vpop.permute.xlu0 %2500  ;;  %vm2627_vm8 = vcmp.gt.f32.partialorder %v5769_v44, 0.0  ;;  %v6284_v44 = vld [vmem:[#allocation98_spill] sm:$0xff] }
 0x67a   :  { %vm2626_vm9 = vcmp.gt.f32.partialorder %v5771_v36, 0.0  ;;  %v2723_v5 = vsel %vm2627_vm8, %v6260_v33, -3.4028235e+38 }
 0x67b   :  { %v2722_v58 = vsel %vm2626_vm9, %v6261_v42, -3.4028235e+38  ;;  %v2736_v42 = vsel %vm2640_vm12, %v6277_v4, -3.4028235e+38  ;;  %v6286_v4 = vld [vmem:[#allocation100_spill] sm:$0xff] }
 0x67c   :  { %v5773_v11 = vpop.permute.xlu1 %2592  ;;  %v2779_v45 = vmax.f32 %v2722_v58, %v2723_v5  ;;  %v2817_v58 = vrot.slane %v2816_v13, 2 }
 0x67d   :  { %v5775_v12 = vpop.permute.xlu0 %2588  ;;  %vm2643_vm13 = vcmp.gt.f32.partialorder %v5773_v11, 0.0 }
 0x67e   :  { %vm2642_vm14 = vcmp.gt.f32.partialorder %v5775_v12, 0.0  ;;  %v2739_v60 = vsel %vm2643_vm13, %v6278_v22, -3.4028235e+38  ;;  %v2828_v12 = vmax.f32 %v2736_v42, %v2737_v3  ;;  %v2780_v22 = vrot.slane %v2779_v45, 4 }
 0x67f   :  { %v2756_v42 = vrot.slane %v2755_v48, 1 }
 0x680   :  { %v5779_v46 = vpop.permute.xlu1 %2515  ;;  %v2829_v31 = vrot.slane %v2828_v12, 4  ;;  %v2781_v47 = vmax.f32 %v2779_v45, %v2780_v22 }
 0x681   :  { %v5781_v62 = vpop.permute.xlu0 %2511  ;;  %vm2629_vm7 = vcmp.gt.f32.partialorder %v5779_v46, 0.0  ;;  %v2801_v46 = vrot.slane %v5803_v55, 4 }
 0x682   :  { %vm2628_vm10 = vcmp.gt.f32.partialorder %v5781_v62, 0.0  ;;  %v2725_v24 = vsel %vm2629_vm7, %v6262_v15, -3.4028235e+38  ;;  %v2738_v15 = vsel %vm2642_vm14, %v6279_v25, -3.4028235e+38  ;;  %v2808_v62 = vrot.slane %v5805_v1, 4 }
 0x683   :  { %v2724_v17 = vsel %vm2628_vm10, %v6263_v43, -3.4028235e+38  ;;  %v2821_v43 = vmax.f32 %v2734_v19, %v2735_v23  ;;  %v2835_v59 = vmax.f32 %v2738_v15, %v2739_v60  ;;  %v2760_v25 = vmax.f32 %v5795_v40, %v2759_v52 }
 0x684   :  { %v5785_v6 = vpop.permute.xlu1 %2603  ;;  %v2786_v54 = vmax.f32 %v2724_v17, %v2725_v24  ;;  %v2802_v41 = vmax.f32 %v5803_v55, %v2801_v46  ;;  %v2809_v8 = vmax.f32 %v5805_v1, %v2808_v62  ;;  %v2830_v19 = vmax.f32 %v2828_v12, %v2829_v31 }
 0x685   :  { %v5787_v39 = vpop.permute.xlu0 %2599  ;;  %vm2645_vm15 = vcmp.gt.f32.partialorder %v5785_v6, 0.0  ;;  %v2822_v6 = vrot.slane %v2821_v43, 4  ;;  %v2836_v40 = vrot.slane %v2835_v59, 4  ;;  %v2761_v61 = vrot.slane %v2760_v25, 2 }
 0x686   :  { %vm2644_vm0 = vcmp.gt.f32.partialorder %v5787_v39, 0.0  ;;  %v2741_v53 = vsel %vm2645_vm15, %v6280_v35, -3.4028235e+38  ;;  %v2787_v35 = vrot.slane %v2786_v54, 4  ;;  %v2803_v55 = vrot.slane %v2802_v41, 2 }
 0x687   :  { %v2740_v36 = vsel %vm2644_vm0, %v6284_v44, -3.4028235e+38  ;;  %v2823_v26 = vmax.f32 %v2821_v43, %v2822_v6  ;;  %v2810_v3 = vrot.slane %v2809_v8, 2  ;;  %v2782_v1 = vrot.slane %v2781_v47, 2 }
 0x688   :  { %v2527_v27 = vpop.permute.xlu1 %2526  ;;  %v2842_v18 = vmax.f32 %v2740_v36, %v2741_v53  ;;  %v2762_v5 = vmax.f32 %v2760_v25, %v2761_v61  ;;  %v2831_v10 = vrot.slane %v2830_v19, 2  ;;  %v2804_v20 = vmax.f32 %v2802_v41, %v2803_v55 }
 0x689   :  { %v2523_v16 = vpop.permute.xlu0 %2522  ;;  %vm2631_vm11 = vcmp.gt.f32.partialorder %v2527_v27, 0.0  ;;  %v2788_v27 = vmax.f32 %v2786_v54, %v2787_v35  ;;  %v2824_v24 = vrot.slane %v2823_v26, 2  ;;  %v2811_v2 = vmax.f32 %v2809_v8, %v2810_v3 }
 0x68a   :  { %vm2630_vm6 = vcmp.gt.f32.partialorder %v2523_v16, 0.0  ;;  %v2727_v14 = vsel %vm2631_vm11, %v6264_v30, -3.4028235e+38  ;;  %v2773_v30 = vrot.slane %v2772_v7, 4  ;;  %v2843_v16 = vrot.slane %v2842_v18, 4 }
 0x68b   :  { %v2726_v33 = vsel %vm2630_vm6, %v6265_v29, -3.4028235e+38  ;;  %v6285_v29 = vld [vmem:[#allocation101_spill] sm:$0xff]  ;;  %v2783_v60 = vmax.f32 %v2781_v47, %v2782_v1  ;;  %v2763_v54 = vrot.slane %v2762_v5, 1  ;;  %v2818_v43 = vmax.f32 %v2816_v13, %v2817_v58 }
 0x68c   :  { %v2615_v49 = vpop.permute.xlu1 %2614  ;;  %v2793_v11 = vmax.f32 %v2726_v33, %v2727_v14  ;;  %v2774_v21 = vmax.f32 %v2772_v7, %v2773_v30  ;;  %v2837_v7 = vmax.f32 %v2835_v59, %v2836_v40  ;;  %v2844_v56 = vmax.f32 %v2842_v18, %v2843_v16 }
 0x68d   :  { %v2611_v63 = vpop.permute.xlu0 %2610  ;;  %vm2647_vm8 = vcmp.gt.f32.partialorder %v2615_v49, 0.0  ;;  %v2789_v49 = vrot.slane %v2788_v27, 2  ;;  %v2749_v33 = vrot.slane %v2748_v38, 1  ;;  %v2805_v46 = vrot.slane %v2804_v20, 1 }
 0x68e   :  { %vm2646_vm9 = vcmp.gt.f32.partialorder %v2611_v63, 0.0  ;;  %v2743_v28 = vsel %vm2647_vm8, %v6285_v29, -3.4028235e+38  ;;  %v2794_v39 = vrot.slane %v2793_v11, 4  ;;  %v2775_v23 = vrot.slane %v2774_v21, 2 }
 0x68f   :  { %v2742_v37 = vsel %vm2646_vm9, %v6286_v4, -3.4028235e+38  ;;  %v2769_v63 = vmax.f32 %v2767_v32, %v2768_v50  ;;  %v2838_v15 = vrot.slane %v2837_v7, 2  ;;  %v2790_v53 = vmax.f32 %v2788_v27, %v2789_v49 }
 0x690   :  { %v2849_v9 = vmax.f32 %v2742_v37, %v2743_v28  ;;  %v2795_v52 = vmax.f32 %v2793_v11, %v2794_v39  ;;  %v2776_v45 = vmax.f32 %v2774_v21, %v2775_v23  ;;  %v2845_v44 = vrot.slane %v2844_v56, 2 }
 0x691   :  { %v2770_v36 = vrot.slane %v2769_v63, 1  ;;  %v2825_v11 = vmax.f32 %v2823_v26, %v2824_v24  ;;  %v2750_v29 = vmax.f32 %v2748_v38, %v2749_v33  ;;  %v2757_v28 = vmax.f32 %v2755_v48, %v2756_v42 }
 0x692   :  { %v2850_v0 = vrot.slane %v2849_v9, 4  ;;  %v2796_v17 = vrot.slane %v2795_v52, 2  ;;  %v2777_v4 = vrot.slane %v2776_v45, 1  ;;  %v2832_v37 = vmax.f32 %v2830_v19, %v2831_v10 }
 0x693   :  { %v2812_v62 = vrot.slane %v2811_v2, 1  ;;  %v2784_v22 = vrot.slane %v2783_v60, 1  ;;  %v2839_v59 = vmax.f32 %v2837_v7, %v2838_v15  ;;  %v2764_v25 = vmax.f32 %v2762_v5, %v2763_v54 }
 0x694   :  { %v2851_v14 = vmax.f32 %v2849_v9, %v2850_v0  ;;  %v2797_v30 = vmax.f32 %v2795_v52, %v2796_v17  ;;  %v2819_v34 = vrot.slane %v2818_v43, 1  ;;  %v2791_v35 = vrot.slane %v2790_v53, 1 }
 0x695   :  { %v2846_v18 = vmax.f32 %v2844_v56, %v2845_v44  ;;  %v2771_v32 = vmax.f32 %v2769_v63, %v2770_v36  ;;  %v2826_v6 = vrot.slane %v2825_v11, 1  ;;  %v2886_v57 = vsel %vm2885_vm1, %v2757_v28, %v2750_v29 }
 0x696   :  { %v2852_v12 = vrot.slane %v2851_v14, 2  ;;  %v2798_v39 = vrot.slane %v2797_v30, 1  ;;  %v2778_v51 = vmax.f32 %v2776_v45, %v2777_v4  ;;  %v2833_v21 = vrot.slane %v2832_v37, 1 }
 0x697   :  { %v2806_v31 = vmax.f32 %v2804_v20, %v2805_v46  ;;  %v2813_v41 = vmax.f32 %v2811_v2, %v2812_v62  ;;  %v2785_v8 = vmax.f32 %v2783_v60, %v2784_v22  ;;  %v2840_v47 = vrot.slane %v2839_v59, 1 }
 0x698   :  { %v2853_v9 = vmax.f32 %v2851_v14, %v2852_v12  ;;  %v2888_v40 = vsel %vm2887_vm2, %v2764_v25, %v2886_v57  ;;  %v2820_v61 = vmax.f32 %v2818_v43, %v2819_v34  ;;  %v2792_v13 = vmax.f32 %v2790_v53, %v2791_v35 }
 0x699   :  { %v2847_v27 = vrot.slane %v2846_v18, 1  ;;  %v2827_v16 = vmax.f32 %v2825_v11, %v2826_v6  ;;  %v2799_v26 = vmax.f32 %v2797_v30, %v2798_v39  ;;  %v2890_v52 = vsel %vm2889_vm3, %v2771_v32, %v2888_v40 }
 0x69a   :  { %v2854_v50 = vrot.slane %v2853_v9, 1  ;;  %v2834_v0 = vmax.f32 %v2832_v37, %v2833_v21  ;;  %v2892_v38 = vsel %vm2891_vm4, %v2778_v51, %v2890_v52  ;;  %v2899_v48 = vsel %vm2885_vm1, %v2813_v41, %v2806_v31 }
 0x69b   :  { %v2841_v23 = vmax.f32 %v2839_v59, %v2840_v47  ;;  %v2894_v19 = vsel %vm2893_vm5, %v2785_v8, %v2892_v38  ;;  %v2900_v55 = vsel %vm2887_vm2, %v2820_v61, %v2899_v48  ;;  %v2848_v3 = vmax.f32 %v2846_v18, %v2847_v27 }
 0x69c   :  { %vm6287_vm6 = vcmask 1046534   ;;  %vm6288_vm7 = vcmask 1047559   ;;  %v2855_v58 = vmax.f32 %v2853_v9, %v2854_v50  ;;  %v2901_v49 = vsel %vm2889_vm3, %v2827_v16, %v2900_v55 }
 0x69d   :  { %v2896_v1 = vsel %vm6287_vm6, %v2792_v13, %v2894_v19  ;;  %v2902_v63 = vsel %vm2891_vm4, %v2834_v0, %v2901_v49  ;;  %vm6289_vm1 = vmmov %vm6287_vm6 }
 0x69e   :  { %v2898_v5 = vsel %vm6288_vm7, %v2799_v26, %v2896_v1  ;;  %v2903_v24 = vsel %vm2893_vm5, %v2841_v23, %v2902_v63  ;;  %vm6290_vm11 = vmmov %vm6288_vm7 }
 0x69f   :  { %v2904_v14 = vsel %vm6289_vm1, %v2848_v3, %v2903_v24 }
 0x6a0   :  { %v2905_v33 = vsel %vm6290_vm11, %v2855_v58, %v2904_v14 }
 0x6ba   :  { %v2859_v7 = vpop.xlane.xlu0 %2858 }
 0x6bb   :  { %vm2863_vm10 = vcmp.gt.f32.partialorder %v2859_v7, 0.0 }
 0x6bc   :  { %v2908_v56 = vsel %vm2863_vm10, %v2898_v5, 0.0 }
 0x6bd   :  { %2944 = vst [vmem:[#allocation14 + $0x8] sm:$0xff] %v2908_v56 }
 0x6be   :  { %v2862_v17 = vpop.xlane.xlu1 %2861 }
 0x6bf   :  { %vm2864_vm2 = vcmp.gt.f32.partialorder %v2862_v17, 0.0 }
 0x6c0   :  { %v2909_v42 = vsel %vm2864_vm2, %v2905_v33, 0.0 }
 0x6c1   :  { %2945 = vst [vmem:[#allocation14 + $0x18] sm:$0xff] %v2909_v42 }
 0x6c2   :  { %4183 = shalt.err (!%p4180_p7)
}
 0x6c3   :  { %s4478_s21 = smov 256   ;;  %s4479_s10 = smov 16  }
 0x6c4   :  { %2957 = dma.vmem_to_hbm [thread:$0]  %s2952_s8, 512, %s5881_s11, [#allocation5], %s4478_s21, %s4478_s21, %s4479_s10  }
 0x6c5   :  { %4332 = dma.done.wait [#allocation5], 512  }
 0x6c6   :  { %4333 = vsyncadd [#allocation5], 4294966784 }
 0x6c7   :  { %2961 = vsyncpa [#allocation4], 1 }
 0x6c8   :  { %2962 = vsyncpa [#allocation7], 1 }
 0x6c9   :  { %2963 = vsyncpa [#allocation10], 1 }
 0x6ca   :  { %2964 = vsyncpa [#allocation13], 1 }
 0x6cb   :  { %2965 = vsyncpa [#allocation5], 1 }

</bundles_post_ra>
